<compile_context>
chip_gen: v7x
topology: tpu7x:2x2x1
jax: 0.10.0
libtpu: 0.0.40
codegen_flags: <defaults>
</compile_context>

<pallas_src>
import functools

import jax
import jax.numpy as jnp
from jax.experimental import pallas as pl
from jax.experimental.pallas import tpu as pltpu


# --------------------- head: Pallas matmul + bias (+ReLU) --------------------


def _matmul_bias_kernel(a_ref, w_ref, b_ref, o_ref, *, relu):
    # a_ref: (TM, Kp) bf16   w_ref: (Kp, N) bf16   b_ref: (1, N) f32
    acc = jnp.dot(a_ref[...], w_ref[...], preferred_element_type=jnp.float32)
    acc = acc + b_ref[...]
    if relu:
        acc = jnp.maximum(acc, 0.0)
    o_ref[...] = acc.astype(o_ref.dtype)


def _pick_tile_m(m):
    """Largest power-of-two tile <= 512 dividing m that leaves >= 2 grid steps."""
    tm = 8
    t = 8
    while t <= 512 and m % t == 0 and m // t >= 2:
        tm = t
        t *= 2
    return tm


def matmul_bias(a, w, b, relu, out_dtype=jnp.bfloat16):
    """(M, K) @ (K, N) + b (f32), optional ReLU, tiled over M with Pallas."""
    m, k = a.shape
    k2, n = w.shape
    assert k == k2
    tm = _pick_tile_m(m)
    m_pad = ((m + tm - 1) // tm) * tm
    if m_pad != m:  # never taken for the shapes in this script
        a = jnp.pad(a, ((0, m_pad - m), (0, 0)))
    out = pl.pallas_call(
        functools.partial(_matmul_bias_kernel, relu=relu),
        out_shape=jax.ShapeDtypeStruct((m_pad, n), out_dtype),
        grid_spec=pltpu.PrefetchScalarGridSpec(
            num_scalar_prefetch=0,
            grid=(m_pad // tm,),
            in_specs=[
                pl.BlockSpec((tm, k), lambda i: (i, 0)),
                pl.BlockSpec((k, n), lambda i: (0, 0)),
                pl.BlockSpec((1, n), lambda i: (0, 0)),
            ],
            out_specs=pl.BlockSpec((tm, n), lambda i: (i, 0)),
        ),
        compiler_params=pltpu.CompilerParams(
            dimension_semantics=("parallel",)),
    )(a, w, b.reshape(1, n).astype(jnp.float32))
    if m_pad != m:
        out = out[:m]
    return out


def im2col_bf16(x, k, stride, pad):
    """x: (B,H,W,C) -> A: (B*Ho*Wo, Kp) with Kp = k*k*C rounded up to 128."""
    b, h, w, c = x.shape
    ho = (h + 2 * pad - k) // stride + 1
    wo = (w + 2 * pad - k) // stride + 1
    xp = jnp.pad(x, ((0, 0), (pad, pad), (pad, pad), (0, 0)))
    cols = []
    for kh in range(k):
        for kw in range(k):
            cols.append(jax.lax.slice(
                xp,
                (0, kh, kw, 0),
                (b, kh + stride * (ho - 1) + 1, kw + stride * (wo - 1) + 1, c),
                (1, stride, stride, 1)))
    kdim = k * k * c
    kpad = ((kdim + 127) // 128) * 128
    if kpad != kdim:
        cols.append(jnp.zeros((b, ho, wo, kpad - kdim), x.dtype))
    a = jnp.concatenate(cols, axis=-1).reshape(b * ho * wo, kpad)
    return a, ho, wo, kdim


def conv2d_head(x, w, b, stride, pad, relu):
    """NHWC conv via bf16 im2col + Pallas matmul. w: (k, k, Cin, Cout) f32."""
    bsz = x.shape[0]
    k, _, cin, cout = w.shape
    a, ho, wo, kdim = im2col_bf16(x, k, stride, pad)
    kp = a.shape[1]
    wm = w.reshape(k * k * cin, cout)
    if kp != kdim:
        wm = jnp.pad(wm, ((0, kp - kdim), (0, 0)))
    y = matmul_bias(a, wm.astype(jnp.bfloat16), b, relu)
    return y.reshape(bsz, ho, wo, cout)


# ------------- fused tail: layers 4..8 + spatial mean + *0.01 ----------------


def _conv3x3_s2(x, s, w_ref, b_ref, relu):
    """One 3x3 / stride-2 / pad-1 conv on a single-batch flattened activation.

    x: (s*s, Cin) f32, spatial row-major. Returns ((ho*ho, Cout) f32, ho).
    All indices are Python ints so every gather is a static slice; taps that
    fall entirely in the zero padding are skipped, partial ones use zero rows.
    """
    ho = (s - 1) // 2 + 1
    npos = ho * ho
    cin = x.shape[-1]
    cout = w_ref.shape[-1]
    acc = jnp.zeros((npos, cout), jnp.float32)
    for kh in range(3):
        for kw in range(3):
            rows = []
            any_real = False
            for i in range(ho):
                for j in range(ho):
                    r = 2 * i + kh - 1
                    c = 2 * j + kw - 1
                    if 0 <= r < s and 0 <= c < s:
                        idx = r * s + c
                        rows.append(x[idx:idx + 1, :])
                        any_real = True
                    else:
                        rows.append(jnp.zeros((1, cin), x.dtype))
            if not any_real:
                continue
            xt = rows[0] if len(rows) == 1 else jnp.concatenate(rows, axis=0)
            acc = acc + jnp.dot(xt.astype(jnp.bfloat16), w_ref[kh, kw],
                                preferred_element_type=jnp.float32)
    y = acc + b_ref[...]
    if relu:
        y = jnp.maximum(y, 0.0)
    return y, ho


def _tail_kernel(*refs, s0, n_layers):
    x_ref, o_ref = refs[0], refs[-1]
    x = x_ref[0].astype(jnp.float32)      # (s0*s0, C) for this batch element
    s = s0
    for li in range(n_layers):
        w_ref = refs[1 + 2 * li]
        b_ref = refs[2 + 2 * li]
        relu = li < n_layers - 1
        x, s = _conv3x3_s2(x, s, w_ref, b_ref, relu)
    # global spatial mean per channel (spatial is 1x1 here, kept general) * 0.01
    out = jnp.mean(x, axis=0, keepdims=True) * 0.01       # (1, Cout_last) f32
    o_ref[...] = out.reshape(o_ref.shape)


def tail_fused(x3, tail_ws, tail_bs):
    """Layers 4..8 + spatial mean + *0.01 in one VMEM-resident Pallas kernel."""
    bsz, s, s2, c = x3.shape
    assert s == s2 and s <= 16, "fused tail expects a small spatial extent"
    n_layers = len(tail_ws)
    cl = tail_ws[-1].shape[-1]
    x_flat = x3.reshape(bsz, s * s, c)

    operands = [x_flat]
    in_specs = [pl.BlockSpec((1, s * s, c), lambda bb: (bb, 0, 0))]
    for w, b in zip(tail_ws, tail_bs):
        wb = w.astype(jnp.bfloat16)
        bv = b.reshape(1, -1).astype(jnp.float32)
        operands += [wb, bv]
        in_specs += [
            pl.BlockSpec(wb.shape, lambda bb: (0, 0, 0, 0)),
            pl.BlockSpec(bv.shape, lambda bb: (0, 0)),
        ]

    out = pl.pallas_call(
        functools.partial(_tail_kernel, s0=s, n_layers=n_layers),
        out_shape=jax.ShapeDtypeStruct((bsz, 1, cl), jnp.float32),
        grid_spec=pltpu.PrefetchScalarGridSpec(
            num_scalar_prefetch=0,
            grid=(bsz,),
            in_specs=in_specs,
            out_specs=pl.BlockSpec((1, 1, cl), lambda bb: (bb, 0, 0)),
        ),
        compiler_params=pltpu.CompilerParams(
            dimension_semantics=("parallel",)),
    )(*operands)
    return out                             # (B, 1, 6*(bundle_size-1))


# ------------------------------ model plumbing -------------------------------


def posenet_config(bundle_size):
    return [
        # (cin, cout, kernel, stride, pad, relu)
        (bundle_size * 3, 16, 7, 2, 3, True),
        (16, 32, 5, 2, 2, True),
        (32, 64, 3, 2, 1, True),
        (64, 128, 3, 2, 1, True),
        (128, 256, 3, 2, 1, True),
        (256, 256, 3, 2, 1, True),
        (256, 256, 3, 2, 1, True),
        (256, 6 * (bundle_size - 1), 3, 2, 1, False),
    ]


_N_HEAD = 3   # layers lowered to im2col + Pallas matmul; the rest are fused.


def init_params(key, bundle_size):
    ws, bs = [], []
    for cin, cout, k, _, _, _ in posenet_config(bundle_size):
        key, wk, bk = jax.random.split(key, 3)
        fan_in = cin * k * k
        w = jax.random.normal(wk, (k, k, cin, cout), jnp.float32) * jnp.sqrt(
            2.0 / fan_in)
        b = jax.random.normal(bk, (cout,), jnp.float32) * 0.01
        ws.append(w)
        bs.append(b)
    return ws, bs


@functools.partial(jax.jit, static_argnums=(3,))
def posenet_forward(x_nchw, ws, bs, bundle_size):
    """x_nchw: (B, 3*bundle_size, H, W) -- same layout as the PyTorch module."""
    cfg = posenet_config(bundle_size)
    assert x_nchw.shape[1] == bundle_size * 3
    x = jnp.transpose(x_nchw, (0, 2, 3, 1)).astype(jnp.bfloat16)   # -> NHWC
    for li in range(_N_HEAD):
        _, _, k, s, p, relu = cfg[li]
        x = conv2d_head(x, ws[li], bs[li], s, p, relu)
    for _, _, k, s, p, _ in cfg[_N_HEAD:]:
        assert (k, s, p) == (3, 2, 1)
    p_out = tail_fused(x, ws[_N_HEAD:], bs[_N_HEAD:])   # (B, 1, 6*(bundle-1))
    return p_out.reshape(x_nchw.shape[0], bundle_size - 1, 6)


@functools.partial(jax.jit, static_argnums=(3,))
def reference_forward(x_nchw, ws, bs, bundle_size):
    """Pure-XLA f32 reference matching the PyTorch module semantics."""
    cfg = posenet_config(bundle_size)
    x = jnp.transpose(x_nchw, (0, 2, 3, 1)).astype(jnp.float32)
    for (w, b, (_, _, k, s, p, relu)) in zip(ws, bs, cfg):
        x = jax.lax.conv_general_dilated(
            x, w, (s, s), ((p, p), (p, p)),
            dimension_numbers=("NHWC", "HWIO", "NHWC"))
        x = x + b
        if relu:
            x = jnp.maximum(x, 0.0)
    bsz = x.shape[0]
    c = x.shape[-1]
    p_out = jnp.mean(x.reshape(bsz, -1, c), axis=1) * 0.01
    return p_out.reshape(bsz, bundle_size - 1, 6)


# ----------------------------------- main ------------------------------------

if __name__ == "__main__":
    bundle_size = 2
    key = jax.random.PRNGKey(0)
    key, xk = jax.random.split(key)
    # Input consistent with the module: B=2, C=3*bundle_size=6, H=W=64.
    x = jax.random.normal(xk, (2, bundle_size * 3, 64, 64), jnp.float32)
    ws, bs = init_params(key, bundle_size)

    out = jax.block_until_ready(posenet_forward(x, ws, bs, bundle_size))
    assert out.shape == (2, bundle_size - 1, 6), out.shape
    assert bool(jnp.all(jnp.isfinite(out)))

    ref = jax.block_until_ready(reference_forward(x, ws, bs, bundle_size))
    assert bool(jnp.allclose(out, ref, rtol=0.12, atol=3e-3)), (
        float(jnp.max(jnp.abs(out - ref))))

    print("KERNEL_OK")
</pallas_src>

<mosaic_0001>
module attributes {stable_mosaic.version = 11 : i64} {
  func.func @_matmul_bias_kernel(%arg0: i32, %arg1: memref<512x384xbf16, #tpu.memory_space<vmem>>, %arg2: memref<384x16xbf16, #tpu.memory_space<vmem>>, %arg3: memref<1x16xf32, #tpu.memory_space<vmem>>, %arg4: memref<512x16xbf16, #tpu.memory_space<vmem>>) attributes {dimension_semantics = [#tpu.dimension_semantics<parallel>], iteration_bounds = array<i64: 4>, scalar_prefetch = 0 : i64, scratch_operands = 0 : i64, tpu.core_type = #tpu.core_type<tc>, window_params = [{transform_indices = @transform_0, window_bounds = array<i64: 512, 384>}, {pipeline_mode = #tpu.pipeline_mode<synchronous>, transform_indices = @transform_1, window_bounds = array<i64: 384, 16>}, {pipeline_mode = #tpu.pipeline_mode<synchronous>, transform_indices = @transform_2, window_bounds = array<i64: 1, 16>}, {transform_indices = @transform_3, window_bounds = array<i64: 512, 16>}]} {
    %c0 = arith.constant 0 : index
    %c0_0 = arith.constant 0 : index
    %0 = vector.load %arg1[%c0, %c0_0] : memref<512x384xbf16, #tpu.memory_space<vmem>>, vector<512x384xbf16>
    %c0_1 = arith.constant 0 : index
    %c0_2 = arith.constant 0 : index
    %1 = vector.load %arg2[%c0_1, %c0_2] : memref<384x16xbf16, #tpu.memory_space<vmem>>, vector<384x16xbf16>
    %cst = arith.constant dense<0.000000e+00> : vector<512x16xf32>
    %2 = tpu.matmul %0, %1, %cst {dimension_numbers = #tpu.dot_dimension_numbers<[1], [0], [0], [1], [0, 0, 1, 1], [], []>} : vector<512x384xbf16>, vector<384x16xbf16>, vector<512x16xf32> -> vector<512x16xf32>
    %c0_3 = arith.constant 0 : index
    %c0_4 = arith.constant 0 : index
    %3 = vector.load %arg3[%c0_3, %c0_4] : memref<1x16xf32, #tpu.memory_space<vmem>>, vector<1x16xf32>
    %4 = vector.broadcast %3 : vector<1x16xf32> to vector<512x16xf32>
    %5 = arith.addf %2, %4 : vector<512x16xf32>
    %cst_5 = arith.constant 0.000000e+00 : f32
    %6 = vector.broadcast %cst_5 : f32 to vector<512x16xf32>
    %7 = arith.maximumf %5, %6 : vector<512x16xf32>
    %8 = arith.truncf %7 : vector<512x16xf32> to vector<512x16xbf16>
    %c0_6 = arith.constant 0 : index
    %c0_7 = arith.constant 0 : index
    %9 = vector.load %arg4[%c0_6, %c0_7] : memref<512x16xbf16, #tpu.memory_space<vmem>>, vector<512x16xbf16>
    tpu.vector_store %arg4[%c0_6, %c0_7], %8 {strides = array<i32>} : memref<512x16xbf16, #tpu.memory_space<vmem>>, vector<512x16xbf16>,
    return
  }
  func.func @transform_0(%arg0: i32) -> (i32, i32) {
    %c0_i32 = arith.constant 0 : i32
    %c0_i32_0 = arith.constant 0 : i32
    return %arg0, %c0_i32 : i32, i32
  }
  func.func @transform_1(%arg0: i32) -> (i32, i32) {
    %c0_i32 = arith.constant 0 : i32
    %c0_i32_0 = arith.constant 0 : i32
    %c0_i32_1 = arith.constant 0 : i32
    return %c0_i32, %c0_i32_0 : i32, i32
  }
  func.func @transform_2(%arg0: i32) -> (i32, i32) {
    %c0_i32 = arith.constant 0 : i32
    %c0_i32_0 = arith.constant 0 : i32
    %c0_i32_1 = arith.constant 0 : i32
    return %c0_i32, %c0_i32_0 : i32, i32
  }
  func.func @transform_3(%arg0: i32) -> (i32, i32) {
    %c0_i32 = arith.constant 0 : i32
    %c0_i32_0 = arith.constant 0 : i32
    return %arg0, %c0_i32 : i32, i32
  }
}

module attributes {stable_mosaic.version = 11 : i64} {
  func.func @_matmul_bias_kernel(%arg0: i32, %arg1: memref<256x512xbf16, #tpu.memory_space<vmem>>, %arg2: memref<512x32xbf16, #tpu.memory_space<vmem>>, %arg3: memref<1x32xf32, #tpu.memory_space<vmem>>, %arg4: memref<256x32xbf16, #tpu.memory_space<vmem>>) attributes {dimension_semantics = [#tpu.dimension_semantics<parallel>], iteration_bounds = array<i64: 2>, scalar_prefetch = 0 : i64, scratch_operands = 0 : i64, tpu.core_type = #tpu.core_type<tc>, window_params = [{transform_indices = @transform_0, window_bounds = array<i64: 256, 512>}, {pipeline_mode = #tpu.pipeline_mode<synchronous>, transform_indices = @transform_1, window_bounds = array<i64: 512, 32>}, {pipeline_mode = #tpu.pipeline_mode<synchronous>, transform_indices = @transform_2, window_bounds = array<i64: 1, 32>}, {transform_indices = @transform_3, window_bounds = array<i64: 256, 32>}]} {
    %c0 = arith.constant 0 : index
    %c0_0 = arith.constant 0 : index
    %0 = vector.load %arg1[%c0, %c0_0] : memref<256x512xbf16, #tpu.memory_space<vmem>>, vector<256x512xbf16>
    %c0_1 = arith.constant 0 : index
    %c0_2 = arith.constant 0 : index
    %1 = vector.load %arg2[%c0_1, %c0_2] : memref<512x32xbf16, #tpu.memory_space<vmem>>, vector<512x32xbf16>
    %cst = arith.constant dense<0.000000e+00> : vector<256x32xf32>
    %2 = tpu.matmul %0, %1, %cst {dimension_numbers = #tpu.dot_dimension_numbers<[1], [0], [0], [1], [0, 0, 1, 1], [], []>} : vector<256x512xbf16>, vector<512x32xbf16>, vector<256x32xf32> -> vector<256x32xf32>
    %c0_3 = arith.constant 0 : index
    %c0_4 = arith.constant 0 : index
    %3 = vector.load %arg3[%c0_3, %c0_4] : memref<1x32xf32, #tpu.memory_space<vmem>>, vector<1x32xf32>
    %4 = vector.broadcast %3 : vector<1x32xf32> to vector<256x32xf32>
    %5 = arith.addf %2, %4 : vector<256x32xf32>
    %cst_5 = arith.constant 0.000000e+00 : f32
    %6 = vector.broadcast %cst_5 : f32 to vector<256x32xf32>
    %7 = arith.maximumf %5, %6 : vector<256x32xf32>
    %8 = arith.truncf %7 : vector<256x32xf32> to vector<256x32xbf16>
    %c0_6 = arith.constant 0 : index
    %c0_7 = arith.constant 0 : index
    %9 = vector.load %arg4[%c0_6, %c0_7] : memref<256x32xbf16, #tpu.memory_space<vmem>>, vector<256x32xbf16>
    tpu.vector_store %arg4[%c0_6, %c0_7], %8 {strides = array<i32>} : memref<256x32xbf16, #tpu.memory_space<vmem>>, vector<256x32xbf16>,
    return
  }
  func.func @transform_0(%arg0: i32) -> (i32, i32) {
    %c0_i32 = arith.constant 0 : i32
    %c0_i32_0 = arith.constant 0 : i32
    return %arg0, %c0_i32 : i32, i32
  }
  func.func @transform_1(%arg0: i32) -> (i32, i32) {
    %c0_i32 = arith.constant 0 : i32
    %c0_i32_0 = arith.constant 0 : i32
    %c0_i32_1 = arith.constant 0 : i32
    return %c0_i32, %c0_i32_0 : i32, i32
  }
  func.func @transform_2(%arg0: i32) -> (i32, i32) {
    %c0_i32 = arith.constant 0 : i32
    %c0_i32_0 = arith.constant 0 : i32
    %c0_i32_1 = arith.constant 0 : i32
    return %c0_i32, %c0_i32_0 : i32, i32
  }
  func.func @transform_3(%arg0: i32) -> (i32, i32) {
    %c0_i32 = arith.constant 0 : i32
    %c0_i32_0 = arith.constant 0 : i32
    return %arg0, %c0_i32 : i32, i32
  }
}

module attributes {stable_mosaic.version = 11 : i64} {
  func.func @_matmul_bias_kernel(%arg0: i32, %arg1: memref<64x384xbf16, #tpu.memory_space<vmem>>, %arg2: memref<384x64xbf16, #tpu.memory_space<vmem>>, %arg3: memref<1x64xf32, #tpu.memory_space<vmem>>, %arg4: memref<64x64xbf16, #tpu.memory_space<vmem>>) attributes {dimension_semantics = [#tpu.dimension_semantics<parallel>], iteration_bounds = array<i64: 2>, scalar_prefetch = 0 : i64, scratch_operands = 0 : i64, tpu.core_type = #tpu.core_type<tc>, window_params = [{transform_indices = @transform_0, window_bounds = array<i64: 64, 384>}, {pipeline_mode = #tpu.pipeline_mode<synchronous>, transform_indices = @transform_1, window_bounds = array<i64: 384, 64>}, {pipeline_mode = #tpu.pipeline_mode<synchronous>, transform_indices = @transform_2, window_bounds = array<i64: 1, 64>}, {transform_indices = @transform_3, window_bounds = array<i64: 64, 64>}]} {
    %c0 = arith.constant 0 : index
    %c0_0 = arith.constant 0 : index
    %0 = vector.load %arg1[%c0, %c0_0] : memref<64x384xbf16, #tpu.memory_space<vmem>>, vector<64x384xbf16>
    %c0_1 = arith.constant 0 : index
    %c0_2 = arith.constant 0 : index
    %1 = vector.load %arg2[%c0_1, %c0_2] : memref<384x64xbf16, #tpu.memory_space<vmem>>, vector<384x64xbf16>
    %cst = arith.constant dense<0.000000e+00> : vector<64x64xf32>
    %2 = tpu.matmul %0, %1, %cst {dimension_numbers = #tpu.dot_dimension_numbers<[1], [0], [0], [1], [0, 0, 1, 1], [], []>} : vector<64x384xbf16>, vector<384x64xbf16>, vector<64x64xf32> -> vector<64x64xf32>
    %c0_3 = arith.constant 0 : index
    %c0_4 = arith.constant 0 : index
    %3 = vector.load %arg3[%c0_3, %c0_4] : memref<1x64xf32, #tpu.memory_space<vmem>>, vector<1x64xf32>
    %4 = vector.broadcast %3 : vector<1x64xf32> to vector<64x64xf32>
    %5 = arith.addf %2, %4 : vector<64x64xf32>
    %cst_5 = arith.constant 0.000000e+00 : f32
    %6 = vector.broadcast %cst_5 : f32 to vector<64x64xf32>
    %7 = arith.maximumf %5, %6 : vector<64x64xf32>
    %8 = arith.truncf %7 : vector<64x64xf32> to vector<64x64xbf16>
    %c0_6 = arith.constant 0 : index
    %c0_7 = arith.constant 0 : index
    %9 = vector.load %arg4[%c0_6, %c0_7] : memref<64x64xbf16, #tpu.memory_space<vmem>>, vector<64x64xbf16>
    tpu.vector_store %arg4[%c0_6, %c0_7], %8 {strides = array<i32>} : memref<64x64xbf16, #tpu.memory_space<vmem>>, vector<64x64xbf16>,
    return
  }
  func.func @transform_0(%arg0: i32) -> (i32, i32) {
    %c0_i32 = arith.constant 0 : i32
    %c0_i32_0 = arith.constant 0 : i32
    return %arg0, %c0_i32 : i32, i32
  }
  func.func @transform_1(%arg0: i32) -> (i32, i32) {
    %c0_i32 = arith.constant 0 : i32
    %c0_i32_0 = arith.constant 0 : i32
    %c0_i32_1 = arith.constant 0 : i32
    return %c0_i32, %c0_i32_0 : i32, i32
  }
  func.func @transform_2(%arg0: i32) -> (i32, i32) {
    %c0_i32 = arith.constant 0 : i32
    %c0_i32_0 = arith.constant 0 : i32
    %c0_i32_1 = arith.constant 0 : i32
    return %c0_i32, %c0_i32_0 : i32, i32
  }
  func.func @transform_3(%arg0: i32) -> (i32, i32) {
    %c0_i32 = arith.constant 0 : i32
    %c0_i32_0 = arith.constant 0 : i32
    return %arg0, %c0_i32 : i32, i32
  }
}

module attributes {stable_mosaic.version = 11 : i64} {
  func.func @_tail_kernel(%arg0: i32, %arg1: memref<1x64x64xbf16, #tpu.memory_space<vmem>>, %arg2: memref<3x3x64x128xbf16, #tpu.memory_space<vmem>>, %arg3: memref<1x128xf32, #tpu.memory_space<vmem>>, %arg4: memref<3x3x128x256xbf16, #tpu.memory_space<vmem>>, %arg5: memref<1x256xf32, #tpu.memory_space<vmem>>, %arg6: memref<3x3x256x256xbf16, #tpu.memory_space<vmem>>, %arg7: memref<1x256xf32, #tpu.memory_space<vmem>>, %arg8: memref<3x3x256x256xbf16, #tpu.memory_space<vmem>>, %arg9: memref<1x256xf32, #tpu.memory_space<vmem>>, %arg10: memref<3x3x256x6xbf16, #tpu.memory_space<vmem>>, %arg11: memref<1x6xf32, #tpu.memory_space<vmem>>, %arg12: memref<1x1x6xf32, #tpu.memory_space<vmem>>) attributes {dimension_semantics = [#tpu.dimension_semantics<parallel>], iteration_bounds = array<i64: 2>, scalar_prefetch = 0 : i64, scratch_operands = 0 : i64, tpu.core_type = #tpu.core_type<tc>, window_params = [{transform_indices = @transform_0, window_bounds = array<i64: 1, 64, 64>}, {pipeline_mode = #tpu.pipeline_mode<synchronous>, transform_indices = @transform_1, window_bounds = array<i64: 3, 3, 64, 128>}, {pipeline_mode = #tpu.pipeline_mode<synchronous>, transform_indices = @transform_2, window_bounds = array<i64: 1, 128>}, {pipeline_mode = #tpu.pipeline_mode<synchronous>, transform_indices = @transform_3, window_bounds = array<i64: 3, 3, 128, 256>}, {pipeline_mode = #tpu.pipeline_mode<synchronous>, transform_indices = @transform_4, window_bounds = array<i64: 1, 256>}, {pipeline_mode = #tpu.pipeline_mode<synchronous>, transform_indices = @transform_5, window_bounds = array<i64: 3, 3, 256, 256>}, {pipeline_mode = #tpu.pipeline_mode<synchronous>, transform_indices = @transform_6, window_bounds = array<i64: 1, 256>}, {pipeline_mode = #tpu.pipeline_mode<synchronous>, transform_indices = @transform_7, window_bounds = array<i64: 3, 3, 256, 256>}, {pipeline_mode = #tpu.pipeline_mode<synchronous>, transform_indices = @transform_8, window_bounds = array<i64: 1, 256>}, {pipeline_mode = #tpu.pipeline_mode<synchronous>, transform_indices = @transform_9, window_bounds = array<i64: 3, 3, 256, 6>}, {pipeline_mode = #tpu.pipeline_mode<synchronous>, transform_indices = @transform_10, window_bounds = array<i64: 1, 6>}, {transform_indices = @transform_11, window_bounds = array<i64: 1, 1, 6>}]} {
    %c0 = arith.constant 0 : index
    %c0_0 = arith.constant 0 : index
    %c0_1 = arith.constant 0 : index
    %0 = vector.load %arg1[%c0, %c0_0, %c0_1] : memref<1x64x64xbf16, #tpu.memory_space<vmem>>, vector<1x64x64xbf16>
    %1 = vector.shape_cast %0 : vector<1x64x64xbf16> to vector<64x64xbf16>
    %2 = arith.extf %1 : vector<64x64xbf16> to vector<64x64xf32>
    %cst = arith.constant 0.000000e+00 : f32
    %3 = vector.broadcast %cst : f32 to vector<16x128xf32>
    %cst_2 = arith.constant 0.000000e+00 : f32
    %4 = vector.broadcast %cst_2 : f32 to vector<1x64xf32>
    %cst_3 = arith.constant 0.000000e+00 : f32
    %5 = vector.broadcast %cst_3 : f32 to vector<1x64xf32>
    %cst_4 = arith.constant 0.000000e+00 : f32
    %6 = vector.broadcast %cst_4 : f32 to vector<1x64xf32>
    %cst_5 = arith.constant 0.000000e+00 : f32
    %7 = vector.broadcast %cst_5 : f32 to vector<1x64xf32>
    %cst_6 = arith.constant 0.000000e+00 : f32
    %8 = vector.broadcast %cst_6 : f32 to vector<1x64xf32>
    %9 = vector.extract_strided_slice %2 {offsets = [9, 0], sizes = [1, 64], strides = [1, 1]} : vector<64x64xf32> to vector<1x64xf32>
    %10 = vector.extract_strided_slice %2 {offsets = [11, 0], sizes = [1, 64], strides = [1, 1]} : vector<64x64xf32> to vector<1x64xf32>
    %11 = vector.extract_strided_slice %2 {offsets = [13, 0], sizes = [1, 64], strides = [1, 1]} : vector<64x64xf32> to vector<1x64xf32>
    %cst_7 = arith.constant 0.000000e+00 : f32
    %12 = vector.broadcast %cst_7 : f32 to vector<1x64xf32>
    %13 = vector.extract_strided_slice %2 {offsets = [25, 0], sizes = [1, 64], strides = [1, 1]} : vector<64x64xf32> to vector<1x64xf32>
    %14 = vector.extract_strided_slice %2 {offsets = [27, 0], sizes = [1, 64], strides = [1, 1]} : vector<64x64xf32> to vector<1x64xf32>
    %15 = vector.extract_strided_slice %2 {offsets = [29, 0], sizes = [1, 64], strides = [1, 1]} : vector<64x64xf32> to vector<1x64xf32>
    %cst_8 = arith.constant 0.000000e+00 : f32
    %16 = vector.broadcast %cst_8 : f32 to vector<1x64xf32>
    %17 = vector.extract_strided_slice %2 {offsets = [41, 0], sizes = [1, 64], strides = [1, 1]} : vector<64x64xf32> to vector<1x64xf32>
    %18 = vector.extract_strided_slice %2 {offsets = [43, 0], sizes = [1, 64], strides = [1, 1]} : vector<64x64xf32> to vector<1x64xf32>
    %19 = vector.extract_strided_slice %2 {offsets = [45, 0], sizes = [1, 64], strides = [1, 1]} : vector<64x64xf32> to vector<1x64xf32>
    %20 = tpu.concatenate %4, %5, %6, %7, %8, %9, %10, %11, %12, %13, %14, %15, %16, %17, %18, %19 in 0 : vector<1x64xf32>, vector<1x64xf32>, vector<1x64xf32>, vector<1x64xf32>, vector<1x64xf32>, vector<1x64xf32>, vector<1x64xf32>, vector<1x64xf32>, vector<1x64xf32>, vector<1x64xf32>, vector<1x64xf32>, vector<1x64xf32>, vector<1x64xf32>, vector<1x64xf32>, vector<1x64xf32>, vector<1x64xf32> -> vector<16x64xf32>
    %21 = arith.truncf %20 : vector<16x64xf32> to vector<16x64xbf16>
    %c0_9 = arith.constant 0 : index
    %c0_10 = arith.constant 0 : index
    %c0_11 = arith.constant 0 : index
    %c0_12 = arith.constant 0 : index
    %22 = vector.load %arg2[%c0_9, %c0_10, %c0_11, %c0_12] : memref<3x3x64x128xbf16, #tpu.memory_space<vmem>>, vector<1x1x64x128xbf16>
    %23 = vector.shape_cast %22 : vector<1x1x64x128xbf16> to vector<64x128xbf16>
    %cst_13 = arith.constant dense<0.000000e+00> : vector<16x128xf32>
    %24 = tpu.matmul %21, %23, %cst_13 {dimension_numbers = #tpu.dot_dimension_numbers<[1], [0], [0], [1], [0, 0, 1, 1], [], []>} : vector<16x64xbf16>, vector<64x128xbf16>, vector<16x128xf32> -> vector<16x128xf32>
    %25 = arith.addf %3, %24 : vector<16x128xf32>
    %cst_14 = arith.constant 0.000000e+00 : f32
    %26 = vector.broadcast %cst_14 : f32 to vector<1x64xf32>
    %cst_15 = arith.constant 0.000000e+00 : f32
    %27 = vector.broadcast %cst_15 : f32 to vector<1x64xf32>
    %cst_16 = arith.constant 0.000000e+00 : f32
    %28 = vector.broadcast %cst_16 : f32 to vector<1x64xf32>
    %cst_17 = arith.constant 0.000000e+00 : f32
    %29 = vector.broadcast %cst_17 : f32 to vector<1x64xf32>
    %30 = vector.extract_strided_slice %2 {offsets = [8, 0], sizes = [1, 64], strides = [1, 1]} : vector<64x64xf32> to vector<1x64xf32>
    %31 = vector.extract_strided_slice %2 {offsets = [10, 0], sizes = [1, 64], strides = [1, 1]} : vector<64x64xf32> to vector<1x64xf32>
    %32 = vector.extract_strided_slice %2 {offsets = [12, 0], sizes = [1, 64], strides = [1, 1]} : vector<64x64xf32> to vector<1x64xf32>
    %33 = vector.extract_strided_slice %2 {offsets = [14, 0], sizes = [1, 64], strides = [1, 1]} : vector<64x64xf32> to vector<1x64xf32>
    %34 = vector.extract_strided_slice %2 {offsets = [24, 0], sizes = [1, 64], strides = [1, 1]} : vector<64x64xf32> to vector<1x64xf32>
    %35 = vector.extract_strided_slice %2 {offsets = [26, 0], sizes = [1, 64], strides = [1, 1]} : vector<64x64xf32> to vector<1x64xf32>
    %36 = vector.extract_strided_slice %2 {offsets = [28, 0], sizes = [1, 64], strides = [1, 1]} : vector<64x64xf32> to vector<1x64xf32>
    %37 = vector.extract_strided_slice %2 {offsets = [30, 0], sizes = [1, 64], strides = [1, 1]} : vector<64x64xf32> to vector<1x64xf32>
    %38 = vector.extract_strided_slice %2 {offsets = [40, 0], sizes = [1, 64], strides = [1, 1]} : vector<64x64xf32> to vector<1x64xf32>
    %39 = vector.extract_strided_slice %2 {offsets = [42, 0], sizes = [1, 64], strides = [1, 1]} : vector<64x64xf32> to vector<1x64xf32>
    %40 = vector.extract_strided_slice %2 {offsets = [44, 0], sizes = [1, 64], strides = [1, 1]} : vector<64x64xf32> to vector<1x64xf32>
    %41 = vector.extract_strided_slice %2 {offsets = [46, 0], sizes = [1, 64], strides = [1, 1]} : vector<64x64xf32> to vector<1x64xf32>
    %42 = tpu.concatenate %26, %27, %28, %29, %30, %31, %32, %33, %34, %35, %36, %37, %38, %39, %40, %41 in 0 : vector<1x64xf32>, vector<1x64xf32>, vector<1x64xf32>, vector<1x64xf32>, vector<1x64xf32>, vector<1x64xf32>, vector<1x64xf32>, vector<1x64xf32>, vector<1x64xf32>, vector<1x64xf32>, vector<1x64xf32>, vector<1x64xf32>, vector<1x64xf32>, vector<1x64xf32>, vector<1x64xf32>, vector<1x64xf32> -> vector<16x64xf32>
    %43 = arith.truncf %42 : vector<16x64xf32> to vector<16x64xbf16>
    %c0_18 = arith.constant 0 : index
    %c1 = arith.constant 1 : index
    %c0_19 = arith.constant 0 : index
    %c0_20 = arith.constant 0 : index
    %44 = vector.load %arg2[%c0_18, %c1, %c0_19, %c0_20] : memref<3x3x64x128xbf16, #tpu.memory_space<vmem>>, vector<1x1x64x128xbf16>
    %45 = vector.shape_cast %44 : vector<1x1x64x128xbf16> to vector<64x128xbf16>
    %cst_21 = arith.constant dense<0.000000e+00> : vector<16x128xf32>
    %46 = tpu.matmul %43, %45, %cst_21 {dimension_numbers = #tpu.dot_dimension_numbers<[1], [0], [0], [1], [0, 0, 1, 1], [], []>} : vector<16x64xbf16>, vector<64x128xbf16>, vector<16x128xf32> -> vector<16x128xf32>
    %47 = arith.addf %25, %46 : vector<16x128xf32>
    %cst_22 = arith.constant 0.000000e+00 : f32
    %48 = vector.broadcast %cst_22 : f32 to vector<1x64xf32>
    %cst_23 = arith.constant 0.000000e+00 : f32
    %49 = vector.broadcast %cst_23 : f32 to vector<1x64xf32>
    %cst_24 = arith.constant 0.000000e+00 : f32
    %50 = vector.broadcast %cst_24 : f32 to vector<1x64xf32>
    %cst_25 = arith.constant 0.000000e+00 : f32
    %51 = vector.broadcast %cst_25 : f32 to vector<1x64xf32>
    %52 = vector.extract_strided_slice %2 {offsets = [9, 0], sizes = [1, 64], strides = [1, 1]} : vector<64x64xf32> to vector<1x64xf32>
    %53 = vector.extract_strided_slice %2 {offsets = [11, 0], sizes = [1, 64], strides = [1, 1]} : vector<64x64xf32> to vector<1x64xf32>
    %54 = vector.extract_strided_slice %2 {offsets = [13, 0], sizes = [1, 64], strides = [1, 1]} : vector<64x64xf32> to vector<1x64xf32>
    %55 = vector.extract_strided_slice %2 {offsets = [15, 0], sizes = [1, 64], strides = [1, 1]} : vector<64x64xf32> to vector<1x64xf32>
    %56 = vector.extract_strided_slice %2 {offsets = [25, 0], sizes = [1, 64], strides = [1, 1]} : vector<64x64xf32> to vector<1x64xf32>
    %57 = vector.extract_strided_slice %2 {offsets = [27, 0], sizes = [1, 64], strides = [1, 1]} : vector<64x64xf32> to vector<1x64xf32>
    %58 = vector.extract_strided_slice %2 {offsets = [29, 0], sizes = [1, 64], strides = [1, 1]} : vector<64x64xf32> to vector<1x64xf32>
    %59 = vector.extract_strided_slice %2 {offsets = [31, 0], sizes = [1, 64], strides = [1, 1]} : vector<64x64xf32> to vector<1x64xf32>
    %60 = vector.extract_strided_slice %2 {offsets = [41, 0], sizes = [1, 64], strides = [1, 1]} : vector<64x64xf32> to vector<1x64xf32>
    %61 = vector.extract_strided_slice %2 {offsets = [43, 0], sizes = [1, 64], strides = [1, 1]} : vector<64x64xf32> to vector<1x64xf32>
    %62 = vector.extract_strided_slice %2 {offsets = [45, 0], sizes = [1, 64], strides = [1, 1]} : vector<64x64xf32> to vector<1x64xf32>
    %63 = vector.extract_strided_slice %2 {offsets = [47, 0], sizes = [1, 64], strides = [1, 1]} : vector<64x64xf32> to vector<1x64xf32>
    %64 = tpu.concatenate %48, %49, %50, %51, %52, %53, %54, %55, %56, %57, %58, %59, %60, %61, %62, %63 in 0 : vector<1x64xf32>, vector<1x64xf32>, vector<1x64xf32>, vector<1x64xf32>, vector<1x64xf32>, vector<1x64xf32>, vector<1x64xf32>, vector<1x64xf32>, vector<1x64xf32>, vector<1x64xf32>, vector<1x64xf32>, vector<1x64xf32>, vector<1x64xf32>, vector<1x64xf32>, vector<1x64xf32>, vector<1x64xf32> -> vector<16x64xf32>
    %65 = arith.truncf %64 : vector<16x64xf32> to vector<16x64xbf16>
    %c0_26 = arith.constant 0 : index
    %c2 = arith.constant 2 : index
    %c0_27 = arith.constant 0 : index
    %c0_28 = arith.constant 0 : index
    %66 = vector.load %arg2[%c0_26, %c2, %c0_27, %c0_28] : memref<3x3x64x128xbf16, #tpu.memory_space<vmem>>, vector<1x1x64x128xbf16>
    %67 = vector.shape_cast %66 : vector<1x1x64x128xbf16> to vector<64x128xbf16>
    %cst_29 = arith.constant dense<0.000000e+00> : vector<16x128xf32>
    %68 = tpu.matmul %65, %67, %cst_29 {dimension_numbers = #tpu.dot_dimension_numbers<[1], [0], [0], [1], [0, 0, 1, 1], [], []>} : vector<16x64xbf16>, vector<64x128xbf16>, vector<16x128xf32> -> vector<16x128xf32>
    %69 = arith.addf %47, %68 : vector<16x128xf32>
    %cst_30 = arith.constant 0.000000e+00 : f32
    %70 = vector.broadcast %cst_30 : f32 to vector<1x64xf32>
    %71 = vector.extract_strided_slice %2 {offsets = [1, 0], sizes = [1, 64], strides = [1, 1]} : vector<64x64xf32> to vector<1x64xf32>
    %72 = vector.extract_strided_slice %2 {offsets = [3, 0], sizes = [1, 64], strides = [1, 1]} : vector<64x64xf32> to vector<1x64xf32>
    %73 = vector.extract_strided_slice %2 {offsets = [5, 0], sizes = [1, 64], strides = [1, 1]} : vector<64x64xf32> to vector<1x64xf32>
    %cst_31 = arith.constant 0.000000e+00 : f32
    %74 = vector.broadcast %cst_31 : f32 to vector<1x64xf32>
    %75 = vector.extract_strided_slice %2 {offsets = [17, 0], sizes = [1, 64], strides = [1, 1]} : vector<64x64xf32> to vector<1x64xf32>
    %76 = vector.extract_strided_slice %2 {offsets = [19, 0], sizes = [1, 64], strides = [1, 1]} : vector<64x64xf32> to vector<1x64xf32>
    %77 = vector.extract_strided_slice %2 {offsets = [21, 0], sizes = [1, 64], strides = [1, 1]} : vector<64x64xf32> to vector<1x64xf32>
    %cst_32 = arith.constant 0.000000e+00 : f32
    %78 = vector.broadcast %cst_32 : f32 to vector<1x64xf32>
    %79 = vector.extract_strided_slice %2 {offsets = [33, 0], sizes = [1, 64], strides = [1, 1]} : vector<64x64xf32> to vector<1x64xf32>
    %80 = vector.extract_strided_slice %2 {offsets = [35, 0], sizes = [1, 64], strides = [1, 1]} : vector<64x64xf32> to vector<1x64xf32>
    %81 = vector.extract_strided_slice %2 {offsets = [37, 0], sizes = [1, 64], strides = [1, 1]} : vector<64x64xf32> to vector<1x64xf32>
    %cst_33 = arith.constant 0.000000e+00 : f32
    %82 = vector.broadcast %cst_33 : f32 to vector<1x64xf32>
    %83 = vector.extract_strided_slice %2 {offsets = [49, 0], sizes = [1, 64], strides = [1, 1]} : vector<64x64xf32> to vector<1x64xf32>
    %84 = vector.extract_strided_slice %2 {offsets = [51, 0], sizes = [1, 64], strides = [1, 1]} : vector<64x64xf32> to vector<1x64xf32>
    %85 = vector.extract_strided_slice %2 {offsets = [53, 0], sizes = [1, 64], strides = [1, 1]} : vector<64x64xf32> to vector<1x64xf32>
    %86 = tpu.concatenate %70, %71, %72, %73, %74, %75, %76, %77, %78, %79, %80, %81, %82, %83, %84, %85 in 0 : vector<1x64xf32>, vector<1x64xf32>, vector<1x64xf32>, vector<1x64xf32>, vector<1x64xf32>, vector<1x64xf32>, vector<1x64xf32>, vector<1x64xf32>, vector<1x64xf32>, vector<1x64xf32>, vector<1x64xf32>, vector<1x64xf32>, vector<1x64xf32>, vector<1x64xf32>, vector<1x64xf32>, vector<1x64xf32> -> vector<16x64xf32>
    %87 = arith.truncf %86 : vector<16x64xf32> to vector<16x64xbf16>
    %c1_34 = arith.constant 1 : index
    %c0_35 = arith.constant 0 : index
    %c0_36 = arith.constant 0 : index
    %c0_37 = arith.constant 0 : index
    %88 = vector.load %arg2[%c1_34, %c0_35, %c0_36, %c0_37] : memref<3x3x64x128xbf16, #tpu.memory_space<vmem>>, vector<1x1x64x128xbf16>
    %89 = vector.shape_cast %88 : vector<1x1x64x128xbf16> to vector<64x128xbf16>
    %cst_38 = arith.constant dense<0.000000e+00> : vector<16x128xf32>
    %90 = tpu.matmul %87, %89, %cst_38 {dimension_numbers = #tpu.dot_dimension_numbers<[1], [0], [0], [1], [0, 0, 1, 1], [], []>} : vector<16x64xbf16>, vector<64x128xbf16>, vector<16x128xf32> -> vector<16x128xf32>
    %91 = arith.addf %69, %90 : vector<16x128xf32>
    %92 = vector.extract_strided_slice %2 {offsets = [0, 0], sizes = [1, 64], strides = [1, 1]} : vector<64x64xf32> to vector<1x64xf32>
    %93 = vector.extract_strided_slice %2 {offsets = [2, 0], sizes = [1, 64], strides = [1, 1]} : vector<64x64xf32> to vector<1x64xf32>
    %94 = vector.extract_strided_slice %2 {offsets = [4, 0], sizes = [1, 64], strides = [1, 1]} : vector<64x64xf32> to vector<1x64xf32>
    %95 = vector.extract_strided_slice %2 {offsets = [6, 0], sizes = [1, 64], strides = [1, 1]} : vector<64x64xf32> to vector<1x64xf32>
    %96 = vector.extract_strided_slice %2 {offsets = [16, 0], sizes = [1, 64], strides = [1, 1]} : vector<64x64xf32> to vector<1x64xf32>
    %97 = vector.extract_strided_slice %2 {offsets = [18, 0], sizes = [1, 64], strides = [1, 1]} : vector<64x64xf32> to vector<1x64xf32>
    %98 = vector.extract_strided_slice %2 {offsets = [20, 0], sizes = [1, 64], strides = [1, 1]} : vector<64x64xf32> to vector<1x64xf32>
    %99 = vector.extract_strided_slice %2 {offsets = [22, 0], sizes = [1, 64], strides = [1, 1]} : vector<64x64xf32> to vector<1x64xf32>
    %100 = vector.extract_strided_slice %2 {offsets = [32, 0], sizes = [1, 64], strides = [1, 1]} : vector<64x64xf32> to vector<1x64xf32>
    %101 = vector.extract_strided_slice %2 {offsets = [34, 0], sizes = [1, 64], strides = [1, 1]} : vector<64x64xf32> to vector<1x64xf32>
    %102 = vector.extract_strided_slice %2 {offsets = [36, 0], sizes = [1, 64], strides = [1, 1]} : vector<64x64xf32> to vector<1x64xf32>
    %103 = vector.extract_strided_slice %2 {offsets = [38, 0], sizes = [1, 64], strides = [1, 1]} : vector<64x64xf32> to vector<1x64xf32>
    %104 = vector.extract_strided_slice %2 {offsets = [48, 0], sizes = [1, 64], strides = [1, 1]} : vector<64x64xf32> to vector<1x64xf32>
    %105 = vector.extract_strided_slice %2 {offsets = [50, 0], sizes = [1, 64], strides = [1, 1]} : vector<64x64xf32> to vector<1x64xf32>
    %106 = vector.extract_strided_slice %2 {offsets = [52, 0], sizes = [1, 64], strides = [1, 1]} : vector<64x64xf32> to vector<1x64xf32>
    %107 = vector.extract_strided_slice %2 {offsets = [54, 0], sizes = [1, 64], strides = [1, 1]} : vector<64x64xf32> to vector<1x64xf32>
    %108 = tpu.concatenate %92, %93, %94, %95, %96, %97, %98, %99, %100, %101, %102, %103, %104, %105, %106, %107 in 0 : vector<1x64xf32>, vector<1x64xf32>, vector<1x64xf32>, vector<1x64xf32>, vector<1x64xf32>, vector<1x64xf32>, vector<1x64xf32>, vector<1x64xf32>, vector<1x64xf32>, vector<1x64xf32>, vector<1x64xf32>, vector<1x64xf32>, vector<1x64xf32>, vector<1x64xf32>, vector<1x64xf32>, vector<1x64xf32> -> vector<16x64xf32>
    %109 = arith.truncf %108 : vector<16x64xf32> to vector<16x64xbf16>
    %c1_39 = arith.constant 1 : index
    %c1_40 = arith.constant 1 : index
    %c0_41 = arith.constant 0 : index
    %c0_42 = arith.constant 0 : index
    %110 = vector.load %arg2[%c1_39, %c1_40, %c0_41, %c0_42] : memref<3x3x64x128xbf16, #tpu.memory_space<vmem>>, vector<1x1x64x128xbf16>
    %111 = vector.shape_cast %110 : vector<1x1x64x128xbf16> to vector<64x128xbf16>
    %cst_43 = arith.constant dense<0.000000e+00> : vector<16x128xf32>
    %112 = tpu.matmul %109, %111, %cst_43 {dimension_numbers = #tpu.dot_dimension_numbers<[1], [0], [0], [1], [0, 0, 1, 1], [], []>} : vector<16x64xbf16>, vector<64x128xbf16>, vector<16x128xf32> -> vector<16x128xf32>
    %113 = arith.addf %91, %112 : vector<16x128xf32>
    %114 = vector.extract_strided_slice %2 {offsets = [1, 0], sizes = [1, 64], strides = [1, 1]} : vector<64x64xf32> to vector<1x64xf32>
    %115 = vector.extract_strided_slice %2 {offsets = [3, 0], sizes = [1, 64], strides = [1, 1]} : vector<64x64xf32> to vector<1x64xf32>
    %116 = vector.extract_strided_slice %2 {offsets = [5, 0], sizes = [1, 64], strides = [1, 1]} : vector<64x64xf32> to vector<1x64xf32>
    %117 = vector.extract_strided_slice %2 {offsets = [7, 0], sizes = [1, 64], strides = [1, 1]} : vector<64x64xf32> to vector<1x64xf32>
    %118 = vector.extract_strided_slice %2 {offsets = [17, 0], sizes = [1, 64], strides = [1, 1]} : vector<64x64xf32> to vector<1x64xf32>
    %119 = vector.extract_strided_slice %2 {offsets = [19, 0], sizes = [1, 64], strides = [1, 1]} : vector<64x64xf32> to vector<1x64xf32>
    %120 = vector.extract_strided_slice %2 {offsets = [21, 0], sizes = [1, 64], strides = [1, 1]} : vector<64x64xf32> to vector<1x64xf32>
    %121 = vector.extract_strided_slice %2 {offsets = [23, 0], sizes = [1, 64], strides = [1, 1]} : vector<64x64xf32> to vector<1x64xf32>
    %122 = vector.extract_strided_slice %2 {offsets = [33, 0], sizes = [1, 64], strides = [1, 1]} : vector<64x64xf32> to vector<1x64xf32>
    %123 = vector.extract_strided_slice %2 {offsets = [35, 0], sizes = [1, 64], strides = [1, 1]} : vector<64x64xf32> to vector<1x64xf32>
    %124 = vector.extract_strided_slice %2 {offsets = [37, 0], sizes = [1, 64], strides = [1, 1]} : vector<64x64xf32> to vector<1x64xf32>
    %125 = vector.extract_strided_slice %2 {offsets = [39, 0], sizes = [1, 64], strides = [1, 1]} : vector<64x64xf32> to vector<1x64xf32>
    %126 = vector.extract_strided_slice %2 {offsets = [49, 0], sizes = [1, 64], strides = [1, 1]} : vector<64x64xf32> to vector<1x64xf32>
    %127 = vector.extract_strided_slice %2 {offsets = [51, 0], sizes = [1, 64], strides = [1, 1]} : vector<64x64xf32> to vector<1x64xf32>
    %128 = vector.extract_strided_slice %2 {offsets = [53, 0], sizes = [1, 64], strides = [1, 1]} : vector<64x64xf32> to vector<1x64xf32>
    %129 = vector.extract_strided_slice %2 {offsets = [55, 0], sizes = [1, 64], strides = [1, 1]} : vector<64x64xf32> to vector<1x64xf32>
    %130 = tpu.concatenate %114, %115, %116, %117, %118, %119, %120, %121, %122, %123, %124, %125, %126, %127, %128, %129 in 0 : vector<1x64xf32>, vector<1x64xf32>, vector<1x64xf32>, vector<1x64xf32>, vector<1x64xf32>, vector<1x64xf32>, vector<1x64xf32>, vector<1x64xf32>, vector<1x64xf32>, vector<1x64xf32>, vector<1x64xf32>, vector<1x64xf32>, vector<1x64xf32>, vector<1x64xf32>, vector<1x64xf32>, vector<1x64xf32> -> vector<16x64xf32>
    %131 = arith.truncf %130 : vector<16x64xf32> to vector<16x64xbf16>
    %c1_44 = arith.constant 1 : index
    %c2_45 = arith.constant 2 : index
    %c0_46 = arith.constant 0 : index
    %c0_47 = arith.constant 0 : index
    %132 = vector.load %arg2[%c1_44, %c2_45, %c0_46, %c0_47] : memref<3x3x64x128xbf16, #tpu.memory_space<vmem>>, vector<1x1x64x128xbf16>
    %133 = vector.shape_cast %132 : vector<1x1x64x128xbf16> to vector<64x128xbf16>
    %cst_48 = arith.constant dense<0.000000e+00> : vector<16x128xf32>
    %134 = tpu.matmul %131, %133, %cst_48 {dimension_numbers = #tpu.dot_dimension_numbers<[1], [0], [0], [1], [0, 0, 1, 1], [], []>} : vector<16x64xbf16>, vector<64x128xbf16>, vector<16x128xf32> -> vector<16x128xf32>
    %135 = arith.addf %113, %134 : vector<16x128xf32>
    %cst_49 = arith.constant 0.000000e+00 : f32
    %136 = vector.broadcast %cst_49 : f32 to vector<1x64xf32>
    %137 = vector.extract_strided_slice %2 {offsets = [9, 0], sizes = [1, 64], strides = [1, 1]} : vector<64x64xf32> to vector<1x64xf32>
    %138 = vector.extract_strided_slice %2 {offsets = [11, 0], sizes = [1, 64], strides = [1, 1]} : vector<64x64xf32> to vector<1x64xf32>
    %139 = vector.extract_strided_slice %2 {offsets = [13, 0], sizes = [1, 64], strides = [1, 1]} : vector<64x64xf32> to vector<1x64xf32>
    %cst_50 = arith.constant 0.000000e+00 : f32
    %140 = vector.broadcast %cst_50 : f32 to vector<1x64xf32>
    %141 = vector.extract_strided_slice %2 {offsets = [25, 0], sizes = [1, 64], strides = [1, 1]} : vector<64x64xf32> to vector<1x64xf32>
    %142 = vector.extract_strided_slice %2 {offsets = [27, 0], sizes = [1, 64], strides = [1, 1]} : vector<64x64xf32> to vector<1x64xf32>
    %143 = vector.extract_strided_slice %2 {offsets = [29, 0], sizes = [1, 64], strides = [1, 1]} : vector<64x64xf32> to vector<1x64xf32>
    %cst_51 = arith.constant 0.000000e+00 : f32
    %144 = vector.broadcast %cst_51 : f32 to vector<1x64xf32>
    %145 = vector.extract_strided_slice %2 {offsets = [41, 0], sizes = [1, 64], strides = [1, 1]} : vector<64x64xf32> to vector<1x64xf32>
    %146 = vector.extract_strided_slice %2 {offsets = [43, 0], sizes = [1, 64], strides = [1, 1]} : vector<64x64xf32> to vector<1x64xf32>
    %147 = vector.extract_strided_slice %2 {offsets = [45, 0], sizes = [1, 64], strides = [1, 1]} : vector<64x64xf32> to vector<1x64xf32>
    %cst_52 = arith.constant 0.000000e+00 : f32
    %148 = vector.broadcast %cst_52 : f32 to vector<1x64xf32>
    %149 = vector.extract_strided_slice %2 {offsets = [57, 0], sizes = [1, 64], strides = [1, 1]} : vector<64x64xf32> to vector<1x64xf32>
    %150 = vector.extract_strided_slice %2 {offsets = [59, 0], sizes = [1, 64], strides = [1, 1]} : vector<64x64xf32> to vector<1x64xf32>
    %151 = vector.extract_strided_slice %2 {offsets = [61, 0], sizes = [1, 64], strides = [1, 1]} : vector<64x64xf32> to vector<1x64xf32>
    %152 = tpu.concatenate %136, %137, %138, %139, %140, %141, %142, %143, %144, %145, %146, %147, %148, %149, %150, %151 in 0 : vector<1x64xf32>, vector<1x64xf32>, vector<1x64xf32>, vector<1x64xf32>, vector<1x64xf32>, vector<1x64xf32>, vector<1x64xf32>, vector<1x64xf32>, vector<1x64xf32>, vector<1x64xf32>, vector<1x64xf32>, vector<1x64xf32>, vector<1x64xf32>, vector<1x64xf32>, vector<1x64xf32>, vector<1x64xf32> -> vector<16x64xf32>
    %153 = arith.truncf %152 : vector<16x64xf32> to vector<16x64xbf16>
    %c2_53 = arith.constant 2 : index
    %c0_54 = arith.constant 0 : index
    %c0_55 = arith.constant 0 : index
    %c0_56 = arith.constant 0 : index
    %154 = vector.load %arg2[%c2_53, %c0_54, %c0_55, %c0_56] : memref<3x3x64x128xbf16, #tpu.memory_space<vmem>>, vector<1x1x64x128xbf16>
    %155 = vector.shape_cast %154 : vector<1x1x64x128xbf16> to vector<64x128xbf16>
    %cst_57 = arith.constant dense<0.000000e+00> : vector<16x128xf32>
    %156 = tpu.matmul %153, %155, %cst_57 {dimension_numbers = #tpu.dot_dimension_numbers<[1], [0], [0], [1], [0, 0, 1, 1], [], []>} : vector<16x64xbf16>, vector<64x128xbf16>, vector<16x128xf32> -> vector<16x128xf32>
    %157 = arith.addf %135, %156 : vector<16x128xf32>
    %158 = vector.extract_strided_slice %2 {offsets = [8, 0], sizes = [1, 64], strides = [1, 1]} : vector<64x64xf32> to vector<1x64xf32>
    %159 = vector.extract_strided_slice %2 {offsets = [10, 0], sizes = [1, 64], strides = [1, 1]} : vector<64x64xf32> to vector<1x64xf32>
    %160 = vector.extract_strided_slice %2 {offsets = [12, 0], sizes = [1, 64], strides = [1, 1]} : vector<64x64xf32> to vector<1x64xf32>
    %161 = vector.extract_strided_slice %2 {offsets = [14, 0], sizes = [1, 64], strides = [1, 1]} : vector<64x64xf32> to vector<1x64xf32>
    %162 = vector.extract_strided_slice %2 {offsets = [24, 0], sizes = [1, 64], strides = [1, 1]} : vector<64x64xf32> to vector<1x64xf32>
    %163 = vector.extract_strided_slice %2 {offsets = [26, 0], sizes = [1, 64], strides = [1, 1]} : vector<64x64xf32> to vector<1x64xf32>
    %164 = vector.extract_strided_slice %2 {offsets = [28, 0], sizes = [1, 64], strides = [1, 1]} : vector<64x64xf32> to vector<1x64xf32>
    %165 = vector.extract_strided_slice %2 {offsets = [30, 0], sizes = [1, 64], strides = [1, 1]} : vector<64x64xf32> to vector<1x64xf32>
    %166 = vector.extract_strided_slice %2 {offsets = [40, 0], sizes = [1, 64], strides = [1, 1]} : vector<64x64xf32> to vector<1x64xf32>
    %167 = vector.extract_strided_slice %2 {offsets = [42, 0], sizes = [1, 64], strides = [1, 1]} : vector<64x64xf32> to vector<1x64xf32>
    %168 = vector.extract_strided_slice %2 {offsets = [44, 0], sizes = [1, 64], strides = [1, 1]} : vector<64x64xf32> to vector<1x64xf32>
    %169 = vector.extract_strided_slice %2 {offsets = [46, 0], sizes = [1, 64], strides = [1, 1]} : vector<64x64xf32> to vector<1x64xf32>
    %170 = vector.extract_strided_slice %2 {offsets = [56, 0], sizes = [1, 64], strides = [1, 1]} : vector<64x64xf32> to vector<1x64xf32>
    %171 = vector.extract_strided_slice %2 {offsets = [58, 0], sizes = [1, 64], strides = [1, 1]} : vector<64x64xf32> to vector<1x64xf32>
    %172 = vector.extract_strided_slice %2 {offsets = [60, 0], sizes = [1, 64], strides = [1, 1]} : vector<64x64xf32> to vector<1x64xf32>
    %173 = vector.extract_strided_slice %2 {offsets = [62, 0], sizes = [1, 64], strides = [1, 1]} : vector<64x64xf32> to vector<1x64xf32>
    %174 = tpu.concatenate %158, %159, %160, %161, %162, %163, %164, %165, %166, %167, %168, %169, %170, %171, %172, %173 in 0 : vector<1x64xf32>, vector<1x64xf32>, vector<1x64xf32>, vector<1x64xf32>, vector<1x64xf32>, vector<1x64xf32>, vector<1x64xf32>, vector<1x64xf32>, vector<1x64xf32>, vector<1x64xf32>, vector<1x64xf32>, vector<1x64xf32>, vector<1x64xf32>, vector<1x64xf32>, vector<1x64xf32>, vector<1x64xf32> -> vector<16x64xf32>
    %175 = arith.truncf %174 : vector<16x64xf32> to vector<16x64xbf16>
    %c2_58 = arith.constant 2 : index
    %c1_59 = arith.constant 1 : index
    %c0_60 = arith.constant 0 : index
    %c0_61 = arith.constant 0 : index
    %176 = vector.load %arg2[%c2_58, %c1_59, %c0_60, %c0_61] : memref<3x3x64x128xbf16, #tpu.memory_space<vmem>>, vector<1x1x64x128xbf16>
    %177 = vector.shape_cast %176 : vector<1x1x64x128xbf16> to vector<64x128xbf16>
    %cst_62 = arith.constant dense<0.000000e+00> : vector<16x128xf32>
    %178 = tpu.matmul %175, %177, %cst_62 {dimension_numbers = #tpu.dot_dimension_numbers<[1], [0], [0], [1], [0, 0, 1, 1], [], []>} : vector<16x64xbf16>, vector<64x128xbf16>, vector<16x128xf32> -> vector<16x128xf32>
    %179 = arith.addf %157, %178 : vector<16x128xf32>
    %180 = vector.extract_strided_slice %2 {offsets = [9, 0], sizes = [1, 64], strides = [1, 1]} : vector<64x64xf32> to vector<1x64xf32>
    %181 = vector.extract_strided_slice %2 {offsets = [11, 0], sizes = [1, 64], strides = [1, 1]} : vector<64x64xf32> to vector<1x64xf32>
    %182 = vector.extract_strided_slice %2 {offsets = [13, 0], sizes = [1, 64], strides = [1, 1]} : vector<64x64xf32> to vector<1x64xf32>
    %183 = vector.extract_strided_slice %2 {offsets = [15, 0], sizes = [1, 64], strides = [1, 1]} : vector<64x64xf32> to vector<1x64xf32>
    %184 = vector.extract_strided_slice %2 {offsets = [25, 0], sizes = [1, 64], strides = [1, 1]} : vector<64x64xf32> to vector<1x64xf32>
    %185 = vector.extract_strided_slice %2 {offsets = [27, 0], sizes = [1, 64], strides = [1, 1]} : vector<64x64xf32> to vector<1x64xf32>
    %186 = vector.extract_strided_slice %2 {offsets = [29, 0], sizes = [1, 64], strides = [1, 1]} : vector<64x64xf32> to vector<1x64xf32>
    %187 = vector.extract_strided_slice %2 {offsets = [31, 0], sizes = [1, 64], strides = [1, 1]} : vector<64x64xf32> to vector<1x64xf32>
    %188 = vector.extract_strided_slice %2 {offsets = [41, 0], sizes = [1, 64], strides = [1, 1]} : vector<64x64xf32> to vector<1x64xf32>
    %189 = vector.extract_strided_slice %2 {offsets = [43, 0], sizes = [1, 64], strides = [1, 1]} : vector<64x64xf32> to vector<1x64xf32>
    %190 = vector.extract_strided_slice %2 {offsets = [45, 0], sizes = [1, 64], strides = [1, 1]} : vector<64x64xf32> to vector<1x64xf32>
    %191 = vector.extract_strided_slice %2 {offsets = [47, 0], sizes = [1, 64], strides = [1, 1]} : vector<64x64xf32> to vector<1x64xf32>
    %192 = vector.extract_strided_slice %2 {offsets = [57, 0], sizes = [1, 64], strides = [1, 1]} : vector<64x64xf32> to vector<1x64xf32>
    %193 = vector.extract_strided_slice %2 {offsets = [59, 0], sizes = [1, 64], strides = [1, 1]} : vector<64x64xf32> to vector<1x64xf32>
    %194 = vector.extract_strided_slice %2 {offsets = [61, 0], sizes = [1, 64], strides = [1, 1]} : vector<64x64xf32> to vector<1x64xf32>
    %195 = vector.extract_strided_slice %2 {offsets = [63, 0], sizes = [1, 64], strides = [1, 1]} : vector<64x64xf32> to vector<1x64xf32>
    %196 = tpu.concatenate %180, %181, %182, %183, %184, %185, %186, %187, %188, %189, %190, %191, %192, %193, %194, %195 in 0 : vector<1x64xf32>, vector<1x64xf32>, vector<1x64xf32>, vector<1x64xf32>, vector<1x64xf32>, vector<1x64xf32>, vector<1x64xf32>, vector<1x64xf32>, vector<1x64xf32>, vector<1x64xf32>, vector<1x64xf32>, vector<1x64xf32>, vector<1x64xf32>, vector<1x64xf32>, vector<1x64xf32>, vector<1x64xf32> -> vector<16x64xf32>
    %197 = arith.truncf %196 : vector<16x64xf32> to vector<16x64xbf16>
    %c2_63 = arith.constant 2 : index
    %c2_64 = arith.constant 2 : index
    %c0_65 = arith.constant 0 : index
    %c0_66 = arith.constant 0 : index
    %198 = vector.load %arg2[%c2_63, %c2_64, %c0_65, %c0_66] : memref<3x3x64x128xbf16, #tpu.memory_space<vmem>>, vector<1x1x64x128xbf16>
    %199 = vector.shape_cast %198 : vector<1x1x64x128xbf16> to vector<64x128xbf16>
    %cst_67 = arith.constant dense<0.000000e+00> : vector<16x128xf32>
    %200 = tpu.matmul %197, %199, %cst_67 {dimension_numbers = #tpu.dot_dimension_numbers<[1], [0], [0], [1], [0, 0, 1, 1], [], []>} : vector<16x64xbf16>, vector<64x128xbf16>, vector<16x128xf32> -> vector<16x128xf32>
    %201 = arith.addf %179, %200 : vector<16x128xf32>
    %c0_68 = arith.constant 0 : index
    %c0_69 = arith.constant 0 : index
    %202 = vector.load %arg3[%c0_68, %c0_69] : memref<1x128xf32, #tpu.memory_space<vmem>>, vector<1x128xf32>
    %203 = vector.broadcast %202 : vector<1x128xf32> to vector<16x128xf32>
    %204 = arith.addf %201, %203 : vector<16x128xf32>
    %cst_70 = arith.constant 0.000000e+00 : f32
    %205 = vector.broadcast %cst_70 : f32 to vector<16x128xf32>
    %206 = arith.maximumf %204, %205 : vector<16x128xf32>
    %cst_71 = arith.constant 0.000000e+00 : f32
    %207 = vector.broadcast %cst_71 : f32 to vector<4x256xf32>
    %cst_72 = arith.constant 0.000000e+00 : f32
    %208 = vector.broadcast %cst_72 : f32 to vector<1x128xf32>
    %cst_73 = arith.constant 0.000000e+00 : f32
    %209 = vector.broadcast %cst_73 : f32 to vector<1x128xf32>
    %cst_74 = arith.constant 0.000000e+00 : f32
    %210 = vector.broadcast %cst_74 : f32 to vector<1x128xf32>
    %211 = vector.extract_strided_slice %206 {offsets = [5, 0], sizes = [1, 128], strides = [1, 1]} : vector<16x128xf32> to vector<1x128xf32>
    %212 = tpu.concatenate %208, %209, %210, %211 in 0 : vector<1x128xf32>, vector<1x128xf32>, vector<1x128xf32>, vector<1x128xf32> -> vector<4x128xf32>
    %213 = arith.truncf %212 : vector<4x128xf32> to vector<4x128xbf16>
    %c0_75 = arith.constant 0 : index
    %c0_76 = arith.constant 0 : index
    %c0_77 = arith.constant 0 : index
    %c0_78 = arith.constant 0 : index
    %214 = vector.load %arg4[%c0_75, %c0_76, %c0_77, %c0_78] : memref<3x3x128x256xbf16, #tpu.memory_space<vmem>>, vector<1x1x128x256xbf16>
    %215 = vector.shape_cast %214 : vector<1x1x128x256xbf16> to vector<128x256xbf16>
    %cst_79 = arith.constant dense<0.000000e+00> : vector<4x256xf32>
    %216 = tpu.matmul %213, %215, %cst_79 {dimension_numbers = #tpu.dot_dimension_numbers<[1], [0], [0], [1], [0, 0, 1, 1], [], []>} : vector<4x128xbf16>, vector<128x256xbf16>, vector<4x256xf32> -> vector<4x256xf32>
    %217 = arith.addf %207, %216 : vector<4x256xf32>
    %cst_80 = arith.constant 0.000000e+00 : f32
    %218 = vector.broadcast %cst_80 : f32 to vector<1x128xf32>
    %cst_81 = arith.constant 0.000000e+00 : f32
    %219 = vector.broadcast %cst_81 : f32 to vector<1x128xf32>
    %220 = vector.extract_strided_slice %206 {offsets = [4, 0], sizes = [1, 128], strides = [1, 1]} : vector<16x128xf32> to vector<1x128xf32>
    %221 = vector.extract_strided_slice %206 {offsets = [6, 0], sizes = [1, 128], strides = [1, 1]} : vector<16x128xf32> to vector<1x128xf32>
    %222 = tpu.concatenate %218, %219, %220, %221 in 0 : vector<1x128xf32>, vector<1x128xf32>, vector<1x128xf32>, vector<1x128xf32> -> vector<4x128xf32>
    %223 = arith.truncf %222 : vector<4x128xf32> to vector<4x128xbf16>
    %c0_82 = arith.constant 0 : index
    %c1_83 = arith.constant 1 : index
    %c0_84 = arith.constant 0 : index
    %c0_85 = arith.constant 0 : index
    %224 = vector.load %arg4[%c0_82, %c1_83, %c0_84, %c0_85] : memref<3x3x128x256xbf16, #tpu.memory_space<vmem>>, vector<1x1x128x256xbf16>
    %225 = vector.shape_cast %224 : vector<1x1x128x256xbf16> to vector<128x256xbf16>
    %cst_86 = arith.constant dense<0.000000e+00> : vector<4x256xf32>
    %226 = tpu.matmul %223, %225, %cst_86 {dimension_numbers = #tpu.dot_dimension_numbers<[1], [0], [0], [1], [0, 0, 1, 1], [], []>} : vector<4x128xbf16>, vector<128x256xbf16>, vector<4x256xf32> -> vector<4x256xf32>
    %227 = arith.addf %217, %226 : vector<4x256xf32>
    %cst_87 = arith.constant 0.000000e+00 : f32
    %228 = vector.broadcast %cst_87 : f32 to vector<1x128xf32>
    %cst_88 = arith.constant 0.000000e+00 : f32
    %229 = vector.broadcast %cst_88 : f32 to vector<1x128xf32>
    %230 = vector.extract_strided_slice %206 {offsets = [5, 0], sizes = [1, 128], strides = [1, 1]} : vector<16x128xf32> to vector<1x128xf32>
    %231 = vector.extract_strided_slice %206 {offsets = [7, 0], sizes = [1, 128], strides = [1, 1]} : vector<16x128xf32> to vector<1x128xf32>
    %232 = tpu.concatenate %228, %229, %230, %231 in 0 : vector<1x128xf32>, vector<1x128xf32>, vector<1x128xf32>, vector<1x128xf32> -> vector<4x128xf32>
    %233 = arith.truncf %232 : vector<4x128xf32> to vector<4x128xbf16>
    %c0_89 = arith.constant 0 : index
    %c2_90 = arith.constant 2 : index
    %c0_91 = arith.constant 0 : index
    %c0_92 = arith.constant 0 : index
    %234 = vector.load %arg4[%c0_89, %c2_90, %c0_91, %c0_92] : memref<3x3x128x256xbf16, #tpu.memory_space<vmem>>, vector<1x1x128x256xbf16>
    %235 = vector.shape_cast %234 : vector<1x1x128x256xbf16> to vector<128x256xbf16>
    %cst_93 = arith.constant dense<0.000000e+00> : vector<4x256xf32>
    %236 = tpu.matmul %233, %235, %cst_93 {dimension_numbers = #tpu.dot_dimension_numbers<[1], [0], [0], [1], [0, 0, 1, 1], [], []>} : vector<4x128xbf16>, vector<128x256xbf16>, vector<4x256xf32> -> vector<4x256xf32>
    %237 = arith.addf %227, %236 : vector<4x256xf32>
    %cst_94 = arith.constant 0.000000e+00 : f32
    %238 = vector.broadcast %cst_94 : f32 to vector<1x128xf32>
    %239 = vector.extract_strided_slice %206 {offsets = [1, 0], sizes = [1, 128], strides = [1, 1]} : vector<16x128xf32> to vector<1x128xf32>
    %cst_95 = arith.constant 0.000000e+00 : f32
    %240 = vector.broadcast %cst_95 : f32 to vector<1x128xf32>
    %241 = vector.extract_strided_slice %206 {offsets = [9, 0], sizes = [1, 128], strides = [1, 1]} : vector<16x128xf32> to vector<1x128xf32>
    %242 = tpu.concatenate %238, %239, %240, %241 in 0 : vector<1x128xf32>, vector<1x128xf32>, vector<1x128xf32>, vector<1x128xf32> -> vector<4x128xf32>
    %243 = arith.truncf %242 : vector<4x128xf32> to vector<4x128xbf16>
    %c1_96 = arith.constant 1 : index
    %c0_97 = arith.constant 0 : index
    %c0_98 = arith.constant 0 : index
    %c0_99 = arith.constant 0 : index
    %244 = vector.load %arg4[%c1_96, %c0_97, %c0_98, %c0_99] : memref<3x3x128x256xbf16, #tpu.memory_space<vmem>>, vector<1x1x128x256xbf16>
    %245 = vector.shape_cast %244 : vector<1x1x128x256xbf16> to vector<128x256xbf16>
    %cst_100 = arith.constant dense<0.000000e+00> : vector<4x256xf32>
    %246 = tpu.matmul %243, %245, %cst_100 {dimension_numbers = #tpu.dot_dimension_numbers<[1], [0], [0], [1], [0, 0, 1, 1], [], []>} : vector<4x128xbf16>, vector<128x256xbf16>, vector<4x256xf32> -> vector<4x256xf32>
    %247 = arith.addf %237, %246 : vector<4x256xf32>
    %248 = vector.extract_strided_slice %206 {offsets = [0, 0], sizes = [1, 128], strides = [1, 1]} : vector<16x128xf32> to vector<1x128xf32>
    %249 = vector.extract_strided_slice %206 {offsets = [2, 0], sizes = [1, 128], strides = [1, 1]} : vector<16x128xf32> to vector<1x128xf32>
    %250 = vector.extract_strided_slice %206 {offsets = [8, 0], sizes = [1, 128], strides = [1, 1]} : vector<16x128xf32> to vector<1x128xf32>
    %251 = vector.extract_strided_slice %206 {offsets = [10, 0], sizes = [1, 128], strides = [1, 1]} : vector<16x128xf32> to vector<1x128xf32>
    %252 = tpu.concatenate %248, %249, %250, %251 in 0 : vector<1x128xf32>, vector<1x128xf32>, vector<1x128xf32>, vector<1x128xf32> -> vector<4x128xf32>
    %253 = arith.truncf %252 : vector<4x128xf32> to vector<4x128xbf16>
    %c1_101 = arith.constant 1 : index
    %c1_102 = arith.constant 1 : index
    %c0_103 = arith.constant 0 : index
    %c0_104 = arith.constant 0 : index
    %254 = vector.load %arg4[%c1_101, %c1_102, %c0_103, %c0_104] : memref<3x3x128x256xbf16, #tpu.memory_space<vmem>>, vector<1x1x128x256xbf16>
    %255 = vector.shape_cast %254 : vector<1x1x128x256xbf16> to vector<128x256xbf16>
    %cst_105 = arith.constant dense<0.000000e+00> : vector<4x256xf32>
    %256 = tpu.matmul %253, %255, %cst_105 {dimension_numbers = #tpu.dot_dimension_numbers<[1], [0], [0], [1], [0, 0, 1, 1], [], []>} : vector<4x128xbf16>, vector<128x256xbf16>, vector<4x256xf32> -> vector<4x256xf32>
    %257 = arith.addf %247, %256 : vector<4x256xf32>
    %258 = vector.extract_strided_slice %206 {offsets = [1, 0], sizes = [1, 128], strides = [1, 1]} : vector<16x128xf32> to vector<1x128xf32>
    %259 = vector.extract_strided_slice %206 {offsets = [3, 0], sizes = [1, 128], strides = [1, 1]} : vector<16x128xf32> to vector<1x128xf32>
    %260 = vector.extract_strided_slice %206 {offsets = [9, 0], sizes = [1, 128], strides = [1, 1]} : vector<16x128xf32> to vector<1x128xf32>
    %261 = vector.extract_strided_slice %206 {offsets = [11, 0], sizes = [1, 128], strides = [1, 1]} : vector<16x128xf32> to vector<1x128xf32>
    %262 = tpu.concatenate %258, %259, %260, %261 in 0 : vector<1x128xf32>, vector<1x128xf32>, vector<1x128xf32>, vector<1x128xf32> -> vector<4x128xf32>
    %263 = arith.truncf %262 : vector<4x128xf32> to vector<4x128xbf16>
    %c1_106 = arith.constant 1 : index
    %c2_107 = arith.constant 2 : index
    %c0_108 = arith.constant 0 : index
    %c0_109 = arith.constant 0 : index
    %264 = vector.load %arg4[%c1_106, %c2_107, %c0_108, %c0_109] : memref<3x3x128x256xbf16, #tpu.memory_space<vmem>>, vector<1x1x128x256xbf16>
    %265 = vector.shape_cast %264 : vector<1x1x128x256xbf16> to vector<128x256xbf16>
    %cst_110 = arith.constant dense<0.000000e+00> : vector<4x256xf32>
    %266 = tpu.matmul %263, %265, %cst_110 {dimension_numbers = #tpu.dot_dimension_numbers<[1], [0], [0], [1], [0, 0, 1, 1], [], []>} : vector<4x128xbf16>, vector<128x256xbf16>, vector<4x256xf32> -> vector<4x256xf32>
    %267 = arith.addf %257, %266 : vector<4x256xf32>
    %cst_111 = arith.constant 0.000000e+00 : f32
    %268 = vector.broadcast %cst_111 : f32 to vector<1x128xf32>
    %269 = vector.extract_strided_slice %206 {offsets = [5, 0], sizes = [1, 128], strides = [1, 1]} : vector<16x128xf32> to vector<1x128xf32>
    %cst_112 = arith.constant 0.000000e+00 : f32
    %270 = vector.broadcast %cst_112 : f32 to vector<1x128xf32>
    %271 = vector.extract_strided_slice %206 {offsets = [13, 0], sizes = [1, 128], strides = [1, 1]} : vector<16x128xf32> to vector<1x128xf32>
    %272 = tpu.concatenate %268, %269, %270, %271 in 0 : vector<1x128xf32>, vector<1x128xf32>, vector<1x128xf32>, vector<1x128xf32> -> vector<4x128xf32>
    %273 = arith.truncf %272 : vector<4x128xf32> to vector<4x128xbf16>
    %c2_113 = arith.constant 2 : index
    %c0_114 = arith.constant 0 : index
    %c0_115 = arith.constant 0 : index
    %c0_116 = arith.constant 0 : index
    %274 = vector.load %arg4[%c2_113, %c0_114, %c0_115, %c0_116] : memref<3x3x128x256xbf16, #tpu.memory_space<vmem>>, vector<1x1x128x256xbf16>
    %275 = vector.shape_cast %274 : vector<1x1x128x256xbf16> to vector<128x256xbf16>
    %cst_117 = arith.constant dense<0.000000e+00> : vector<4x256xf32>
    %276 = tpu.matmul %273, %275, %cst_117 {dimension_numbers = #tpu.dot_dimension_numbers<[1], [0], [0], [1], [0, 0, 1, 1], [], []>} : vector<4x128xbf16>, vector<128x256xbf16>, vector<4x256xf32> -> vector<4x256xf32>
    %277 = arith.addf %267, %276 : vector<4x256xf32>
    %278 = vector.extract_strided_slice %206 {offsets = [4, 0], sizes = [1, 128], strides = [1, 1]} : vector<16x128xf32> to vector<1x128xf32>
    %279 = vector.extract_strided_slice %206 {offsets = [6, 0], sizes = [1, 128], strides = [1, 1]} : vector<16x128xf32> to vector<1x128xf32>
    %280 = vector.extract_strided_slice %206 {offsets = [12, 0], sizes = [1, 128], strides = [1, 1]} : vector<16x128xf32> to vector<1x128xf32>
    %281 = vector.extract_strided_slice %206 {offsets = [14, 0], sizes = [1, 128], strides = [1, 1]} : vector<16x128xf32> to vector<1x128xf32>
    %282 = tpu.concatenate %278, %279, %280, %281 in 0 : vector<1x128xf32>, vector<1x128xf32>, vector<1x128xf32>, vector<1x128xf32> -> vector<4x128xf32>
    %283 = arith.truncf %282 : vector<4x128xf32> to vector<4x128xbf16>
    %c2_118 = arith.constant 2 : index
    %c1_119 = arith.constant 1 : index
    %c0_120 = arith.constant 0 : index
    %c0_121 = arith.constant 0 : index
    %284 = vector.load %arg4[%c2_118, %c1_119, %c0_120, %c0_121] : memref<3x3x128x256xbf16, #tpu.memory_space<vmem>>, vector<1x1x128x256xbf16>
    %285 = vector.shape_cast %284 : vector<1x1x128x256xbf16> to vector<128x256xbf16>
    %cst_122 = arith.constant dense<0.000000e+00> : vector<4x256xf32>
    %286 = tpu.matmul %283, %285, %cst_122 {dimension_numbers = #tpu.dot_dimension_numbers<[1], [0], [0], [1], [0, 0, 1, 1], [], []>} : vector<4x128xbf16>, vector<128x256xbf16>, vector<4x256xf32> -> vector<4x256xf32>
    %287 = arith.addf %277, %286 : vector<4x256xf32>
    %288 = vector.extract_strided_slice %206 {offsets = [5, 0], sizes = [1, 128], strides = [1, 1]} : vector<16x128xf32> to vector<1x128xf32>
    %289 = vector.extract_strided_slice %206 {offsets = [7, 0], sizes = [1, 128], strides = [1, 1]} : vector<16x128xf32> to vector<1x128xf32>
    %290 = vector.extract_strided_slice %206 {offsets = [13, 0], sizes = [1, 128], strides = [1, 1]} : vector<16x128xf32> to vector<1x128xf32>
    %291 = vector.extract_strided_slice %206 {offsets = [15, 0], sizes = [1, 128], strides = [1, 1]} : vector<16x128xf32> to vector<1x128xf32>
    %292 = tpu.concatenate %288, %289, %290, %291 in 0 : vector<1x128xf32>, vector<1x128xf32>, vector<1x128xf32>, vector<1x128xf32> -> vector<4x128xf32>
    %293 = arith.truncf %292 : vector<4x128xf32> to vector<4x128xbf16>
    %c2_123 = arith.constant 2 : index
    %c2_124 = arith.constant 2 : index
    %c0_125 = arith.constant 0 : index
    %c0_126 = arith.constant 0 : index
    %294 = vector.load %arg4[%c2_123, %c2_124, %c0_125, %c0_126] : memref<3x3x128x256xbf16, #tpu.memory_space<vmem>>, vector<1x1x128x256xbf16>
    %295 = vector.shape_cast %294 : vector<1x1x128x256xbf16> to vector<128x256xbf16>
    %cst_127 = arith.constant dense<0.000000e+00> : vector<4x256xf32>
    %296 = tpu.matmul %293, %295, %cst_127 {dimension_numbers = #tpu.dot_dimension_numbers<[1], [0], [0], [1], [0, 0, 1, 1], [], []>} : vector<4x128xbf16>, vector<128x256xbf16>, vector<4x256xf32> -> vector<4x256xf32>
    %297 = arith.addf %287, %296 : vector<4x256xf32>
    %c0_128 = arith.constant 0 : index
    %c0_129 = arith.constant 0 : index
    %298 = vector.load %arg5[%c0_128, %c0_129] : memref<1x256xf32, #tpu.memory_space<vmem>>, vector<1x256xf32>
    %299 = vector.broadcast %298 : vector<1x256xf32> to vector<4x256xf32>
    %300 = arith.addf %297, %299 : vector<4x256xf32>
    %cst_130 = arith.constant 0.000000e+00 : f32
    %301 = vector.broadcast %cst_130 : f32 to vector<4x256xf32>
    %302 = arith.maximumf %300, %301 : vector<4x256xf32>
    %cst_131 = arith.constant 0.000000e+00 : f32
    %303 = vector.broadcast %cst_131 : f32 to vector<1x256xf32>
    %304 = vector.extract_strided_slice %302 {offsets = [0, 0], sizes = [1, 256], strides = [1, 1]} : vector<4x256xf32> to vector<1x256xf32>
    %305 = arith.truncf %304 : vector<1x256xf32> to vector<1x256xbf16>
    %c1_132 = arith.constant 1 : index
    %c1_133 = arith.constant 1 : index
    %c0_134 = arith.constant 0 : index
    %c0_135 = arith.constant 0 : index
    %306 = vector.load %arg6[%c1_132, %c1_133, %c0_134, %c0_135] : memref<3x3x256x256xbf16, #tpu.memory_space<vmem>>, vector<1x1x256x256xbf16>
    %307 = vector.shape_cast %306 : vector<1x1x256x256xbf16> to vector<256x256xbf16>
    %cst_136 = arith.constant dense<0.000000e+00> : vector<1x256xf32>
    %308 = tpu.matmul %305, %307, %cst_136 {dimension_numbers = #tpu.dot_dimension_numbers<[1], [0], [0], [1], [0, 0, 1, 1], [], []>} : vector<1x256xbf16>, vector<256x256xbf16>, vector<1x256xf32> -> vector<1x256xf32>
    %309 = arith.addf %303, %308 : vector<1x256xf32>
    %310 = vector.extract_strided_slice %302 {offsets = [1, 0], sizes = [1, 256], strides = [1, 1]} : vector<4x256xf32> to vector<1x256xf32>
    %311 = arith.truncf %310 : vector<1x256xf32> to vector<1x256xbf16>
    %c1_137 = arith.constant 1 : index
    %c2_138 = arith.constant 2 : index
    %c0_139 = arith.constant 0 : index
    %c0_140 = arith.constant 0 : index
    %312 = vector.load %arg6[%c1_137, %c2_138, %c0_139, %c0_140] : memref<3x3x256x256xbf16, #tpu.memory_space<vmem>>, vector<1x1x256x256xbf16>
    %313 = vector.shape_cast %312 : vector<1x1x256x256xbf16> to vector<256x256xbf16>
    %cst_141 = arith.constant dense<0.000000e+00> : vector<1x256xf32>
    %314 = tpu.matmul %311, %313, %cst_141 {dimension_numbers = #tpu.dot_dimension_numbers<[1], [0], [0], [1], [0, 0, 1, 1], [], []>} : vector<1x256xbf16>, vector<256x256xbf16>, vector<1x256xf32> -> vector<1x256xf32>
    %315 = arith.addf %309, %314 : vector<1x256xf32>
    %316 = vector.extract_strided_slice %302 {offsets = [2, 0], sizes = [1, 256], strides = [1, 1]} : vector<4x256xf32> to vector<1x256xf32>
    %317 = arith.truncf %316 : vector<1x256xf32> to vector<1x256xbf16>
    %c2_142 = arith.constant 2 : index
    %c1_143 = arith.constant 1 : index
    %c0_144 = arith.constant 0 : index
    %c0_145 = arith.constant 0 : index
    %318 = vector.load %arg6[%c2_142, %c1_143, %c0_144, %c0_145] : memref<3x3x256x256xbf16, #tpu.memory_space<vmem>>, vector<1x1x256x256xbf16>
    %319 = vector.shape_cast %318 : vector<1x1x256x256xbf16> to vector<256x256xbf16>
    %cst_146 = arith.constant dense<0.000000e+00> : vector<1x256xf32>
    %320 = tpu.matmul %317, %319, %cst_146 {dimension_numbers = #tpu.dot_dimension_numbers<[1], [0], [0], [1], [0, 0, 1, 1], [], []>} : vector<1x256xbf16>, vector<256x256xbf16>, vector<1x256xf32> -> vector<1x256xf32>
    %321 = arith.addf %315, %320 : vector<1x256xf32>
    %322 = vector.extract_strided_slice %302 {offsets = [3, 0], sizes = [1, 256], strides = [1, 1]} : vector<4x256xf32> to vector<1x256xf32>
    %323 = arith.truncf %322 : vector<1x256xf32> to vector<1x256xbf16>
    %c2_147 = arith.constant 2 : index
    %c2_148 = arith.constant 2 : index
    %c0_149 = arith.constant 0 : index
    %c0_150 = arith.constant 0 : index
    %324 = vector.load %arg6[%c2_147, %c2_148, %c0_149, %c0_150] : memref<3x3x256x256xbf16, #tpu.memory_space<vmem>>, vector<1x1x256x256xbf16>
    %325 = vector.shape_cast %324 : vector<1x1x256x256xbf16> to vector<256x256xbf16>
    %cst_151 = arith.constant dense<0.000000e+00> : vector<1x256xf32>
    %326 = tpu.matmul %323, %325, %cst_151 {dimension_numbers = #tpu.dot_dimension_numbers<[1], [0], [0], [1], [0, 0, 1, 1], [], []>} : vector<1x256xbf16>, vector<256x256xbf16>, vector<1x256xf32> -> vector<1x256xf32>
    %327 = arith.addf %321, %326 : vector<1x256xf32>
    %c0_152 = arith.constant 0 : index
    %c0_153 = arith.constant 0 : index
    %328 = vector.load %arg7[%c0_152, %c0_153] : memref<1x256xf32, #tpu.memory_space<vmem>>, vector<1x256xf32>
    %329 = arith.addf %327, %328 : vector<1x256xf32>
    %cst_154 = arith.constant 0.000000e+00 : f32
    %330 = vector.broadcast %cst_154 : f32 to vector<1x256xf32>
    %331 = arith.maximumf %329, %330 : vector<1x256xf32>
    %cst_155 = arith.constant 0.000000e+00 : f32
    %332 = vector.broadcast %cst_155 : f32 to vector<1x256xf32>
    %333 = arith.truncf %331 : vector<1x256xf32> to vector<1x256xbf16>
    %c1_156 = arith.constant 1 : index
    %c1_157 = arith.constant 1 : index
    %c0_158 = arith.constant 0 : index
    %c0_159 = arith.constant 0 : index
    %334 = vector.load %arg8[%c1_156, %c1_157, %c0_158, %c0_159] : memref<3x3x256x256xbf16, #tpu.memory_space<vmem>>, vector<1x1x256x256xbf16>
    %335 = vector.shape_cast %334 : vector<1x1x256x256xbf16> to vector<256x256xbf16>
    %cst_160 = arith.constant dense<0.000000e+00> : vector<1x256xf32>
    %336 = tpu.matmul %333, %335, %cst_160 {dimension_numbers = #tpu.dot_dimension_numbers<[1], [0], [0], [1], [0, 0, 1, 1], [], []>} : vector<1x256xbf16>, vector<256x256xbf16>, vector<1x256xf32> -> vector<1x256xf32>
    %337 = arith.addf %332, %336 : vector<1x256xf32>
    %c0_161 = arith.constant 0 : index
    %c0_162 = arith.constant 0 : index
    %338 = vector.load %arg9[%c0_161, %c0_162] : memref<1x256xf32, #tpu.memory_space<vmem>>, vector<1x256xf32>
    %339 = arith.addf %337, %338 : vector<1x256xf32>
    %cst_163 = arith.constant 0.000000e+00 : f32
    %340 = vector.broadcast %cst_163 : f32 to vector<1x256xf32>
    %341 = arith.maximumf %339, %340 : vector<1x256xf32>
    %cst_164 = arith.constant 0.000000e+00 : f32
    %342 = vector.broadcast %cst_164 : f32 to vector<1x6xf32>
    %343 = arith.truncf %341 : vector<1x256xf32> to vector<1x256xbf16>
    %c1_165 = arith.constant 1 : index
    %c1_166 = arith.constant 1 : index
    %c0_167 = arith.constant 0 : index
    %c0_168 = arith.constant 0 : index
    %344 = vector.load %arg10[%c1_165, %c1_166, %c0_167, %c0_168] : memref<3x3x256x6xbf16, #tpu.memory_space<vmem>>, vector<1x1x256x6xbf16>
    %345 = vector.shape_cast %344 : vector<1x1x256x6xbf16> to vector<256x6xbf16>
    %cst_169 = arith.constant dense<0.000000e+00> : vector<1x6xf32>
    %346 = tpu.matmul %343, %345, %cst_169 {dimension_numbers = #tpu.dot_dimension_numbers<[1], [0], [0], [1], [0, 0, 1, 1], [], []>} : vector<1x256xbf16>, vector<256x6xbf16>, vector<1x6xf32> -> vector<1x6xf32>
    %347 = arith.addf %342, %346 : vector<1x6xf32>
    %c0_170 = arith.constant 0 : index
    %c0_171 = arith.constant 0 : index
    %348 = vector.load %arg11[%c0_170, %c0_171] : memref<1x6xf32, #tpu.memory_space<vmem>>, vector<1x6xf32>
    %349 = arith.addf %347, %348 : vector<1x6xf32>
    %cst_172 = arith.constant dense<0.000000e+00> : vector<6xf32>
    %350 = vector.multi_reduction <add>, %349, %cst_172 [0] : vector<1x6xf32> to vector<6xf32>
    %351 = vector.shape_cast %350 : vector<6xf32> to vector<1x6xf32>
    %cst_173 = arith.constant 1.000000e+00 : f32
    %352 = vector.broadcast %cst_173 : f32 to vector<1x6xf32>
    %353 = arith.divf %351, %352 : vector<1x6xf32>
    %cst_174 = arith.constant 0.00999999977 : f32
    %354 = vector.broadcast %cst_174 : f32 to vector<1x6xf32>
    %355 = arith.mulf %353, %354 : vector<1x6xf32>
    %356 = vector.shape_cast %355 : vector<1x6xf32> to vector<1x1x6xf32>
    %c0_175 = arith.constant 0 : index
    %c0_176 = arith.constant 0 : index
    %c0_177 = arith.constant 0 : index
    %357 = vector.load %arg12[%c0_175, %c0_176, %c0_177] : memref<1x1x6xf32, #tpu.memory_space<vmem>>, vector<1x1x6xf32>
    tpu.vector_store %arg12[%c0_175, %c0_176, %c0_177], %356 {strides = array<i32>} : memref<1x1x6xf32, #tpu.memory_space<vmem>>, vector<1x1x6xf32>,
    return
  }
  func.func @transform_0(%arg0: i32) -> (i32, i32, i32) {
    %c0_i32 = arith.constant 0 : i32
    %c0_i32_0 = arith.constant 0 : i32
    %c0_i32_1 = arith.constant 0 : i32
    return %arg0, %c0_i32, %c0_i32_0 : i32, i32, i32
  }
  func.func @transform_1(%arg0: i32) -> (i32, i32, i32, i32) {
    %c0_i32 = arith.constant 0 : i32
    %c0_i32_0 = arith.constant 0 : i32
    %c0_i32_1 = arith.constant 0 : i32
    %c0_i32_2 = arith.constant 0 : i32
    %c0_i32_3 = arith.constant 0 : i32
    return %c0_i32, %c0_i32_0, %c0_i32_1, %c0_i32_2 : i32, i32, i32, i32
  }
  func.func @transform_2(%arg0: i32) -> (i32, i32) {
    %c0_i32 = arith.constant 0 : i32
    %c0_i32_0 = arith.constant 0 : i32
    %c0_i32_1 = arith.constant 0 : i32
    return %c0_i32, %c0_i32_0 : i32, i32
  }
  func.func @transform_3(%arg0: i32) -> (i32, i32, i32, i32) {
    %c0_i32 = arith.constant 0 : i32
    %c0_i32_0 = arith.constant 0 : i32
    %c0_i32_1 = arith.constant 0 : i32
    %c0_i32_2 = arith.constant 0 : i32
    %c0_i32_3 = arith.constant 0 : i32
    return %c0_i32, %c0_i32_0, %c0_i32_1, %c0_i32_2 : i32, i32, i32, i32
  }
  func.func @transform_4(%arg0: i32) -> (i32, i32) {
    %c0_i32 = arith.constant 0 : i32
    %c0_i32_0 = arith.constant 0 : i32
    %c0_i32_1 = arith.constant 0 : i32
    return %c0_i32, %c0_i32_0 : i32, i32
  }
  func.func @transform_5(%arg0: i32) -> (i32, i32, i32, i32) {
    %c0_i32 = arith.constant 0 : i32
    %c0_i32_0 = arith.constant 0 : i32
    %c0_i32_1 = arith.constant 0 : i32
    %c0_i32_2 = arith.constant 0 : i32
    %c0_i32_3 = arith.constant 0 : i32
    return %c0_i32, %c0_i32_0, %c0_i32_1, %c0_i32_2 : i32, i32, i32, i32
  }
  func.func @transform_6(%arg0: i32) -> (i32, i32) {
    %c0_i32 = arith.constant 0 : i32
    %c0_i32_0 = arith.constant 0 : i32
    %c0_i32_1 = arith.constant 0 : i32
    return %c0_i32, %c0_i32_0 : i32, i32
  }
  func.func @transform_7(%arg0: i32) -> (i32, i32, i32, i32) {
    %c0_i32 = arith.constant 0 : i32
    %c0_i32_0 = arith.constant 0 : i32
    %c0_i32_1 = arith.constant 0 : i32
    %c0_i32_2 = arith.constant 0 : i32
    %c0_i32_3 = arith.constant 0 : i32
    return %c0_i32, %c0_i32_0, %c0_i32_1, %c0_i32_2 : i32, i32, i32, i32
  }
  func.func @transform_8(%arg0: i32) -> (i32, i32) {
    %c0_i32 = arith.constant 0 : i32
    %c0_i32_0 = arith.constant 0 : i32
    %c0_i32_1 = arith.constant 0 : i32
    return %c0_i32, %c0_i32_0 : i32, i32
  }
  func.func @transform_9(%arg0: i32) -> (i32, i32, i32, i32) {
    %c0_i32 = arith.constant 0 : i32
    %c0_i32_0 = arith.constant 0 : i32
    %c0_i32_1 = arith.constant 0 : i32
    %c0_i32_2 = arith.constant 0 : i32
    %c0_i32_3 = arith.constant 0 : i32
    return %c0_i32, %c0_i32_0, %c0_i32_1, %c0_i32_2 : i32, i32, i32, i32
  }
  func.func @transform_10(%arg0: i32) -> (i32, i32) {
    %c0_i32 = arith.constant 0 : i32
    %c0_i32_0 = arith.constant 0 : i32
    %c0_i32_1 = arith.constant 0 : i32
    return %c0_i32, %c0_i32_0 : i32, i32
  }
  func.func @transform_11(%arg0: i32) -> (i32, i32, i32) {
    %c0_i32 = arith.constant 0 : i32
    %c0_i32_0 = arith.constant 0 : i32
    %c0_i32_1 = arith.constant 0 : i32
    return %arg0, %c0_i32, %c0_i32_0 : i32, i32, i32
  }
}

</mosaic_0001>

<bundles_post_ra>
// kernel: posenet_forward.4
= control target key start
LH: loop header
LB: loop body
LE: loop exit
PB: predicated region body
PF: predicated region fallthrough
CT: control target
= control target key end

     0   :  { %s2639_s12 = smov 0   ;;  %s3187_s0 = inlined_call_operand.vmem [shape: bf16[2048,384], index: 0, kind: input, shape index: {}]   ;;  %s3188_s1 = inlined_call_operand.vmem [shape: bf16[384,16], index: 1, kind: input, shape index: {}]   ;;  %s3189_s2 = inlined_call_operand.vmem [shape: f32[1,16], index: 2, kind: input, shape index: {}]   ;;  %s3190_s3 = inlined_call_operand.vmem [shape: bf16[2048,16], index: 3, kind: output, shape index: {}]  }
   0x1 LB: > { %s2036_s13 = sadd.s32 4294967295, %s2616_s12   ;;  %p2040_p0 = scmp.ge.s32.totalorder %s2616_s12, 1  ;;  %s2616_s12 = sphi %s2639_s12, %s13_s12  }
   0x2   : > { %p139_p1 = scmp.lt.s32.totalorder %s2616_s12, 5 }
   0x4   : > { %p140_p2 = pnand %p2040_p0, %p139_p1 }
   0x5   : > { %v2458_v0 = vld [vmem:[%s3188_s1] sm:$0xff] (!%p140_p2)   ;;  %v2618_v1 = vmov (!%p140_p2), 0   ;;  %s2041_s16 = sshll.u32 (!%p140_p2), %s2036_s13, 6  ;;  %v2459_v2 = vld [vmem:[%s3188_s1 + $0x8] sm:$0xff] (!%p140_p2)   ;;  %v2460_v3 = vld [vmem:[%s3188_s1 + $0x10] sm:$0xff] (!%p140_p2)   ;;  %vm1915_vm0 = vcmask (!%p140_p2), 125952  }
   0x6   : > { %143 = sbr.rel (%p140_p2) target bundleno = 477 (0x1dd), region = 32  ;;  %1017 = vmatprep.subr.bf16.mxu0 (!%p140_p2), %v2618_v1  ;;  %2416 = vmatprep.subr.bf16.mxu1 (!%p140_p2), %v2618_v1  ;;  %p165_p3 = scmp.lt.s32.totalorder (!%p140_p2), %s2041_s16, 255  ;;  %v2461_v4 = vld [vmem:[%s3188_s1 + $0x18] sm:$0xff] (!%p140_p2)   ;;  %v2462_v5 = vld [vmem:[%s3188_s1 + $0x20] sm:$0xff] (!%p140_p2)   ;;  %v2463_v7 = vld [vmem:[%s3188_s1 + $0x28] sm:$0xff] (!%p140_p2)  }
   0x7   : > { %1018 = vmatpush1.bf16.msra.mxu0 (!%p140_p2), %v2458_v0  ;;  %2432 = vmatpush1.bf16.msra.mxu1 (!%p140_p2), %v2458_v0  ;;  %v2464_v9 = vld [vmem:[%s3188_s1 + $0x30] sm:$0xff] (!%p140_p2)   ;;  %v2465_v10 = vld [vmem:[%s3188_s1 + $0x38] sm:$0xff] (!%p140_p2)   ;;  %v2466_v11 = vld [vmem:[%s3188_s1 + $0x40] sm:$0xff] (!%p140_p2)  }
   0x8   : > { %1019 = vmatprep.subr.bf16.mxu0 (!%p140_p2), %v2618_v1  ;;  %2417 = vmatprep.subr.bf16.mxu1 (!%p140_p2), %v2618_v1  ;;  %v2467_v12 = vld [vmem:[%s3188_s1 + $0x48] sm:$0xff] (!%p140_p2)   ;;  %v2468_v13 = vld [vmem:[%s3188_s1 + $0x50] sm:$0xff] (!%p140_p2)   ;;  %v2469_v14 = vld [vmem:[%s3188_s1 + $0x58] sm:$0xff] (!%p140_p2)  }
   0x9   : > { %v2470_v15 = vld [vmem:[%s3188_s1 + $0x60] sm:$0xff] (!%p140_p2)   ;;  %v2471_v16 = vld [vmem:[%s3188_s1 + $0x68] sm:$0xff] (!%p140_p2)   ;;  %v2472_v17 = vld [vmem:[%s3188_s1 + $0x70] sm:$0xff] (!%p140_p2)  }
   0xa   : > { %v2473_v18 = vld [vmem:[%s3188_s1 + $0x78] sm:$0xff] (!%p140_p2)   ;;  %v2480_v19 = vld [vmem:[%s3188_s1 + $0x80] sm:$0xff] (!%p140_p2)   ;;  %v2487_v24 = vld [vmem:[%s3188_s1 + $0x88] sm:$0xff] (!%p140_p2)  }
   0xb   : > { %1020 = vmatpush1.bf16.msra.mxu0 (!%p140_p2), %v2459_v2  ;;  %2433 = vmatpush1.bf16.msra.mxu1 (!%p140_p2), %v2459_v2  ;;  %v2494_v25 = vld [vmem:[%s3188_s1 + $0x90] sm:$0xff] (!%p140_p2)   ;;  %v2501_v30 = vld [vmem:[%s3188_s1 + $0x98] sm:$0xff] (!%p140_p2)   ;;  %v2508_v32 = vld [vmem:[%s3188_s1 + $0xa0] sm:$0xff] (!%p140_p2)  }
   0xc   : > { %1021 = vmatprep.subr.bf16.mxu0 (!%p140_p2), %v2618_v1  ;;  %2418 = vmatprep.subr.bf16.mxu1 (!%p140_p2), %v2618_v1  ;;  %v2515_v36 = vld [vmem:[%s3188_s1 + $0xa8] sm:$0xff] (!%p140_p2)   ;;  %v2522_v41 = vld [vmem:[%s3188_s1 + $0xb0] sm:$0xff] (!%p140_p2)   ;;  %v2529_v42 = vld [vmem:[%s3188_s1 + $0xb8] sm:$0xff] (!%p140_p2)  }
   0xd   : > { %s3192_s16 = smov (!%p165_p3, %s2041_s16), 255 }
   0xe   : > { %s2448_s23 = smul.u32 12, %s3192_s16  ;;  %s2044_s19 = sshll.u32 %s3192_s16, 2 }
   0xf   : > { %1022 = vmatpush1.bf16.msra.mxu0 %v2460_v3  ;;  %2434 = vmatpush1.bf16.msra.mxu1 %v2460_v3  ;;  %s2934_s22 = scalar_lea.vmem %s3190_s3, %s2044_s19 }
  0x10   : > { %1023 = vmatprep.subr.bf16.mxu0 %v2618_v1  ;;  %2419 = vmatprep.subr.bf16.mxu1 %v2618_v1  ;;  %s2676_s28 = scalar_lea.vmem %s3187_s0, %s2448_s23 }
  0x11   : > { %v2476_v6 = vld [vmem:[%s2676_s28 + $0x4] ss:$12 sps:$4 sm:$0xff]   ;;  %v2474_v20 = vld [vmem:[%s2676_s28] ss:$12 sps:$4 sm:$0xff]   ;;  %v2481_v22 = vld [vmem:[%s2676_s28 + $0x1c] ss:$12 sps:$4 sm:$0xff]  }
  0x12   : > { %v2479_v8 = vld [vmem:[%s2676_s28 + $0x244] ss:$12 sps:$4 sm:$0xff]   ;;  %1049 = vmatprep.mubr.bf16.mxu0 %v2476_v6  ;;  %v2477_v21 = vld [vmem:[%s2676_s28 + $0x240] ss:$12 sps:$4 sm:$0xff]   ;;  %v2483_v23 = vld [vmem:[%s2676_s28 + $0x25c] ss:$12 sps:$4 sm:$0xff]  }
  0x13   : > { %1024 = vmatpush1.bf16.msra.mxu0 %v2461_v4  ;;  %2435 = vmatpush1.bf16.msra.mxu1 %v2461_v4  ;;  %v2485_v26 = vld [vmem:[%s2676_s28 + $0x18] ss:$12 sps:$4 sm:$0xff]   ;;  %v2488_v28 = vld [vmem:[%s2676_s28 + $0x34] ss:$12 sps:$4 sm:$0xff]   ;;  %v2492_v31 = vld [vmem:[%s2676_s28 + $0x30] ss:$12 sps:$4 sm:$0xff]  }
  0x14   : > { %1025 = vmatprep.subr.bf16.mxu0 %v2618_v1  ;;  %2420 = vmatprep.subr.bf16.mxu1 %v2618_v1  ;;  %v2486_v27 = vld [vmem:[%s2676_s28 + $0x258] ss:$12 sps:$4 sm:$0xff]   ;;  %v2490_v29 = vld [vmem:[%s2676_s28 + $0x274] ss:$12 sps:$4 sm:$0xff]   ;;  %v2493_v33 = vld [vmem:[%s2676_s28 + $0x270] ss:$12 sps:$4 sm:$0xff]  }
  0x15   : > { %1241 = vmatprep.mubr.bf16.mxu1 %v2479_v8  ;;  %v2495_v34 = vld [vmem:[%s2676_s28 + $0x4c] ss:$12 sps:$4 sm:$0xff]   ;;  %v2499_v37 = vld [vmem:[%s2676_s28 + $0x48] ss:$12 sps:$4 sm:$0xff]   ;;  %v2502_v39 = vld [vmem:[%s2676_s28 + $0x64] ss:$12 sps:$4 sm:$0xff]  }
  0x16   : > { %v2497_v35 = vld [vmem:[%s2676_s28 + $0x28c] ss:$12 sps:$4 sm:$0xff]   ;;  %v2500_v38 = vld [vmem:[%s2676_s28 + $0x288] ss:$12 sps:$4 sm:$0xff]   ;;  %v2504_v40 = vld [vmem:[%s2676_s28 + $0x2a4] ss:$12 sps:$4 sm:$0xff]  }
  0x17   : > { %1026 = vmatpush1.bf16.msra.mxu0 %v2462_v5  ;;  %2436 = vmatpush1.bf16.msra.mxu1 %v2462_v5  ;;  %v2506_v43 = vld [vmem:[%s2676_s28 + $0x60] ss:$12 sps:$4 sm:$0xff]   ;;  %v2509_v45 = vld [vmem:[%s2676_s28 + $0x7c] ss:$12 sps:$4 sm:$0xff]   ;;  %v2513_v47 = vld [vmem:[%s2676_s28 + $0x78] ss:$12 sps:$4 sm:$0xff]  }
  0x18   : > { %1027 = vmatprep.subr.bf16.mxu0 %v2618_v1  ;;  %2421 = vmatprep.subr.bf16.mxu1 %v2618_v1  ;;  %v2507_v44 = vld [vmem:[%s2676_s28 + $0x2a0] ss:$12 sps:$4 sm:$0xff]   ;;  %v2511_v46 = vld [vmem:[%s2676_s28 + $0x2bc] ss:$12 sps:$4 sm:$0xff]   ;;  %v2514_v48 = vld [vmem:[%s2676_s28 + $0x2b8] ss:$12 sps:$4 sm:$0xff]  }
  0x19   : > { %v2516_v49 = vld [vmem:[%s2676_s28 + $0x94] ss:$12 sps:$4 sm:$0xff]   ;;  %v2520_v51 = vld [vmem:[%s2676_s28 + $0x90] ss:$12 sps:$4 sm:$0xff]   ;;  %v2523_v53 = vld [vmem:[%s2676_s28 + $0xac] ss:$12 sps:$4 sm:$0xff]  }
  0x1a   : > { %v2518_v50 = vld [vmem:[%s2676_s28 + $0x2d4] ss:$12 sps:$4 sm:$0xff]   ;;  %v2521_v52 = vld [vmem:[%s2676_s28 + $0x2d0] ss:$12 sps:$4 sm:$0xff]   ;;  %v2525_v54 = vld [vmem:[%s2676_s28 + $0x2ec] ss:$12 sps:$4 sm:$0xff]  }
  0x1b   : > { %1028 = vmatpush1.bf16.msra.mxu0 %v2463_v7  ;;  %2437 = vmatpush1.bf16.msra.mxu1 %v2463_v7  ;;  %v2527_v55 = vld [vmem:[%s2676_s28 + $0xa8] ss:$12 sps:$4 sm:$0xff]   ;;  %v2530_v57 = vld [vmem:[%s2676_s28 + $0xc4] ss:$12 sps:$4 sm:$0xff]   ;;  %v2533_v59 = vld [vmem:[%s2676_s28 + $0xc0] ss:$12 sps:$4 sm:$0xff]  }
  0x1c   : > { %1029 = vmatprep.subr.bf16.mxu0 %v2618_v1  ;;  %2422 = vmatprep.subr.bf16.mxu1 %v2618_v1  ;;  %v2528_v56 = vld [vmem:[%s2676_s28 + $0x2e8] ss:$12 sps:$4 sm:$0xff]   ;;  %v2534_v60 = vld [vmem:[%s2676_s28 + $0x20] ss:$12 sps:$4 sm:$0xff]   ;;  %v2537_v62 = vld [vmem:[%s2676_s28 + $0x38] ss:$12 sps:$4 sm:$0xff]  }
  0x1d   : > { %v2532_v58 = vld [vmem:[%s2676_s28 + $0x8] ss:$12 sps:$4 sm:$0xff]   ;;  %v2538_v63 = vld [vmem:[%s2676_s28 + $0xd8] ss:$12 sps:$4 sm:$0xff]   ;;  %v2539_v0 = vld [vmem:[%s2676_s28 + $0x50] ss:$12 sps:$4 sm:$0xff]  }
  0x1e   : > { %v2535_v61 = vld [vmem:[%s2676_s28 + $0xdc] ss:$12 sps:$4 sm:$0xff]   ;;  %v2544_v4 = vld [vmem:[%s2676_s28 + $0x80] ss:$12 sps:$4 sm:$0xff]   ;;  %v2547_v6 = vld [vmem:[%s2676_s28 + $0x98] ss:$12 sps:$4 sm:$0xff]  }
  0x1f   : > { %1030 = vmatpush1.bf16.msra.mxu0 %v2464_v9  ;;  %2438 = vmatpush1.bf16.msra.mxu1 %v2464_v9  ;;  %v2542_v2 = vld [vmem:[%s2676_s28 + $0x68] ss:$12 sps:$4 sm:$0xff]   ;;  %v2543_v3 = vld [vmem:[%s2676_s28 + $0xf0] ss:$12 sps:$4 sm:$0xff]   ;;  %v2545_v5 = vld [vmem:[%s2676_s28 + $0x10c] ss:$12 sps:$4 sm:$0xff]  }
  0x20   : > { %1031 = vmatprep.subr.bf16.mxu0 %v2618_v1  ;;  %2423 = vmatprep.subr.bf16.mxu1 %v2618_v1  ;;  %v2548_v7 = vld [vmem:[%s2676_s28 + $0x108] ss:$12 sps:$4 sm:$0xff]   ;;  %v2549_v8 = vld [vmem:[%s2676_s28 + $0xb0] ss:$12 sps:$4 sm:$0xff]  }
  0x21   : > { %v2550_v9 = vld [vmem:[%s2676_s28 + $0x124] ss:$12 sps:$4 sm:$0xff]  }
  0x23   : > { %1032 = vmatpush1.bf16.msra.mxu0 %v2465_v10  ;;  %2439 = vmatpush1.bf16.msra.mxu1 %v2465_v10  ;;  %v2552_v10 = vld [vmem:[%s2676_s28 + $0xc8] ss:$12 sps:$4 sm:$0xff]  }
  0x24   : > { %1033 = vmatprep.subr.bf16.mxu0 %v2618_v1  ;;  %2424 = vmatprep.subr.bf16.mxu1 %v2618_v1 }
  0x27   : > { %1034 = vmatpush1.bf16.msra.mxu0 %v2466_v11  ;;  %2440 = vmatpush1.bf16.msra.mxu1 %v2466_v11  ;;  %v2553_v11 = vld [vmem:[%s2676_s28 + $0x120] ss:$12 sps:$4 sm:$0xff]  }
  0x28   : > { %1035 = vmatprep.subr.bf16.mxu0 %v2618_v1  ;;  %2425 = vmatprep.subr.bf16.mxu1 %v2618_v1 }
  0x2b   : > { %1036 = vmatpush1.bf16.msra.mxu0 %v2467_v12  ;;  %2441 = vmatpush1.bf16.msra.mxu1 %v2467_v12  ;;  %v2554_v12 = vld [vmem:[%s2676_s28 + $0xe0] ss:$12 sps:$4 sm:$0xff]  }
  0x2c   : > { %1037 = vmatprep.subr.bf16.mxu0 %v2618_v1  ;;  %2426 = vmatprep.subr.bf16.mxu1 %v2618_v1 }
  0x2f   : > { %1038 = vmatpush1.bf16.msra.mxu0 %v2468_v13  ;;  %2442 = vmatpush1.bf16.msra.mxu1 %v2468_v13  ;;  %v2555_v13 = vld [vmem:[%s2676_s28 + $0x13c] ss:$12 sps:$4 sm:$0xff]  }
  0x30   : > { %1039 = vmatprep.subr.bf16.mxu0 %v2618_v1  ;;  %2427 = vmatprep.subr.bf16.mxu1 %v2618_v1 }
  0x33   : > { %1040 = vmatpush1.bf16.msra.mxu0 %v2469_v14  ;;  %2443 = vmatpush1.bf16.msra.mxu1 %v2469_v14  ;;  %v2557_v14 = vld [vmem:[%s2676_s28 + $0xf8] ss:$12 sps:$4 sm:$0xff]  }
  0x34   : > { %1041 = vmatprep.subr.bf16.mxu0 %v2618_v1  ;;  %2428 = vmatprep.subr.bf16.mxu1 %v2618_v1 }
  0x37   : > { %1042 = vmatpush1.bf16.msra.mxu0 %v2470_v15  ;;  %2444 = vmatpush1.bf16.msra.mxu1 %v2470_v15  ;;  %v2558_v15 = vld [vmem:[%s2676_s28 + $0x138] ss:$12 sps:$4 sm:$0xff]  }
  0x38   : > { %1043 = vmatprep.subr.bf16.mxu0 %v2618_v1  ;;  %2429 = vmatprep.subr.bf16.mxu1 %v2618_v1 }
  0x3b   : > { %1044 = vmatpush1.bf16.msra.mxu0 %v2471_v16  ;;  %2445 = vmatpush1.bf16.msra.mxu1 %v2471_v16  ;;  %v2559_v16 = vld [vmem:[%s2676_s28 + $0x110] ss:$12 sps:$4 sm:$0xff]  }
  0x3c   : > { %1045 = vmatprep.subr.bf16.mxu0 %v2618_v1  ;;  %2430 = vmatprep.subr.bf16.mxu1 %v2618_v1 }
  0x3f   : > { %1046 = vmatpush1.bf16.msra.mxu0 %v2472_v17  ;;  %2446 = vmatpush1.bf16.msra.mxu1 %v2472_v17  ;;  %v2560_v17 = vld [vmem:[%s2676_s28 + $0x154] ss:$12 sps:$4 sm:$0xff]  }
  0x40   : > { %1047 = vmatprep.subr.bf16.mxu0 %v2618_v1  ;;  %2431 = vmatprep.subr.bf16.mxu1 %v2618_v1  ;;  %v2540_v1 = vld [vmem:[%s2676_s28 + $0xf4] ss:$12 sps:$4 sm:$0xff]  }
  0x43   : > { %1048 = vmatpush1.bf16.msra.mxu0 %v2473_v18  ;;  %2447 = vmatpush1.bf16.msra.mxu1 %v2473_v18  ;;  %v2562_v18 = vld [vmem:[%s2676_s28 + $0x128] ss:$12 sps:$4 sm:$0xff]  }
  0x44   : > { %2336 = vmatprep.subr.bf16.mxu1 %v2480_v19 }
  0x46   : > { %1050 = vmatmul.mubr.bf16.vlgmr.msra.gmra.mrb[0].mxu0 %v2474_v20  ;;  %1242 = vmatmul.mubr.bf16.vlgmr.msra.gmra.mrb[0].mxu1 %v2477_v21  ;;  %v2564_v20 = vld [vmem:[%s2676_s28 + $0x140] ss:$12 sps:$4 sm:$0xff]  }
  0x47   : > { %2337 = vmatpush3.bf16.msra.mxu1 %v2480_v19  ;;  %1057 = vmatprep.mubr.bf16.mxu0 %v2481_v22  ;;  %v2563_v19 = vld [vmem:[%s2676_s28 + $0x150] ss:$12 sps:$4 sm:$0xff]   ;;  %v2565_v21 = vld [vmem:[%s2676_s28 + $0x16c] ss:$12 sps:$4 sm:$0xff]  }
  0x48   : > { %1249 = vmatprep.mubr.bf16.mxu1 %v2483_v23  ;;  %2338 = vmatprep.subr.bf16.mxu1 %v2487_v24  ;;  %v2567_v22 = vld [vmem:[%s2676_s28 + $0x158] ss:$12 sps:$4 sm:$0xff]   ;;  %v2568_v23 = vld [vmem:[%s2676_s28 + $0x168] ss:$12 sps:$4 sm:$0xff]  }
  0x4b   : > { %2339 = vmatpush3.bf16.msra.mxu1 %v2487_v24  ;;  %v2569_v24 = vld [vmem:[%s2676_s28 + $0x170] ss:$12 sps:$4 sm:$0xff]  }
  0x4c   : > { %2340 = vmatprep.subr.bf16.mxu1 %v2494_v25 }
  0x4e   : > { %1058 = vmatmul.mubr.bf16.gmra.mrb[4].mxu0 %v2485_v26  ;;  %1250 = vmatmul.mubr.bf16.gmra.mrb[4].mxu1 %v2486_v27  ;;  %v2572_v26 = vld [vmem:[%s2676_s28 + $0x188] ss:$12 sps:$4 sm:$0xff]   ;;  %v2573_v27 = vld [vmem:[%s2676_s28 + $0x180] ss:$12 sps:$4 sm:$0xff]  }
  0x4f   : > { %1065 = vmatprep.mubr.bf16.mxu0 %v2488_v28  ;;  %1257 = vmatprep.mubr.bf16.mxu1 %v2490_v29  ;;  %v2574_v28 = vld [vmem:[%s2676_s28 + $0x1a0] ss:$12 sps:$4 sm:$0xff]   ;;  %v2575_v29 = vld [vmem:[%s2676_s28 + $0x19c] ss:$12 sps:$4 sm:$0xff]  }
  0x50   : > { %2341 = vmatpush3.bf16.msra.mxu1 %v2494_v25  ;;  %v2570_v25 = vld [vmem:[%s2676_s28 + $0x184] ss:$12 sps:$4 sm:$0xff]  }
  0x51   : > { %2342 = vmatprep.subr.bf16.mxu1 %v2501_v30 }
  0x54   : > { %2343 = vmatpush3.bf16.msra.mxu1 %v2501_v30  ;;  %v2577_v30 = vld [vmem:[%s2676_s28 + $0x1b8] ss:$12 sps:$4 sm:$0xff]  }
  0x55   : > { %2344 = vmatprep.subr.bf16.mxu1 %v2508_v32 }
  0x56   : > { %1066 = vmatmul.mubr.bf16.gmra.mrb[8].mxu0 %v2492_v31  ;;  %1258 = vmatmul.mubr.bf16.gmra.mrb[8].mxu1 %v2493_v33  ;;  %v2578_v31 = vld [vmem:[%s2676_s28 + $0x198] ss:$12 sps:$4 sm:$0xff]   ;;  %v2580_v33 = vld [vmem:[%s2676_s28 + $0x1b4] ss:$12 sps:$4 sm:$0xff]  }
  0x57   : > { %1073 = vmatprep.mubr.bf16.mxu0 %v2495_v34  ;;  %1265 = vmatprep.mubr.bf16.mxu1 %v2497_v35  ;;  %v2582_v34 = vld [vmem:[%s2676_s28 + $0x1e8] ss:$12 sps:$4 sm:$0xff]   ;;  %v2583_v35 = vld [vmem:[%s2676_s28 + $0x1b0] ss:$12 sps:$4 sm:$0xff]  }
  0x58   : > { %2345 = vmatpush3.bf16.msra.mxu1 %v2508_v32  ;;  %v2579_v32 = vld [vmem:[%s2676_s28 + $0x1d0] ss:$12 sps:$4 sm:$0xff]  }
  0x59   : > { %2346 = vmatprep.subr.bf16.mxu1 %v2515_v36 }
  0x5c   : > { %2347 = vmatpush3.bf16.msra.mxu1 %v2515_v36  ;;  %v2584_v36 = vld [vmem:[%s2676_s28 + $0x200] ss:$12 sps:$4 sm:$0xff]  }
  0x5d   : > { %2348 = vmatprep.subr.bf16.mxu1 %v2522_v41 }
  0x5e   : > { %1074 = vmatmul.mubr.bf16.gmra.mrb[12].mxu0 %v2499_v37  ;;  %1266 = vmatmul.mubr.bf16.gmra.mrb[12].mxu1 %v2500_v38  ;;  %v2585_v37 = vld [vmem:[%s2676_s28 + $0x1cc] ss:$12 sps:$4 sm:$0xff]  }
  0x5f   : > { %1081 = vmatprep.mubr.bf16.mxu0 %v2502_v39  ;;  %1273 = vmatprep.mubr.bf16.mxu1 %v2504_v40  ;;  %v2587_v38 = vld [vmem:[%s2676_s28 + $0x218] ss:$12 sps:$4 sm:$0xff]   ;;  %v2588_v39 = vld [vmem:[%s2676_s28 + $0x1c8] ss:$12 sps:$4 sm:$0xff]   ;;  %v2589_v40 = vld [vmem:[%s2676_s28 + $0x230] ss:$12 sps:$4 sm:$0xff]  }
  0x60   : > { %2349 = vmatpush3.bf16.msra.mxu1 %v2522_v41  ;;  %v2590_v41 = vld [vmem:[%s2676_s28 + $0x1e4] ss:$12 sps:$4 sm:$0xff]  }
  0x61   : > { %2350 = vmatprep.subr.bf16.mxu1 %v2529_v42 }
  0x64   : > { %2351 = vmatpush3.bf16.msra.mxu1 %v2529_v42  ;;  %v2592_v42 = vld [vmem:[%s2676_s28 + $0x248] ss:$12 sps:$4 sm:$0xff]  }
  0x66   : > { %1082 = vmatmul.mubr.bf16.gmra.mrb[16].mxu0 %v2506_v43  ;;  %1274 = vmatmul.mubr.bf16.gmra.mrb[16].mxu1 %v2507_v44  ;;  %v2593_v43 = vld [vmem:[%s2676_s28 + $0x1e0] ss:$12 sps:$4 sm:$0xff]  }
  0x67   : > { %1089 = vmatprep.mubr.bf16.mxu0 %v2509_v45  ;;  %1281 = vmatprep.mubr.bf16.mxu1 %v2511_v46  ;;  %v2594_v44 = vld [vmem:[%s2676_s28 + $0x260] ss:$12 sps:$4 sm:$0xff]   ;;  %v2595_v45 = vld [vmem:[%s2676_s28 + $0x1fc] ss:$12 sps:$4 sm:$0xff]   ;;  %v2597_v46 = vld [vmem:[%s2676_s28 + $0x278] ss:$12 sps:$4 sm:$0xff]  }
  0x6e   : > { %1090 = vmatmul.mubr.bf16.gmra.mrb[20].mxu0 %v2513_v47  ;;  %1282 = vmatmul.mubr.bf16.gmra.mrb[20].mxu1 %v2514_v48  ;;  %v2598_v47 = vld [vmem:[%s2676_s28 + $0x1f8] ss:$12 sps:$4 sm:$0xff]   ;;  %v2599_v48 = vld [vmem:[%s2676_s28 + $0x290] ss:$12 sps:$4 sm:$0xff]  }
  0x6f   : > { %1097 = vmatprep.mubr.bf16.mxu0 %v2516_v49  ;;  %1289 = vmatprep.mubr.bf16.mxu1 %v2518_v50  ;;  %v2600_v49 = vld [vmem:[%s2676_s28 + $0x214] ss:$12 sps:$4 sm:$0xff]  }
  0x70   : > { %v2602_v50 = vld [vmem:[%s2676_s28 + $0x2a8] ss:$12 sps:$4 sm:$0xff]  }
  0x76   : > { %1098 = vmatmul.mubr.bf16.gmra.mrb[24].mxu0 %v2520_v51  ;;  %1290 = vmatmul.mubr.bf16.gmra.mrb[24].mxu1 %v2521_v52  ;;  %v2603_v51 = vld [vmem:[%s2676_s28 + $0x210] ss:$12 sps:$4 sm:$0xff]   ;;  %v2604_v52 = vld [vmem:[%s2676_s28 + $0x2c0] ss:$12 sps:$4 sm:$0xff]  }
  0x77   : > { %1105 = vmatprep.mubr.bf16.mxu0 %v2523_v53  ;;  %1297 = vmatprep.mubr.bf16.mxu1 %v2525_v54  ;;  %v2605_v53 = vld [vmem:[%s2676_s28 + $0x22c] ss:$12 sps:$4 sm:$0xff]  }
  0x78   : > { %v2607_v54 = vld [vmem:[%s2676_s28 + $0x2d8] ss:$12 sps:$4 sm:$0xff]  }
  0x7e   : > { %1106 = vmatmul.mubr.bf16.gmra.mrb[28].mxu0 %v2527_v55  ;;  %1298 = vmatmul.mubr.bf16.gmra.mrb[28].mxu1 %v2528_v56  ;;  %v2608_v55 = vld [vmem:[%s2676_s28 + $0x228] ss:$12 sps:$4 sm:$0xff]   ;;  %v2609_v56 = vld [vmem:[%s2676_s28 + $0x2f0] ss:$12 sps:$4 sm:$0xff]  }
  0x7f   : > { %1113 = vmatprep.mubr.bf16.mxu0 %v2530_v57  ;;  %2352 = vmatprep.mubr.bf16.mxu1 %v2532_v58 }
  0x86   : > { %1114 = vmatmul.mubr.bf16.gmra.mrb[32].mxu0 %v2533_v59  ;;  %2353 = vmatmul.mubr.bf16.vlgmr.msra.gmra.mrb[32].mxu1 %v2534_v60 }
  0x87   : > { %1121 = vmatprep.mubr.bf16.mxu0 %v2535_v61  ;;  %2356 = vmatprep.mubr.bf16.mxu1 %v2537_v62 }
  0x8e   : > { %1122 = vmatmul.mubr.bf16.gmra.mrb[36].mxu0 %v2538_v63  ;;  %2357 = vmatmul.mubr.bf16.gmra.mrb[36].mxu1 %v2539_v0 }
  0x8f   : > { %1129 = vmatprep.mubr.bf16.mxu0 %v2540_v1  ;;  %2360 = vmatprep.mubr.bf16.mxu1 %v2542_v2 }
  0x96   : > { %1130 = vmatmul.mubr.bf16.gmra.mrb[40].mxu0 %v2543_v3  ;;  %2361 = vmatmul.mubr.bf16.gmra.mrb[40].mxu1 %v2544_v4 }
  0x97   : > { %1137 = vmatprep.mubr.bf16.mxu0 %v2545_v5  ;;  %2364 = vmatprep.mubr.bf16.mxu1 %v2547_v6 }
  0x9e   : > { %1138 = vmatmul.mubr.bf16.gmra.mrb[44].mxu0 %v2548_v7  ;;  %2365 = vmatmul.mubr.bf16.gmra.mrb[44].mxu1 %v2549_v8 }
  0x9f   : > { %1145 = vmatprep.mubr.bf16.mxu0 %v2550_v9  ;;  %2368 = vmatprep.mubr.bf16.mxu1 %v2552_v10 }
  0xa6   : > { %1146 = vmatmul.mubr.bf16.gmra.mrb[48].mxu0 %v2553_v11  ;;  %2369 = vmatmul.mubr.bf16.gmra.mrb[48].mxu1 %v2554_v12 }
  0xa7   : > { %1153 = vmatprep.mubr.bf16.mxu0 %v2555_v13  ;;  %2372 = vmatprep.mubr.bf16.mxu1 %v2557_v14 }
  0xae   : > { %1154 = vmatmul.mubr.bf16.gmra.mrb[52].mxu0 %v2558_v15  ;;  %2373 = vmatmul.mubr.bf16.gmra.mrb[52].mxu1 %v2559_v16 }
  0xaf   : > { %1161 = vmatprep.mubr.bf16.mxu0 %v2560_v17  ;;  %2376 = vmatprep.mubr.bf16.mxu1 %v2562_v18 }
  0xb6   : > { %1162 = vmatmul.mubr.bf16.gmra.mrb[56].mxu0 %v2563_v19  ;;  %2377 = vmatmul.mubr.bf16.gmra.mrb[56].mxu1 %v2564_v20 }
  0xb7   : > { %1169 = vmatprep.mubr.bf16.mxu0 %v2565_v21  ;;  %2380 = vmatprep.mubr.bf16.mxu1 %v2567_v22 }
  0xbe   : > { %1170 = vmatmul.mubr.bf16.gmra.mrb[60].mxu0 %v2568_v23  ;;  %2381 = vmatmul.mubr.bf16.gmra.mrb[60].mxu1 %v2569_v24 }
  0xbf   : > { %1177 = vmatprep.mubr.bf16.mxu0 %v2570_v25  ;;  %2384 = vmatprep.mubr.bf16.mxu1 %v2572_v26 }
  0xc6   : > { %1178 = vmatmul.mubr.bf16.gmra.mrb[64].mxu0 %v2573_v27  ;;  %2385 = vmatmul.mubr.bf16.gmra.mrb[64].mxu1 %v2574_v28 }
  0xc7   : > { %1185 = vmatprep.mubr.bf16.mxu0 %v2575_v29  ;;  %2388 = vmatprep.mubr.bf16.mxu1 %v2577_v30 }
  0xce   : > { %1186 = vmatmul.mubr.bf16.gmra.mrb[68].mxu0 %v2578_v31  ;;  %2389 = vmatmul.mubr.bf16.gmra.mrb[68].mxu1 %v2579_v32 }
  0xcf   : > { %1193 = vmatprep.mubr.bf16.mxu0 %v2580_v33  ;;  %2392 = vmatprep.mubr.bf16.mxu1 %v2582_v34 }
  0xd6   : > { %1194 = vmatmul.mubr.bf16.gmra.mrb[72].mxu0 %v2583_v35  ;;  %2393 = vmatmul.mubr.bf16.gmra.mrb[72].mxu1 %v2584_v36 }
  0xd7   : > { %1201 = vmatprep.mubr.bf16.mxu0 %v2585_v37  ;;  %2396 = vmatprep.mubr.bf16.mxu1 %v2587_v38 }
  0xde   : > { %1202 = vmatmul.mubr.bf16.gmra.mrb[76].mxu0 %v2588_v39  ;;  %2397 = vmatmul.mubr.bf16.gmra.mrb[76].mxu1 %v2589_v40 }
  0xdf   : > { %1209 = vmatprep.mubr.bf16.mxu0 %v2590_v41  ;;  %2400 = vmatprep.mubr.bf16.mxu1 %v2592_v42 }
  0xe6   : > { %1210 = vmatmul.mubr.bf16.gmra.mrb[80].mxu0 %v2593_v43  ;;  %2401 = vmatmul.mubr.bf16.gmra.mrb[80].mxu1 %v2594_v44 }
  0xe7   : > { %1217 = vmatprep.mubr.bf16.mxu0 %v2595_v45  ;;  %2404 = vmatprep.mubr.bf16.mxu1 %v2597_v46 }
  0xee   : > { %1218 = vmatmul.mubr.bf16.gmra.mrb[84].mxu0 %v2598_v47  ;;  %2405 = vmatmul.mubr.bf16.gmra.mrb[84].mxu1 %v2599_v48 }
  0xef   : > { %1225 = vmatprep.mubr.bf16.mxu0 %v2600_v49  ;;  %2408 = vmatprep.mubr.bf16.mxu1 %v2602_v50 }
  0xf6   : > { %1226 = vmatmul.mubr.bf16.gmra.mrb[88].mxu0 %v2603_v51  ;;  %2409 = vmatmul.mubr.bf16.gmra.mrb[88].mxu1 %v2604_v52 }
  0xf7   : > { %1233 = vmatprep.mubr.bf16.mxu0 %v2605_v53  ;;  %2412 = vmatprep.mubr.bf16.mxu1 %v2607_v54 }
  0xfe   : > { %1234 = vmatmul.mubr.bf16.gmra.mrb[92].mxu0 %v2608_v55  ;;  %2413 = vmatmul.mubr.bf16.gmra.mrb[92].mxu1 %v2609_v56 }
 0x119   : > { %v2855_v57 = vpop.f32.mrb[0].mxu0  ;;  %v2857_v58 = vpop.f32.mrb[0].mxu1 }
 0x11a   : > { %v1053_v59 = vpop.f32.mrb[1].mxu0  ;;  %v1245_v60 = vpop.f32.mrb[1].mxu1 }
 0x11b   : > { %v2859_v61 = vpop.f32.mrb[2].mxu0  ;;  %v2861_v62 = vpop.f32.mrb[2].mxu1  ;;  %v2918_v59 = vld [vmem:[%s3189_s2] ss:$0 sm:$0xff] }
 0x11c   : > { %v1056_v63 = vpop.f32.mrb[3].mxu0  ;;  %v1248_v0 = vpop.f32.mrb[3].mxu1 }
 0x11d   : > { %v1052_v63 = vadd.f32 %v2918_v59, %v2855_v57 }
 0x121   : > { %v1059_v1 = vpop.f32.mrb[4].mxu0  ;;  %v2863_v2 = vpop.f32.mrb[4].mxu1 }
 0x122   : > { %v1061_v3 = vpop.f32.mrb[5].mxu0  ;;  %v1253_v4 = vpop.f32.mrb[5].mxu1  ;;  %v1060_v60 = vadd.f32 %v2918_v59, %v1059_v1 }
 0x123   : > { %v1062_v5 = vpop.f32.mrb[6].mxu0  ;;  %v2865_v6 = vpop.f32.mrb[6].mxu1 }
 0x124   : > { %v1064_v7 = vpop.f32.mrb[7].mxu0  ;;  %v1256_v8 = vpop.f32.mrb[7].mxu1  ;;  %v1063_v4 = vadd.f32 %v2918_v59, %v1062_v5 }
 0x129   : > { %v2867_v9 = vpop.f32.mrb[8].mxu0  ;;  %v2869_v10 = vpop.f32.mrb[8].mxu1 }
 0x12a   : > { %v1069_v11 = vpop.f32.mrb[9].mxu0  ;;  %v1261_v12 = vpop.f32.mrb[9].mxu1 }
 0x12b   : > { %v2871_v13 = vpop.f32.mrb[10].mxu0  ;;  %v2873_v14 = vpop.f32.mrb[10].mxu1  ;;  %v1055_v12 = vadd.f32 %v2918_v59, %v2859_v61 }
 0x12c   : > { %v1072_v15 = vpop.f32.mrb[11].mxu0  ;;  %v1264_v16 = vpop.f32.mrb[11].mxu1 }
 0x131   : > { %v2875_v17 = vpop.f32.mrb[12].mxu0  ;;  %v2877_v18 = vpop.f32.mrb[12].mxu1 }
 0x132   : > { %v1077_v19 = vpop.f32.mrb[13].mxu0  ;;  %v1269_v20 = vpop.f32.mrb[13].mxu1 }
 0x133   : > { %v2879_v21 = vpop.f32.mrb[14].mxu0  ;;  %v2881_v22 = vpop.f32.mrb[14].mxu1 }
 0x134   : > { %v1080_v23 = vpop.f32.mrb[15].mxu0  ;;  %v1272_v24 = vpop.f32.mrb[15].mxu1 }
 0x139   : > { %v2883_v25 = vpop.f32.mrb[16].mxu0  ;;  %v2885_v26 = vpop.f32.mrb[16].mxu1 }
 0x13a   : > { %v1085_v27 = vpop.f32.mrb[17].mxu0  ;;  %v1277_v28 = vpop.f32.mrb[17].mxu1 }
 0x13b   : > { %v2887_v29 = vpop.f32.mrb[18].mxu0  ;;  %v2889_v30 = vpop.f32.mrb[18].mxu1 }
 0x13c   : > { %v1088_v31 = vpop.f32.mrb[19].mxu0  ;;  %v1280_v32 = vpop.f32.mrb[19].mxu1 }
 0x13d   : > { %v1076_v32 = vadd.f32 %v2918_v59, %v2875_v17 }
 0x141   : > { %v2891_v33 = vpop.f32.mrb[20].mxu0  ;;  %v2893_v34 = vpop.f32.mrb[20].mxu1 }
 0x142   : > { %v1093_v35 = vpop.f32.mrb[21].mxu0  ;;  %v1285_v36 = vpop.f32.mrb[21].mxu1 }
 0x143   : > { %v2895_v37 = vpop.f32.mrb[22].mxu0  ;;  %v2897_v38 = vpop.f32.mrb[22].mxu1  ;;  %v1068_v36 = vadd.f32 %v2918_v59, %v2867_v9 }
 0x144   : > { %v1096_v39 = vpop.f32.mrb[23].mxu0  ;;  %v1288_v40 = vpop.f32.mrb[23].mxu1 }
 0x149   : > { %v2899_v41 = vpop.f32.mrb[24].mxu0  ;;  %v2901_v42 = vpop.f32.mrb[24].mxu1 }
 0x14a   : > { %v1101_v43 = vpop.f32.mrb[25].mxu0  ;;  %v1293_v44 = vpop.f32.mrb[25].mxu1 }
 0x14b   : > { %v2903_v45 = vpop.f32.mrb[26].mxu0  ;;  %v2905_v46 = vpop.f32.mrb[26].mxu1  ;;  %v1079_v44 = vadd.f32 %v2918_v59, %v2879_v21 }
 0x14c   : > { %v1104_v47 = vpop.f32.mrb[27].mxu0  ;;  %v1296_v48 = vpop.f32.mrb[27].mxu1 }
 0x151   : > { %v2907_v49 = vpop.f32.mrb[28].mxu0  ;;  %v2909_v50 = vpop.f32.mrb[28].mxu1 }
 0x152   : > { %v1109_v51 = vpop.f32.mrb[29].mxu0  ;;  %v1301_v52 = vpop.f32.mrb[29].mxu1 }
 0x153   : > { %v2911_v53 = vpop.f32.mrb[30].mxu0  ;;  %v2913_v54 = vpop.f32.mrb[30].mxu1  ;;  %v1071_v51 = vadd.f32 %v2918_v59, %v2871_v13 }
 0x154   : > { %v1112_v55 = vpop.f32.mrb[31].mxu0  ;;  %v1304_v56 = vpop.f32.mrb[31].mxu1 }
 0x159   : > { %v2923_v0 = vpop.f32.mrb[32].mxu0  ;;  %v2354_v3 = vpop.f32.mrb[32].mxu1 }
 0x15a   : > { %v1349_v7 = vadd.f32 %v2354_v3, %v1060_v60  ;;  %v1117_v8 = vpop.f32.mrb[33].mxu0  ;;  %v1340_v11 = vpop.f32.mrb[33].mxu1 }
 0x15b   : > { %v1341_v15 = vadd.f32 %v1340_v11, %v1052_v63  ;;  %v2929_v16 = vpop.f32.mrb[34].mxu0  ;;  %v2355_v19 = vpop.f32.mrb[34].mxu1 }
 0x15c   : > { %v1597_v1 = vmax.f32 %v1349_v7, 0.0  ;;  %v1352_v20 = vadd.f32 %v2355_v19, %v1063_v4  ;;  %v1120_v23 = vpop.f32.mrb[35].mxu0  ;;  %v1343_v57 = vpop.f32.mrb[35].mxu1  ;;  %v1084_v19 = vadd.f32 %v2918_v59, %v2883_v25 }
 0x15d   : > { %v1595_v5 = vmax.f32 %v1341_v15, 0.0  ;;  %v1344_v24 = vadd.f32 %v1343_v57, %v1055_v12  ;;  %v1092_v12 = vadd.f32 %v2918_v59, %v2891_v33  ;;  %v1095_v57 = vadd.f32 %v2918_v59, %v2895_v37 }
 0x15e   : > { %v2234_v61 = vpack.c.bf16 %v1597_v1, %v1597_v1  ;;  %v1598_v27 = vmax.f32 %v1352_v20, 0.0 }
 0x15f   : > { %v2232_v28 = vpack.c.bf16 %v1595_v5, %v1595_v5  ;;  %v1596_v31 = vmax.f32 %v1344_v24, 0.0 }
 0x160   : > { %1918 = vst.msk [vmem:[%s2934_s22 + $0x8] sm:$0xf] %vm1915_vm0, %v2234_v61  ;;  %v2235_v35 = vpack.c.bf16 %v1598_v27, %v1598_v27  ;;  %v1087_v61 = vadd.f32 %v2918_v59, %v2887_v29 }
 0x161   : > { %1916 = vst.msk [vmem:[%s2934_s22] sm:$0xf] %vm1915_vm0, %v2232_v28  ;;  %v2233_v39 = vpack.c.bf16 %v1596_v31, %v1596_v31  ;;  %v2944_v40 = vpop.f32.mrb[36].mxu0  ;;  %v2358_v43 = vpop.f32.mrb[36].mxu1 }
 0x162   : > { %1919 = vst.msk [vmem:[%s2934_s22 + $0xc] sm:$0xf] %vm1915_vm0, %v2235_v35  ;;  %v1365_v47 = vadd.f32 %v2358_v43, %v1076_v32  ;;  %v1125_v48 = vpop.f32.mrb[37].mxu0  ;;  %v1356_v17 = vpop.f32.mrb[37].mxu1 }
 0x163   : > { %1917 = vst.msk [vmem:[%s2934_s22 + $0x4] sm:$0xf] %vm1915_vm0, %v2233_v39  ;;  %v1357_v9 = vadd.f32 %v1356_v17, %v1068_v36  ;;  %v2954_v52 = vpop.f32.mrb[38].mxu0  ;;  %v2359_v55 = vpop.f32.mrb[38].mxu1  ;;  %v1108_v48 = vadd.f32 %v2918_v59, %v2907_v49  ;;  %v1103_v49 = vadd.f32 %v2918_v59, %v2903_v45  ;;  %v1124_v45 = vadd.f32 %v2918_v59, %v2944_v40 }
 0x164   : > { %v1601_v56 = vmax.f32 %v1365_v47, 0.0  ;;  %v1368_v60 = vadd.f32 %v2359_v55, %v1079_v44  ;;  %v1128_v63 = vpop.f32.mrb[39].mxu0  ;;  %v1359_v21 = vpop.f32.mrb[39].mxu1  ;;  %v1119_v40 = vadd.f32 %v2918_v59, %v2929_v16 }
 0x165   : > { %v1599_v3 = vmax.f32 %v1357_v9, 0.0  ;;  %v1360_v4 = vadd.f32 %v1359_v21, %v1071_v51  ;;  %v1100_v51 = vadd.f32 %v2918_v59, %v2899_v41 }
 0x166   : > { %v2238_v7 = vpack.c.bf16 %v1601_v56, %v1601_v56  ;;  %v1602_v8 = vmax.f32 %v1368_v60, 0.0  ;;  %v1111_v60 = vadd.f32 %v2918_v59, %v2911_v53 }
 0x167   : > { %v2236_v11 = vpack.c.bf16 %v1599_v3, %v1599_v3  ;;  %v1600_v13 = vmax.f32 %v1360_v4, 0.0 }
 0x168   : > { %1922 = vst.msk [vmem:[%s2934_s22 + $0x18] sm:$0xf] %vm1915_vm0, %v2238_v7  ;;  %v2239_v15 = vpack.c.bf16 %v1602_v8, %v1602_v8 }
 0x169   : > { %1920 = vst.msk [vmem:[%s2934_s22 + $0x10] sm:$0xf] %vm1915_vm0, %v2236_v11  ;;  %v2237_v1 = vpack.c.bf16 %v1600_v13, %v1600_v13  ;;  %v2964_v20 = vpop.f32.mrb[40].mxu0  ;;  %v2362_v23 = vpop.f32.mrb[40].mxu1 }
 0x16a   : > { %1923 = vst.msk [vmem:[%s2934_s22 + $0x1c] sm:$0xf] %vm1915_vm0, %v2239_v15  ;;  %v1381_v5 = vadd.f32 %v2362_v23, %v1092_v12  ;;  %v1133_v24 = vpop.f32.mrb[41].mxu0  ;;  %v1372_v33 = vpop.f32.mrb[41].mxu1 }
 0x16b   : > { %1921 = vst.msk [vmem:[%s2934_s22 + $0x14] sm:$0xf] %vm1915_vm0, %v2237_v1  ;;  %v1373_v25 = vadd.f32 %v1372_v33, %v1084_v19  ;;  %v2974_v27 = vpop.f32.mrb[42].mxu0  ;;  %v2363_v28 = vpop.f32.mrb[42].mxu1  ;;  %v1116_v24 = vadd.f32 %v2918_v59, %v2923_v0 }
 0x16c   : > { %v1605_v31 = vmax.f32 %v1381_v5, 0.0  ;;  %v1384_v32 = vadd.f32 %v2363_v28, %v1095_v57  ;;  %v1136_v35 = vpop.f32.mrb[43].mxu0  ;;  %v1375_v37 = vpop.f32.mrb[43].mxu1  ;;  %v1127_v28 = vadd.f32 %v2918_v59, %v2954_v52 }
 0x16d   : > { %v1603_v36 = vmax.f32 %v1373_v25, 0.0  ;;  %v1376_v39 = vadd.f32 %v1375_v37, %v1087_v61 }
 0x16e   : > { %v2242_v43 = vpack.c.bf16 %v1605_v31, %v1605_v31  ;;  %v1606_v44 = vmax.f32 %v1384_v32, 0.0 }
 0x16f   : > { %v2240_v47 = vpack.c.bf16 %v1603_v36, %v1603_v36  ;;  %v1604_v29 = vmax.f32 %v1376_v39, 0.0 }
 0x170   : > { %1926 = vst.msk [vmem:[%s2934_s22 + $0x28] sm:$0xf] %vm1915_vm0, %v2242_v43  ;;  %v2243_v17 = vpack.c.bf16 %v1606_v44, %v1606_v44 }
 0x171   : > { %1924 = vst.msk [vmem:[%s2934_s22 + $0x20] sm:$0xf] %vm1915_vm0, %v2240_v47  ;;  %v2241_v9 = vpack.c.bf16 %v1604_v29, %v1604_v29  ;;  %v1139_v55 = vpop.f32.mrb[44].mxu0  ;;  %v2366_v56 = vpop.f32.mrb[44].mxu1 }
 0x172   : > { %1927 = vst.msk [vmem:[%s2934_s22 + $0x2c] sm:$0xf] %vm1915_vm0, %v2243_v17  ;;  %v1397_v63 = vadd.f32 %v2366_v56, %v1108_v48  ;;  %v1141_v21 = vpop.f32.mrb[45].mxu0  ;;  %v1388_v3 = vpop.f32.mrb[45].mxu1  ;;  %v1140_v16 = vadd.f32 %v2918_v59, %v1139_v55  ;;  %v1135_v55 = vadd.f32 %v2918_v59, %v2974_v27 }
 0x173   : > { %1925 = vst.msk [vmem:[%s2934_s22 + $0x24] sm:$0xf] %vm1915_vm0, %v2241_v9  ;;  %v1389_v41 = vadd.f32 %v1388_v3, %v1100_v51  ;;  %v1142_v4 = vpop.f32.mrb[46].mxu0  ;;  %v2367_v7 = vpop.f32.mrb[46].mxu1 }
 0x174   : > { %v1609_v8 = vmax.f32 %v1397_v63, 0.0  ;;  %v1400_v11 = vadd.f32 %v2367_v7, %v1111_v60  ;;  %v1144_v13 = vpop.f32.mrb[47].mxu0  ;;  %v1391_v12 = vpop.f32.mrb[47].mxu1  ;;  %v1132_v60 = vadd.f32 %v2918_v59, %v2964_v20 }
 0x175   : > { %v1607_v53 = vmax.f32 %v1389_v41, 0.0  ;;  %v1392_v15 = vadd.f32 %v1391_v12, %v1103_v49  ;;  %v1143_v49 = vadd.f32 %v2918_v59, %v1142_v4 }
 0x176   : > { %v2246_v19 = vpack.c.bf16 %v1609_v8, %v1609_v8  ;;  %v1610_v1 = vmax.f32 %v1400_v11, 0.0 }
 0x177   : > { %v2244_v23 = vpack.c.bf16 %v1607_v53, %v1607_v53  ;;  %v1608_v57 = vmax.f32 %v1392_v15, 0.0 }
 0x178   : > { %1930 = vst.msk [vmem:[%s2934_s22 + $0x38] sm:$0xf] %vm1915_vm0, %v2246_v19  ;;  %v2247_v5 = vpack.c.bf16 %v1610_v1, %v1610_v1 }
 0x179   : > { %1928 = vst.msk [vmem:[%s2934_s22 + $0x30] sm:$0xf] %vm1915_vm0, %v2244_v23  ;;  %v2245_v33 = vpack.c.bf16 %v1608_v57, %v1608_v57  ;;  %v1147_v61 = vpop.f32.mrb[48].mxu0  ;;  %v2370_v25 = vpop.f32.mrb[48].mxu1 }
 0x17a   : > { %1931 = vst.msk [vmem:[%s2934_s22 + $0x3c] sm:$0xf] %vm1915_vm0, %v2247_v5  ;;  %v1413_v31 = vadd.f32 %v2370_v25, %v1124_v45  ;;  %v1149_v32 = vpop.f32.mrb[49].mxu0  ;;  %v1404_v35 = vpop.f32.mrb[49].mxu1 }
 0x17b   : > { %1929 = vst.msk [vmem:[%s2934_s22 + $0x34] sm:$0xf] %vm1915_vm0, %v2245_v33  ;;  %v1405_v0 = vadd.f32 %v1404_v35, %v1116_v24  ;;  %v1150_v37 = vpop.f32.mrb[50].mxu0  ;;  %v2371_v36 = vpop.f32.mrb[50].mxu1  ;;  %v1148_v33 = vadd.f32 %v2918_v59, %v1147_v61 }
 0x17c   : > { %v1613_v39 = vmax.f32 %v1413_v31, 0.0  ;;  %v1416_v43 = vadd.f32 %v2371_v36, %v1127_v28  ;;  %v1152_v44 = vpop.f32.mrb[51].mxu0  ;;  %v1407_v47 = vpop.f32.mrb[51].mxu1  ;;  %v1151_v36 = vadd.f32 %v2918_v59, %v1150_v37 }
 0x17d   : > { %v1611_v52 = vmax.f32 %v1405_v0, 0.0  ;;  %v1408_v29 = vadd.f32 %v1407_v47, %v1119_v40 }
 0x17e   : > { %v2250_v48 = vpack.c.bf16 %v1613_v39, %v1613_v39  ;;  %v1614_v17 = vmax.f32 %v1416_v43, 0.0 }
 0x17f   : > { %v2248_v51 = vpack.c.bf16 %v1611_v52, %v1611_v52  ;;  %v1612_v9 = vmax.f32 %v1408_v29, 0.0 }
 0x180   : > { %1934 = vst.msk [vmem:[%s2934_s22 + $0x48] sm:$0xf] %vm1915_vm0, %v2250_v48  ;;  %v2251_v56 = vpack.c.bf16 %v1614_v17, %v1614_v17 }
 0x181   : > { %1932 = vst.msk [vmem:[%s2934_s22 + $0x40] sm:$0xf] %vm1915_vm0, %v2248_v51  ;;  %v2249_v63 = vpack.c.bf16 %v1612_v9, %v1612_v9  ;;  %v1155_v21 = vpop.f32.mrb[52].mxu0  ;;  %v2374_v3 = vpop.f32.mrb[52].mxu1 }
 0x182   : > { %1935 = vst.msk [vmem:[%s2934_s22 + $0x4c] sm:$0xf] %vm1915_vm0, %v2251_v56  ;;  %v1429_v41 = vadd.f32 %v2374_v3, %v1140_v16  ;;  %v1157_v7 = vpop.f32.mrb[53].mxu0  ;;  %v1420_v8 = vpop.f32.mrb[53].mxu1  ;;  %v1156_v27 = vadd.f32 %v2918_v59, %v1155_v21 }
 0x183   : > { %1933 = vst.msk [vmem:[%s2934_s22 + $0x44] sm:$0xf] %vm1915_vm0, %v2249_v63  ;;  %v1421_v11 = vadd.f32 %v1420_v8, %v1132_v60  ;;  %v1158_v20 = vpop.f32.mrb[54].mxu0  ;;  %v2375_v13 = vpop.f32.mrb[54].mxu1 }
 0x184   : > { %v1617_v12 = vmax.f32 %v1429_v41, 0.0  ;;  %v1432_v53 = vadd.f32 %v2375_v13, %v1143_v49  ;;  %v1160_v15 = vpop.f32.mrb[55].mxu0  ;;  %v1423_v19 = vpop.f32.mrb[55].mxu1  ;;  %v1159_v32 = vadd.f32 %v2918_v59, %v1158_v20 }
 0x185   : > { %v1615_v4 = vmax.f32 %v1421_v11, 0.0  ;;  %v1424_v1 = vadd.f32 %v1423_v19, %v1135_v55 }
 0x186   : > { %v2254_v23 = vpack.c.bf16 %v1617_v12, %v1617_v12  ;;  %v1618_v57 = vmax.f32 %v1432_v53, 0.0 }
 0x187   : > { %v2252_v45 = vpack.c.bf16 %v1615_v4, %v1615_v4  ;;  %v1616_v5 = vmax.f32 %v1424_v1, 0.0 }
 0x188   : > { %1938 = vst.msk [vmem:[%s2934_s22 + $0x58] sm:$0xf] %vm1915_vm0, %v2254_v23  ;;  %v2255_v24 = vpack.c.bf16 %v1618_v57, %v1618_v57 }
 0x189   : > { %1936 = vst.msk [vmem:[%s2934_s22 + $0x50] sm:$0xf] %vm1915_vm0, %v2252_v45  ;;  %v2253_v25 = vpack.c.bf16 %v1616_v5, %v1616_v5  ;;  %v1163_v28 = vpop.f32.mrb[56].mxu0  ;;  %v2378_v31 = vpop.f32.mrb[56].mxu1 }
 0x18a   : > { %1939 = vst.msk [vmem:[%s2934_s22 + $0x5c] sm:$0xf] %vm1915_vm0, %v2255_v24  ;;  %v1445_v35 = vadd.f32 %v2378_v31, %v1156_v27  ;;  %v1165_v40 = vpop.f32.mrb[57].mxu0  ;;  %v1436_v0 = vpop.f32.mrb[57].mxu1  ;;  %v1164_v60 = vadd.f32 %v2918_v59, %v1163_v28 }
 0x18b   : > { %1937 = vst.msk [vmem:[%s2934_s22 + $0x54] sm:$0xf] %vm1915_vm0, %v2253_v25  ;;  %v1437_v39 = vadd.f32 %v1436_v0, %v1148_v33  ;;  %v1166_v61 = vpop.f32.mrb[58].mxu0  ;;  %v2379_v43 = vpop.f32.mrb[58].mxu1 }
 0x18c   : > { %v1621_v44 = vmax.f32 %v1445_v35, 0.0  ;;  %v1448_v47 = vadd.f32 %v2379_v43, %v1159_v32  ;;  %v1168_v52 = vpop.f32.mrb[59].mxu0  ;;  %v1439_v29 = vpop.f32.mrb[59].mxu1  ;;  %v1167_v8 = vadd.f32 %v2918_v59, %v1166_v61 }
 0x18d   : > { %v1619_v48 = vmax.f32 %v1437_v39, 0.0  ;;  %v1440_v17 = vadd.f32 %v1439_v29, %v1151_v36 }
 0x18e   : > { %v2258_v51 = vpack.c.bf16 %v1621_v44, %v1621_v44  ;;  %v1622_v9 = vmax.f32 %v1448_v47, 0.0 }
 0x18f   : > { %v2256_v16 = vpack.c.bf16 %v1619_v48, %v1619_v48  ;;  %v1620_v56 = vmax.f32 %v1440_v17, 0.0 }
 0x190   : > { %1942 = vst.msk [vmem:[%s2934_s22 + $0x68] sm:$0xf] %vm1915_vm0, %v2258_v51  ;;  %v2259_v37 = vpack.c.bf16 %v1622_v9, %v1622_v9 }
 0x191   : > { %1940 = vst.msk [vmem:[%s2934_s22 + $0x60] sm:$0xf] %vm1915_vm0, %v2256_v16  ;;  %v2257_v63 = vpack.c.bf16 %v1620_v56, %v1620_v56  ;;  %v1171_v21 = vpop.f32.mrb[60].mxu0  ;;  %v2382_v3 = vpop.f32.mrb[60].mxu1 }
 0x192   : > { %1943 = vst.msk [vmem:[%s2934_s22 + $0x6c] sm:$0xf] %vm1915_vm0, %v2259_v37  ;;  %v1172_v49 = vadd.f32 %v2918_v59, %v1171_v21  ;;  %v1173_v41 = vpop.f32.mrb[61].mxu0  ;;  %v1452_v7 = vpop.f32.mrb[61].mxu1 }
 0x193   : > { %1941 = vst.msk [vmem:[%s2934_s22 + $0x64] sm:$0xf] %vm1915_vm0, %v2257_v63  ;;  %v1453_v55 = vadd.f32 %v1452_v7, %v1164_v60  ;;  %v1174_v11 = vpop.f32.mrb[62].mxu0  ;;  %v2383_v20 = vpop.f32.mrb[62].mxu1 }
 0x194   : > { %v1461_v13 = vadd.f32 %v2382_v3, %v1172_v49  ;;  %v1175_v12 = vadd.f32 %v2918_v59, %v1174_v11  ;;  %v1176_v53 = vpop.f32.mrb[63].mxu0  ;;  %v1455_v15 = vpop.f32.mrb[63].mxu1 }
 0x195   : > { %v1623_v19 = vmax.f32 %v1453_v55, 0.0  ;;  %v1456_v4 = vadd.f32 %v1455_v15, %v1167_v8 }
 0x196   : > { %v1625_v1 = vmax.f32 %v1461_v13, 0.0  ;;  %v1464_v23 = vadd.f32 %v2383_v20, %v1175_v12 }
 0x197   : > { %v2260_v57 = vpack.c.bf16 %v1623_v19, %v1623_v19  ;;  %v1624_v45 = vmax.f32 %v1456_v4, 0.0 }
 0x198   : > { %v2262_v5 = vpack.c.bf16 %v1625_v1, %v1625_v1  ;;  %v1626_v27 = vmax.f32 %v1464_v23, 0.0 }
 0x199   : > { %1944 = vst.msk [vmem:[%s2934_s22 + $0x70] sm:$0xf] %vm1915_vm0, %v2260_v57  ;;  %v2261_v24 = vpack.c.bf16 %v1624_v45, %v1624_v45  ;;  %v1179_v33 = vpop.f32.mrb[64].mxu0  ;;  %v2386_v25 = vpop.f32.mrb[64].mxu1 }
 0x19a   : > { %1946 = vst.msk [vmem:[%s2934_s22 + $0x78] sm:$0xf] %vm1915_vm0, %v2262_v5  ;;  %v2263_v28 = vpack.c.bf16 %v1626_v27, %v1626_v27  ;;  %v1180_v31 = vadd.f32 %v2918_v59, %v1179_v33  ;;  %v1181_v32 = vpop.f32.mrb[65].mxu0  ;;  %v1468_v35 = vpop.f32.mrb[65].mxu1 }
 0x19b   : > { %1945 = vst.msk [vmem:[%s2934_s22 + $0x74] sm:$0xf] %vm1915_vm0, %v2261_v24  ;;  %v1182_v40 = vpop.f32.mrb[66].mxu0  ;;  %v2387_v0 = vpop.f32.mrb[66].mxu1 }
 0x19c   : > { %1947 = vst.msk [vmem:[%s2934_s22 + $0x7c] sm:$0xf] %vm1915_vm0, %v2263_v28  ;;  %v1469_v36 = vadd.f32 %v1468_v35, %v1180_v31  ;;  %v1183_v39 = vadd.f32 %v2918_v59, %v1182_v40  ;;  %v1184_v61 = vpop.f32.mrb[67].mxu0  ;;  %v1471_v43 = vpop.f32.mrb[67].mxu1 }
 0x19e   : > { %v1627_v44 = vmax.f32 %v1469_v36, 0.0  ;;  %v1472_v47 = vadd.f32 %v1471_v43, %v1183_v39 }
 0x1a0   : > { %v2264_v52 = vpack.c.bf16 %v1627_v44, %v1627_v44  ;;  %v1628_v29 = vmax.f32 %v1472_v47, 0.0 }
 0x1a1   : > { %v1187_v48 = vpop.f32.mrb[68].mxu0  ;;  %v2390_v17 = vpop.f32.mrb[68].mxu1 }
 0x1a2   : > { %1948 = vst.msk [vmem:[%s2934_s22 + $0x80] sm:$0xf] %vm1915_vm0, %v2264_v52  ;;  %v2265_v51 = vpack.c.bf16 %v1628_v29, %v1628_v29  ;;  %v1188_v9 = vadd.f32 %v2918_v59, %v1187_v48  ;;  %v1189_v16 = vpop.f32.mrb[69].mxu0  ;;  %v1484_v56 = vpop.f32.mrb[69].mxu1  ;;  %v1252_v29 = vadd.f32 %v2918_v59, %v2863_v2  ;;  %v1247_v2 = vadd.f32 %v2918_v59, %v2861_v62 }
 0x1a3   : > { %v1190_v37 = vpop.f32.mrb[70].mxu0  ;;  %v2391_v60 = vpop.f32.mrb[70].mxu1 }
 0x1a4   : > { %1949 = vst.msk [vmem:[%s2934_s22 + $0x84] sm:$0xf] %vm1915_vm0, %v2265_v51  ;;  %v1477_v63 = vadd.f32 %v2386_v25, %v1188_v9  ;;  %v1191_v21 = vadd.f32 %v2918_v59, %v1190_v37  ;;  %v1192_v3 = vpop.f32.mrb[71].mxu0  ;;  %v1487_v49 = vpop.f32.mrb[71].mxu1  ;;  %v1244_v9 = vadd.f32 %v2918_v59, %v2857_v58 }
 0x1a6   : > { %v1629_v41 = vmax.f32 %v1477_v63, 0.0  ;;  %v1480_v7 = vadd.f32 %v2387_v0, %v1191_v21 }
 0x1a8   : > { %v2266_v8 = vpack.c.bf16 %v1629_v41, %v1629_v41  ;;  %v1630_v55 = vmax.f32 %v1480_v7, 0.0 }
 0x1a9   : > { %v1195_v11 = vpop.f32.mrb[72].mxu0  ;;  %v3062_v20 = vpop.f32.mrb[72].mxu1 }
 0x1aa   : > { %1950 = vst.msk [vmem:[%s2934_s22 + $0x88] sm:$0xf] %vm1915_vm0, %v2266_v8  ;;  %v2267_v13 = vpack.c.bf16 %v1630_v55, %v1630_v55  ;;  %v1196_v12 = vadd.f32 %v2918_v59, %v1195_v11  ;;  %v1197_v53 = vpop.f32.mrb[73].mxu0  ;;  %v1500_v15 = vpop.f32.mrb[73].mxu1 }
 0x1ab   : > { %v1198_v19 = vpop.f32.mrb[74].mxu0  ;;  %v3067_v4 = vpop.f32.mrb[74].mxu1 }
 0x1ac   : > { %1951 = vst.msk [vmem:[%s2934_s22 + $0x8c] sm:$0xf] %vm1915_vm0, %v2267_v13  ;;  %v1485_v1 = vadd.f32 %v1484_v56, %v1196_v12  ;;  %v1199_v23 = vadd.f32 %v2918_v59, %v1198_v19  ;;  %v1200_v57 = vpop.f32.mrb[75].mxu0  ;;  %v1503_v45 = vpop.f32.mrb[75].mxu1 }
 0x1ae   : > { %v1631_v5 = vmax.f32 %v1485_v1, 0.0  ;;  %v1488_v27 = vadd.f32 %v1487_v49, %v1199_v23 }
 0x1b0   : > { %v2268_v24 = vpack.c.bf16 %v1631_v5, %v1631_v5  ;;  %v1632_v33 = vmax.f32 %v1488_v27, 0.0 }
 0x1b1   : > { %v1203_v25 = vpop.f32.mrb[76].mxu0  ;;  %v3072_v28 = vpop.f32.mrb[76].mxu1 }
 0x1b2   : > { %1952 = vst.msk [vmem:[%s2934_s22 + $0x90] sm:$0xf] %vm1915_vm0, %v2268_v24  ;;  %v2269_v31 = vpack.c.bf16 %v1632_v33, %v1632_v33  ;;  %v1204_v32 = vadd.f32 %v2918_v59, %v1203_v25  ;;  %v1205_v35 = vpop.f32.mrb[77].mxu0  ;;  %v3077_v40 = vpop.f32.mrb[77].mxu1  ;;  %v1260_v25 = vadd.f32 %v2918_v59, %v2869_v10  ;;  %v1263_v10 = vadd.f32 %v2918_v59, %v2873_v14 }
 0x1b3   : > { %v1206_v0 = vpop.f32.mrb[78].mxu0  ;;  %v3079_v36 = vpop.f32.mrb[78].mxu1  ;;  %v1271_v35 = vadd.f32 %v2918_v59, %v2881_v22 }
 0x1b4   : > { %1953 = vst.msk [vmem:[%s2934_s22 + $0x94] sm:$0xf] %vm1915_vm0, %v2269_v31  ;;  %v1493_v39 = vadd.f32 %v2390_v17, %v1204_v32  ;;  %v1207_v61 = vadd.f32 %v2918_v59, %v1206_v0  ;;  %v1208_v43 = vpop.f32.mrb[79].mxu0  ;;  %v3084_v44 = vpop.f32.mrb[79].mxu1  ;;  %v1255_v17 = vadd.f32 %v2918_v59, %v2865_v6 }
 0x1b6   : > { %v1633_v47 = vmax.f32 %v1493_v39, 0.0  ;;  %v1496_v52 = vadd.f32 %v2391_v60, %v1207_v61 }
 0x1b8   : > { %v2270_v48 = vpack.c.bf16 %v1633_v47, %v1633_v47  ;;  %v1634_v51 = vmax.f32 %v1496_v52, 0.0 }
 0x1b9   : > { %v1211_v16 = vpop.f32.mrb[80].mxu0  ;;  %v2402_v56 = vpop.f32.mrb[80].mxu1 }
 0x1ba   : > { %1954 = vst.msk [vmem:[%s2934_s22 + $0x98] sm:$0xf] %vm1915_vm0, %v2270_v48  ;;  %v2271_v37 = vpack.c.bf16 %v1634_v51, %v1634_v51  ;;  %v1212_v63 = vadd.f32 %v2918_v59, %v1211_v16  ;;  %v1541_v60 = vadd.f32 %v2402_v56, %v1252_v29  ;;  %v1213_v21 = vpop.f32.mrb[81].mxu0  ;;  %v1532_v3 = vpop.f32.mrb[81].mxu1 }
 0x1bb   : > { %v1533_v49 = vadd.f32 %v1532_v3, %v1244_v9  ;;  %v1214_v41 = vpop.f32.mrb[82].mxu0  ;;  %v2403_v7 = vpop.f32.mrb[82].mxu1 }
 0x1bc   : > { %1955 = vst.msk [vmem:[%s2934_s22 + $0x9c] sm:$0xf] %vm1915_vm0, %v2271_v37  ;;  %v1501_v58 = vadd.f32 %v1500_v15, %v1212_v63  ;;  %v1645_v8 = vmax.f32 %v1541_v60, 0.0  ;;  %v1215_v6 = vadd.f32 %v2918_v59, %v1214_v41  ;;  %v1544_v55 = vadd.f32 %v2403_v7, %v1255_v17  ;;  %v1216_v11 = vpop.f32.mrb[83].mxu0  ;;  %v1535_v13 = vpop.f32.mrb[83].mxu1 }
 0x1bd   : > { %v1643_v12 = vmax.f32 %v1533_v49, 0.0  ;;  %v1536_v53 = vadd.f32 %v1535_v13, %v1247_v2  ;;  %v1268_v15 = vadd.f32 %v2918_v59, %v2877_v18 }
 0x1be   : > { %v1635_v19 = vmax.f32 %v1501_v58, 0.0  ;;  %v2282_v1 = vpack.c.bf16 %v1645_v8, %v1645_v8  ;;  %v1504_v62 = vadd.f32 %v1503_v45, %v1215_v6  ;;  %v1646_v23 = vmax.f32 %v1544_v55, 0.0 }
 0x1bf   : > { %v2280_v57 = vpack.c.bf16 %v1643_v12, %v1643_v12  ;;  %v1644_v5 = vmax.f32 %v1536_v53, 0.0  ;;  %v1276_v58 = vadd.f32 %v2918_v59, %v2885_v26  ;;  %v1287_v55 = vadd.f32 %v2918_v59, %v2897_v38 }
 0x1c0   : > { %v2272_v27 = vpack.c.bf16 %v1635_v19, %v1635_v19  ;;  %1966 = vst.msk [vmem:[%s2934_s22 + $0xc8] sm:$0xf] %vm1915_vm0, %v2282_v1  ;;  %v1636_v24 = vmax.f32 %v1504_v62, 0.0  ;;  %v2283_v33 = vpack.c.bf16 %v1646_v23, %v1646_v23  ;;  %v1279_v26 = vadd.f32 %v2918_v59, %v2889_v30 }
 0x1c1   : > { %1964 = vst.msk [vmem:[%s2934_s22 + $0xc0] sm:$0xf] %vm1915_vm0, %v2280_v57  ;;  %v2281_v31 = vpack.c.bf16 %v1644_v5, %v1644_v5  ;;  %v1219_v45 = vpop.f32.mrb[84].mxu0  ;;  %v2406_v32 = vpop.f32.mrb[84].mxu1 }
 0x1c2   : > { %1956 = vst.msk [vmem:[%s2934_s22 + $0xa0] sm:$0xf] %vm1915_vm0, %v2272_v27  ;;  %v2273_v18 = vpack.c.bf16 %v1636_v24, %v1636_v24  ;;  %1967 = vst.msk [vmem:[%s2934_s22 + $0xcc] sm:$0xf] %vm1915_vm0, %v2283_v33  ;;  %v1220_v0 = vadd.f32 %v2918_v59, %v1219_v45  ;;  %v1557_v39 = vadd.f32 %v2406_v32, %v1268_v15  ;;  %v1221_v61 = vpop.f32.mrb[85].mxu0  ;;  %v1548_v43 = vpop.f32.mrb[85].mxu1 }
 0x1c3   : > { %1965 = vst.msk [vmem:[%s2934_s22 + $0xc4] sm:$0xf] %vm1915_vm0, %v2281_v31  ;;  %v1549_v47 = vadd.f32 %v1548_v43, %v1260_v25  ;;  %v1222_v52 = vpop.f32.mrb[86].mxu0  ;;  %v2407_v29 = vpop.f32.mrb[86].mxu1  ;;  %v1292_v61 = vadd.f32 %v2918_v59, %v2901_v42  ;;  %v1295_v42 = vadd.f32 %v2918_v59, %v2905_v46 }
 0x1c4   : > { %1957 = vst.msk [vmem:[%s2934_s22 + $0xa4] sm:$0xf] %vm1915_vm0, %v2273_v18  ;;  %v1509_v22 = vadd.f32 %v3062_v20, %v1220_v0  ;;  %v1649_v48 = vmax.f32 %v1557_v39, 0.0  ;;  %v1223_v51 = vadd.f32 %v2918_v59, %v1222_v52  ;;  %v1560_v9 = vadd.f32 %v2407_v29, %v1271_v35  ;;  %v1224_v16 = vpop.f32.mrb[87].mxu0  ;;  %v1551_v56 = vpop.f32.mrb[87].mxu1 }
 0x1c5   : > { %v1647_v17 = vmax.f32 %v1549_v47, 0.0  ;;  %v1552_v37 = vadd.f32 %v1551_v56, %v1263_v10  ;;  %v1284_v20 = vadd.f32 %v2918_v59, %v2893_v34  ;;  %v1303_v47 = vadd.f32 %v2918_v59, %v2913_v54 }
 0x1c6   : > { %v1637_v14 = vmax.f32 %v1509_v22, 0.0  ;;  %v2286_v63 = vpack.c.bf16 %v1649_v48, %v1649_v48  ;;  %v1512_v60 = vadd.f32 %v3067_v4, %v1223_v51  ;;  %v1650_v21 = vmax.f32 %v1560_v9, 0.0 }
 0x1c7   : > { %v2284_v3 = vpack.c.bf16 %v1647_v17, %v1647_v17  ;;  %v1648_v2 = vmax.f32 %v1552_v37, 0.0 }
 0x1c8   : > { %v2274_v49 = vpack.c.bf16 %v1637_v14, %v1637_v14  ;;  %1970 = vst.msk [vmem:[%s2934_s22 + $0xd8] sm:$0xf] %vm1915_vm0, %v2286_v63  ;;  %v1638_v41 = vmax.f32 %v1512_v60, 0.0  ;;  %v2287_v7 = vpack.c.bf16 %v1650_v21, %v1650_v21 }
 0x1c9   : > { %1968 = vst.msk [vmem:[%s2934_s22 + $0xd0] sm:$0xf] %vm1915_vm0, %v2284_v3  ;;  %v2285_v8 = vpack.c.bf16 %v1648_v2, %v1648_v2  ;;  %v1227_v4 = vpop.f32.mrb[88].mxu0  ;;  %v2410_v6 = vpop.f32.mrb[88].mxu1 }
 0x1ca   : > { %1958 = vst.msk [vmem:[%s2934_s22 + $0xa8] sm:$0xf] %vm1915_vm0, %v2274_v49  ;;  %v2275_v34 = vpack.c.bf16 %v1638_v41, %v1638_v41  ;;  %1971 = vst.msk [vmem:[%s2934_s22 + $0xdc] sm:$0xf] %vm1915_vm0, %v2287_v7  ;;  %v1228_v11 = vadd.f32 %v2918_v59, %v1227_v4  ;;  %v1573_v13 = vadd.f32 %v2410_v6, %v1284_v20  ;;  %v1229_v12 = vpop.f32.mrb[89].mxu0  ;;  %v1564_v53 = vpop.f32.mrb[89].mxu1 }
 0x1cb   : > { %1969 = vst.msk [vmem:[%s2934_s22 + $0xd4] sm:$0xf] %vm1915_vm0, %v2285_v8  ;;  %v1565_v19 = vadd.f32 %v1564_v53, %v1276_v58  ;;  %v1230_v1 = vpop.f32.mrb[90].mxu0  ;;  %v2411_v62 = vpop.f32.mrb[90].mxu1 }
 0x1cc   : > { %1959 = vst.msk [vmem:[%s2934_s22 + $0xac] sm:$0xf] %vm1915_vm0, %v2275_v34  ;;  %v1517_v38 = vadd.f32 %v3077_v40, %v1228_v11  ;;  %v1653_v23 = vmax.f32 %v1573_v13, 0.0  ;;  %v1231_v57 = vadd.f32 %v2918_v59, %v1230_v1  ;;  %v1576_v5 = vadd.f32 %v2411_v62, %v1287_v55  ;;  %v1232_v15 = vpop.f32.mrb[91].mxu0  ;;  %v1567_v27 = vpop.f32.mrb[91].mxu1 }
 0x1cd   : > { %v1651_v24 = vmax.f32 %v1565_v19, 0.0  ;;  %v1568_v33 = vadd.f32 %v1567_v27, %v1279_v26  ;;  %v1300_v40 = vadd.f32 %v2918_v59, %v2909_v50 }
 0x1ce   : > { %v1639_v30 = vmax.f32 %v1517_v38, 0.0  ;;  %v2290_v25 = vpack.c.bf16 %v1653_v23, %v1653_v23  ;;  %v1520_v31 = vadd.f32 %v3084_v44, %v1231_v57  ;;  %v1654_v45 = vmax.f32 %v1576_v5, 0.0 }
 0x1cf   : > { %v2288_v32 = vpack.c.bf16 %v1651_v24, %v1651_v24  ;;  %v1652_v35 = vmax.f32 %v1568_v33, 0.0 }
 0x1d0   : > { %v2276_v18 = vpack.c.bf16 %v1639_v30, %v1639_v30  ;;  %1974 = vst.msk [vmem:[%s2934_s22 + $0xe8] sm:$0xf] %vm1915_vm0, %v2290_v25  ;;  %v1640_v0 = vmax.f32 %v1520_v31, 0.0  ;;  %v2291_v39 = vpack.c.bf16 %v1654_v45, %v1654_v45 }
 0x1d1   : > { %1972 = vst.msk [vmem:[%s2934_s22 + $0xe0] sm:$0xf] %vm1915_vm0, %v2288_v32  ;;  %v2289_v43 = vpack.c.bf16 %v1652_v35, %v1652_v35  ;;  %v1235_v44 = vpop.f32.mrb[92].mxu0  ;;  %v2414_v10 = vpop.f32.mrb[92].mxu1 }
 0x1d2   : > { %1960 = vst.msk [vmem:[%s2934_s22 + $0xb0] sm:$0xf] %vm1915_vm0, %v2276_v18  ;;  %v2277_v50 = vpack.c.bf16 %v1640_v0, %v1640_v0  ;;  %1975 = vst.msk [vmem:[%s2934_s22 + $0xec] sm:$0xf] %vm1915_vm0, %v2291_v39  ;;  %v1236_v52 = vadd.f32 %v2918_v59, %v1235_v44  ;;  %v1589_v29 = vadd.f32 %v2414_v10, %v1300_v40  ;;  %v1237_v22 = vpop.f32.mrb[93].mxu0  ;;  %v1580_v48 = vpop.f32.mrb[93].mxu1 }
 0x1d3   : > { %1973 = vst.msk [vmem:[%s2934_s22 + $0xe4] sm:$0xf] %vm1915_vm0, %v2289_v43  ;;  %v1581_v51 = vadd.f32 %v1580_v48, %v1292_v61  ;;  %v1238_v9 = vpop.f32.mrb[94].mxu0  ;;  %v2415_v16 = vpop.f32.mrb[94].mxu1 }
 0x1d4   : > { %1961 = vst.msk [vmem:[%s2934_s22 + $0xb4] sm:$0xf] %vm1915_vm0, %v2277_v50  ;;  %v1525_v54 = vadd.f32 %v3072_v28, %v1236_v52  ;;  %v1657_v56 = vmax.f32 %v1589_v29, 0.0  ;;  %v1239_v17 = vadd.f32 %v2918_v59, %v1238_v9  ;;  %v1592_v37 = vadd.f32 %v2415_v16, %v1303_v47  ;;  %v1240_v14 = vpop.f32.mrb[95].mxu0  ;;  %v1583_v63 = vpop.f32.mrb[95].mxu1 }
 0x1d5   : > { %v1655_v60 = vmax.f32 %v1581_v51, 0.0  ;;  %v1584_v46 = vadd.f32 %v1583_v63, %v1295_v42 }
 0x1d6   : > { %v1641_v21 = vmax.f32 %v1525_v54, 0.0  ;;  %v2294_v3 = vpack.c.bf16 %v1657_v56, %v1657_v56  ;;  %v1528_v2 = vadd.f32 %v3079_v36, %v1239_v17  ;;  %v1658_v20 = vmax.f32 %v1592_v37, 0.0 }
 0x1d7   : > { %v2292_v49 = vpack.c.bf16 %v1655_v60, %v1655_v60  ;;  %v1656_v28 = vmax.f32 %v1584_v46, 0.0 }
 0x1d8   : > { %v2278_v41 = vpack.c.bf16 %v1641_v21, %v1641_v21  ;;  %1978 = vst.msk [vmem:[%s2934_s22 + $0xf8] sm:$0xf] %vm1915_vm0, %v2294_v3  ;;  %v1642_v59 = vmax.f32 %v1528_v2, 0.0  ;;  %v2295_v7 = vpack.c.bf16 %v1658_v20, %v1658_v20 }
 0x1d9   : > { %1976 = vst.msk [vmem:[%s2934_s22 + $0xf0] sm:$0xf] %vm1915_vm0, %v2292_v49  ;;  %v2293_v58 = vpack.c.bf16 %v1656_v28, %v1656_v28 }
 0x1da   : > { %1962 = vst.msk [vmem:[%s2934_s22 + $0xb8] sm:$0xf] %vm1915_vm0, %v2278_v41  ;;  %v2279_v8 = vpack.c.bf16 %v1642_v59, %v1642_v59  ;;  %1979 = vst.msk [vmem:[%s2934_s22 + $0xfc] sm:$0xf] %vm1915_vm0, %v2295_v7 }
 0x1db   : > { %1977 = vst.msk [vmem:[%s2934_s22 + $0xf4] sm:$0xf] %vm1915_vm0, %v2293_v58 }
 0x1dc   : > { %1963 = vst.msk [vmem:[%s2934_s22 + $0xbc] sm:$0xf] %vm1915_vm0, %v2279_v8 }
 0x1dd PF: > { %s13_s12 = sadd.s32 1, %s2616_s12  }
 0x1de   : > { %p10_p4 = scmp.ge.s32.totalorder %s13_s12, 6  }
 0x1e0   :  { %12 = sbr.rel (!%p10_p4) target bundleno = 1 (0x1), region = 62 }

// kernel: posenet_forward.5
= control target key start
LH: loop header
LB: loop body
LE: loop exit
PB: predicated region body
PF: predicated region fallthrough
CT: control target
= control target key end

     0   :  { %s1958_s12 = smov 0   ;;  %s2246_s0 = inlined_call_operand.vmem [shape: bf16[512,512], index: 0, kind: input, shape index: {}]   ;;  %s2247_s1 = inlined_call_operand.vmem [shape: bf16[512,32], index: 1, kind: input, shape index: {}]   ;;  %s2248_s2 = inlined_call_operand.vmem [shape: f32[1,32], index: 2, kind: input, shape index: {}]   ;;  %s2249_s3 = inlined_call_operand.vmem [shape: bf16[512,32], index: 3, kind: output, shape index: {}]  }
   0x1 LB: > { %s1396_s13 = sadd.s32 4294967295, %s1936_s12   ;;  %p1400_p0 = scmp.ge.s32.totalorder %s1936_s12, 1  ;;  %s1936_s12 = sphi %s1958_s12, %s13_s12  }
   0x2   : > { %p139_p1 = scmp.lt.s32.totalorder %s1936_s12, 3 }
   0x4   : > { %p140_p2 = pnand %p1400_p0, %p139_p1 }
   0x5   : > { %v1802_v0 = vld [vmem:[%s2247_s1 + $0x40] sm:$0xff] (!%p140_p2)   ;;  %v1806_v4 = vld [vmem:[%s2247_s1 + $0x48] sm:$0xff] (!%p140_p2)   ;;  %v1810_v8 = vld [vmem:[%s2247_s1 + $0x50] sm:$0xff] (!%p140_p2)   ;;  %s1401_s21 = sshll.u32 (!%p140_p2), %s1396_s13, 5  ;;  %vm1307_vm0 = vcmask (!%p140_p2), 257024  }
   0x6   : > { %143 = sbr.rel (%p140_p2) target bundleno = 385 (0x181), region = 32  ;;  %v1803_v1 = vld [vmem:[%s2247_s1 + $0xc0] sm:$0xff] (!%p140_p2)   ;;  %1570 = vmatprep.subr.bf16.mxu0 (!%p140_p2), %v1802_v0  ;;  %v1807_v5 = vld [vmem:[%s2247_s1 + $0xc8] sm:$0xff] (!%p140_p2)   ;;  %v1811_v9 = vld [vmem:[%s2247_s1 + $0xd0] sm:$0xff] (!%p140_p2)   ;;  %p165_p3 = scmp.lt.s32.totalorder (!%p140_p2), %s1401_s21, 63 }
   0x7   : > { %v1804_v2 = vld [vmem:[%s2247_s1] sm:$0xff] (!%p140_p2)   ;;  %1682 = vmatprep.subr.bf16.mxu1 (!%p140_p2), %v1803_v1  ;;  %v1808_v6 = vld [vmem:[%s2247_s1 + $0x8] sm:$0xff] (!%p140_p2)   ;;  %v1812_v10 = vld [vmem:[%s2247_s1 + $0x10] sm:$0xff] (!%p140_p2)  }
   0x8   : > { %v1805_v3 = vld [vmem:[%s2247_s1 + $0x80] sm:$0xff] (!%p140_p2)   ;;  %1571 = vmatpush3.bf16.msra.mxu0 (!%p140_p2), %v1804_v2  ;;  %v1809_v7 = vld [vmem:[%s2247_s1 + $0x88] sm:$0xff] (!%p140_p2)   ;;  %v1813_v11 = vld [vmem:[%s2247_s1 + $0x90] sm:$0xff] (!%p140_p2)  }
   0x9   : > { %1683 = vmatpush3.bf16.msra.mxu1 (!%p140_p2), %v1805_v3  ;;  %1572 = vmatprep.subr.bf16.mxu0 (!%p140_p2), %v1806_v4  ;;  %v1814_v12 = vld [vmem:[%s2247_s1 + $0x58] sm:$0xff] (!%p140_p2)   ;;  %v1818_v16 = vld [vmem:[%s2247_s1 + $0x60] sm:$0xff] (!%p140_p2)   ;;  %v1822_v20 = vld [vmem:[%s2247_s1 + $0x68] sm:$0xff] (!%p140_p2)  }
   0xa   : > { %1684 = vmatprep.subr.bf16.mxu1 (!%p140_p2), %v1807_v5  ;;  %v1815_v13 = vld [vmem:[%s2247_s1 + $0xd8] sm:$0xff] (!%p140_p2)   ;;  %v1819_v17 = vld [vmem:[%s2247_s1 + $0xe0] sm:$0xff] (!%p140_p2)   ;;  %v1823_v21 = vld [vmem:[%s2247_s1 + $0xe8] sm:$0xff] (!%p140_p2)  }
   0xb   : > { %v1816_v14 = vld [vmem:[%s2247_s1 + $0x18] sm:$0xff] (!%p140_p2)   ;;  %v1820_v18 = vld [vmem:[%s2247_s1 + $0x20] sm:$0xff] (!%p140_p2)   ;;  %v1824_v22 = vld [vmem:[%s2247_s1 + $0x28] sm:$0xff] (!%p140_p2)  }
   0xc   : > { %1573 = vmatpush3.bf16.msra.mxu0 (!%p140_p2), %v1808_v6  ;;  %v1817_v15 = vld [vmem:[%s2247_s1 + $0x98] sm:$0xff] (!%p140_p2)   ;;  %v1821_v19 = vld [vmem:[%s2247_s1 + $0xa0] sm:$0xff] (!%p140_p2)   ;;  %v1825_v23 = vld [vmem:[%s2247_s1 + $0xa8] sm:$0xff] (!%p140_p2)  }
   0xd   : > { %1685 = vmatpush3.bf16.msra.mxu1 %v1809_v7  ;;  %1574 = vmatprep.subr.bf16.mxu0 %v1810_v8  ;;  %s2251_s21 = smov (!%p165_p3, %s1401_s21), 63  ;;  %v1826_v24 = vld [vmem:[%s2247_s1 + $0x70] sm:$0xff]   ;;  %v1830_v28 = vld [vmem:[%s2247_s1 + $0x78] sm:$0xff]  }
   0xe   : > { %1686 = vmatprep.subr.bf16.mxu1 %v1811_v9  ;;  %v1827_v25 = vld [vmem:[%s2247_s1 + $0xf0] sm:$0xff]   ;;  %s1537_s18 = sshll.u32 %s2251_s21, 4  ;;  %v1831_v29 = vld [vmem:[%s2247_s1 + $0xf8] sm:$0xff]   ;;  %s1405_s7 = sshll.u32 %s2251_s21, 2 }
   0xf   : > { %v1828_v26 = vld [vmem:[%s2247_s1 + $0x30] sm:$0xff]   ;;  %s2064_s28 = scalar_lea.vmem %s2246_s0, %s1537_s18  ;;  %v1832_v30 = vld [vmem:[%s2247_s1 + $0x38] sm:$0xff]   ;;  %s2147_s10 = scalar_lea.vmem %s2249_s3, %s1405_s7 }
  0x10   : > { %1575 = vmatpush3.bf16.msra.mxu0 %v1812_v10  ;;  %v1829_v27 = vld [vmem:[%s2247_s1 + $0xb0] sm:$0xff]   ;;  %v1833_v31 = vld [vmem:[%s2247_s1 + $0xb8] sm:$0xff]  }
  0x11   : > { %1687 = vmatpush3.bf16.msra.mxu1 %v1813_v11  ;;  %1576 = vmatprep.subr.bf16.mxu0 %v1814_v12  ;;  %v1834_v32 = vld [vmem:[%s2064_s28] ss:$16 sps:$4 sm:$0xff]   ;;  %v1836_v33 = vld [vmem:[%s2064_s28 + $0x4] ss:$16 sps:$4 sm:$0xff]   ;;  %v1837_v34 = vld [vmem:[%s2064_s28 + $0x8] ss:$16 sps:$4 sm:$0xff]  }
  0x12   : > { %1688 = vmatprep.subr.bf16.mxu1 %v1815_v13  ;;  %v1839_v35 = vld [vmem:[%s2064_s28 + $0xc] ss:$16 sps:$4 sm:$0xff]   ;;  %857 = vmatprep.mubr.bf16.mxu0 %v1836_v33  ;;  %v1840_v36 = vld [vmem:[%s2064_s28 + $0x24] ss:$16 sps:$4 sm:$0xff]   ;;  %v1844_v38 = vld [vmem:[%s2064_s28 + $0x20] ss:$16 sps:$4 sm:$0xff]  }
  0x13   : > { %1018 = vmatprep.mubr.bf16.mxu1 %v1839_v35  ;;  %v1842_v37 = vld [vmem:[%s2064_s28 + $0x2c] ss:$16 sps:$4 sm:$0xff]   ;;  %v1845_v39 = vld [vmem:[%s2064_s28 + $0x28] ss:$16 sps:$4 sm:$0xff]   ;;  %v1846_v40 = vld [vmem:[%s2064_s28 + $0x44] ss:$16 sps:$4 sm:$0xff]  }
  0x14   : > { %1577 = vmatpush3.bf16.msra.mxu0 %v1816_v14  ;;  %v1848_v41 = vld [vmem:[%s2064_s28 + $0x4c] ss:$16 sps:$4 sm:$0xff]   ;;  %v1850_v42 = vld [vmem:[%s2064_s28 + $0x40] ss:$16 sps:$4 sm:$0xff]   ;;  %v1851_v43 = vld [vmem:[%s2064_s28 + $0x48] ss:$16 sps:$4 sm:$0xff]  }
  0x15   : > { %1689 = vmatpush3.bf16.msra.mxu1 %v1817_v15  ;;  %1578 = vmatprep.subr.bf16.mxu0 %v1818_v16  ;;  %v1852_v44 = vld [vmem:[%s2064_s28 + $0x64] ss:$16 sps:$4 sm:$0xff]   ;;  %v1854_v45 = vld [vmem:[%s2064_s28 + $0x6c] ss:$16 sps:$4 sm:$0xff]   ;;  %v1856_v46 = vld [vmem:[%s2064_s28 + $0x60] ss:$16 sps:$4 sm:$0xff]  }
  0x16   : > { %1690 = vmatprep.subr.bf16.mxu1 %v1819_v17  ;;  %v1857_v47 = vld [vmem:[%s2064_s28 + $0x68] ss:$16 sps:$4 sm:$0xff]   ;;  %v1858_v48 = vld [vmem:[%s2064_s28 + $0x84] ss:$16 sps:$4 sm:$0xff]   ;;  %v1860_v49 = vld [vmem:[%s2064_s28 + $0x8c] ss:$16 sps:$4 sm:$0xff]  }
  0x17   : > { %v1862_v50 = vld [vmem:[%s2064_s28 + $0x80] ss:$16 sps:$4 sm:$0xff]   ;;  %v1863_v51 = vld [vmem:[%s2064_s28 + $0x88] ss:$16 sps:$4 sm:$0xff]   ;;  %v1864_v52 = vld [vmem:[%s2064_s28 + $0xa4] ss:$16 sps:$4 sm:$0xff]  }
  0x18   : > { %1579 = vmatpush3.bf16.msra.mxu0 %v1820_v18  ;;  %v1866_v53 = vld [vmem:[%s2064_s28 + $0xac] ss:$16 sps:$4 sm:$0xff]   ;;  %v1868_v54 = vld [vmem:[%s2064_s28 + $0xa0] ss:$16 sps:$4 sm:$0xff]   ;;  %v1869_v55 = vld [vmem:[%s2064_s28 + $0xa8] ss:$16 sps:$4 sm:$0xff]  }
  0x19   : > { %1691 = vmatpush3.bf16.msra.mxu1 %v1821_v19  ;;  %1580 = vmatprep.subr.bf16.mxu0 %v1822_v20  ;;  %v1870_v56 = vld [vmem:[%s2064_s28 + $0xc4] ss:$16 sps:$4 sm:$0xff]   ;;  %v1872_v57 = vld [vmem:[%s2064_s28 + $0xcc] ss:$16 sps:$4 sm:$0xff]   ;;  %v1874_v58 = vld [vmem:[%s2064_s28 + $0xc0] ss:$16 sps:$4 sm:$0xff]  }
  0x1a   : > { %1692 = vmatprep.subr.bf16.mxu1 %v1823_v21  ;;  %v1875_v59 = vld [vmem:[%s2064_s28 + $0xc8] ss:$16 sps:$4 sm:$0xff]   ;;  %v1876_v60 = vld [vmem:[%s2064_s28 + $0xe4] ss:$16 sps:$4 sm:$0xff]   ;;  %v1878_v61 = vld [vmem:[%s2064_s28 + $0xec] ss:$16 sps:$4 sm:$0xff]  }
  0x1b   : > { %v1880_v62 = vld [vmem:[%s2064_s28 + $0xe0] ss:$16 sps:$4 sm:$0xff]   ;;  %v1881_v63 = vld [vmem:[%s2064_s28 + $0xe8] ss:$16 sps:$4 sm:$0xff]   ;;  %v1882_v0 = vld [vmem:[%s2064_s28 + $0x104] ss:$16 sps:$4 sm:$0xff]  }
  0x1c   : > { %1581 = vmatpush3.bf16.msra.mxu0 %v1824_v22  ;;  %v1884_v1 = vld [vmem:[%s2064_s28 + $0x10c] ss:$16 sps:$4 sm:$0xff]   ;;  %v1886_v2 = vld [vmem:[%s2064_s28 + $0x100] ss:$16 sps:$4 sm:$0xff]   ;;  %v1887_v3 = vld [vmem:[%s2064_s28 + $0x108] ss:$16 sps:$4 sm:$0xff]  }
  0x1d   : > { %1693 = vmatpush3.bf16.msra.mxu1 %v1825_v23  ;;  %1582 = vmatprep.subr.bf16.mxu0 %v1826_v24  ;;  %v1888_v4 = vld [vmem:[%s2064_s28 + $0x124] ss:$16 sps:$4 sm:$0xff]   ;;  %v1890_v5 = vld [vmem:[%s2064_s28 + $0x12c] ss:$16 sps:$4 sm:$0xff]   ;;  %v1892_v6 = vld [vmem:[%s2064_s28 + $0x120] ss:$16 sps:$4 sm:$0xff]  }
  0x1e   : > { %1694 = vmatprep.subr.bf16.mxu1 %v1827_v25  ;;  %v1893_v7 = vld [vmem:[%s2064_s28 + $0x128] ss:$16 sps:$4 sm:$0xff]   ;;  %v1894_v8 = vld [vmem:[%s2064_s28 + $0x144] ss:$16 sps:$4 sm:$0xff]   ;;  %v1896_v9 = vld [vmem:[%s2064_s28 + $0x14c] ss:$16 sps:$4 sm:$0xff]  }
  0x1f   : > { %v1898_v10 = vld [vmem:[%s2064_s28 + $0x140] ss:$16 sps:$4 sm:$0xff]   ;;  %v1899_v11 = vld [vmem:[%s2064_s28 + $0x148] ss:$16 sps:$4 sm:$0xff]   ;;  %v1900_v12 = vld [vmem:[%s2064_s28 + $0x164] ss:$16 sps:$4 sm:$0xff]  }
  0x20   : > { %1583 = vmatpush3.bf16.msra.mxu0 %v1828_v26  ;;  %v1902_v13 = vld [vmem:[%s2064_s28 + $0x16c] ss:$16 sps:$4 sm:$0xff]   ;;  %v1904_v14 = vld [vmem:[%s2064_s28 + $0x160] ss:$16 sps:$4 sm:$0xff]   ;;  %v1905_v15 = vld [vmem:[%s2064_s28 + $0x168] ss:$16 sps:$4 sm:$0xff]  }
  0x21   : > { %1695 = vmatpush3.bf16.msra.mxu1 %v1829_v27  ;;  %1584 = vmatprep.subr.bf16.mxu0 %v1830_v28  ;;  %v1906_v16 = vld [vmem:[%s2064_s28 + $0x184] ss:$16 sps:$4 sm:$0xff]   ;;  %v1908_v17 = vld [vmem:[%s2064_s28 + $0x18c] ss:$16 sps:$4 sm:$0xff]   ;;  %v1910_v18 = vld [vmem:[%s2064_s28 + $0x180] ss:$16 sps:$4 sm:$0xff]  }
  0x22   : > { %1696 = vmatprep.subr.bf16.mxu1 %v1831_v29  ;;  %v1911_v19 = vld [vmem:[%s2064_s28 + $0x188] ss:$16 sps:$4 sm:$0xff]   ;;  %v1912_v20 = vld [vmem:[%s2064_s28 + $0x1a4] ss:$16 sps:$4 sm:$0xff]   ;;  %v1914_v21 = vld [vmem:[%s2064_s28 + $0x1ac] ss:$16 sps:$4 sm:$0xff]  }
  0x23   : > { %v1916_v22 = vld [vmem:[%s2064_s28 + $0x1a0] ss:$16 sps:$4 sm:$0xff]   ;;  %v1917_v23 = vld [vmem:[%s2064_s28 + $0x1a8] ss:$16 sps:$4 sm:$0xff]   ;;  %v1918_v24 = vld [vmem:[%s2064_s28 + $0x1c4] ss:$16 sps:$4 sm:$0xff]  }
  0x24   : > { %1585 = vmatpush3.bf16.msra.mxu0 %v1832_v30  ;;  %v1920_v25 = vld [vmem:[%s2064_s28 + $0x1cc] ss:$16 sps:$4 sm:$0xff]   ;;  %v1922_v26 = vld [vmem:[%s2064_s28 + $0x1c0] ss:$16 sps:$4 sm:$0xff]   ;;  %v1923_v27 = vld [vmem:[%s2064_s28 + $0x1c8] ss:$16 sps:$4 sm:$0xff]  }
  0x25   : > { %1697 = vmatpush3.bf16.msra.mxu1 %v1833_v31  ;;  %v1924_v28 = vld [vmem:[%s2064_s28 + $0x1e4] ss:$16 sps:$4 sm:$0xff]   ;;  %v1926_v29 = vld [vmem:[%s2064_s28 + $0x1ec] ss:$16 sps:$4 sm:$0xff]   ;;  %v1928_v30 = vld [vmem:[%s2064_s28 + $0x1e0] ss:$16 sps:$4 sm:$0xff]  }
  0x26   : > { %v1929_v31 = vld [vmem:[%s2064_s28 + $0x1e8] ss:$16 sps:$4 sm:$0xff]  }
  0x27   : > { %858 = vmatmul.mubr.bf16.vlgmr.msra.gmra.mrb[0].mxu0 %v1834_v32 }
  0x28   : > { %1019 = vmatmul.mubr.bf16.vlgmr.msra.gmra.mrb[0].mxu1 %v1837_v34  ;;  %865 = vmatprep.mubr.bf16.mxu0 %v1840_v36  ;;  %v2139_v34 = vld [vmem:[%s2248_s2] ss:$0 sm:$0xff] }
  0x29   : > { %1026 = vmatprep.mubr.bf16.mxu1 %v1842_v37 }
  0x2f   : > { %866 = vmatmul.mubr.bf16.gmra.mrb[4].mxu0 %v1844_v38 }
  0x30   : > { %1027 = vmatmul.mubr.bf16.gmra.mrb[4].mxu1 %v1845_v39  ;;  %873 = vmatprep.mubr.bf16.mxu0 %v1846_v40 }
  0x31   : > { %1034 = vmatprep.mubr.bf16.mxu1 %v1848_v41 }
  0x37   : > { %874 = vmatmul.mubr.bf16.gmra.mrb[8].mxu0 %v1850_v42 }
  0x38   : > { %1035 = vmatmul.mubr.bf16.gmra.mrb[8].mxu1 %v1851_v43  ;;  %881 = vmatprep.mubr.bf16.mxu0 %v1852_v44 }
  0x39   : > { %1042 = vmatprep.mubr.bf16.mxu1 %v1854_v45 }
  0x3f   : > { %882 = vmatmul.mubr.bf16.gmra.mrb[12].mxu0 %v1856_v46 }
  0x40   : > { %1043 = vmatmul.mubr.bf16.gmra.mrb[12].mxu1 %v1857_v47  ;;  %889 = vmatprep.mubr.bf16.mxu0 %v1858_v48 }
  0x41   : > { %1050 = vmatprep.mubr.bf16.mxu1 %v1860_v49 }
  0x47   : > { %890 = vmatmul.mubr.bf16.gmra.mrb[16].mxu0 %v1862_v50 }
  0x48   : > { %1051 = vmatmul.mubr.bf16.gmra.mrb[16].mxu1 %v1863_v51  ;;  %897 = vmatprep.mubr.bf16.mxu0 %v1864_v52 }
  0x49   : > { %1058 = vmatprep.mubr.bf16.mxu1 %v1866_v53 }
  0x4f   : > { %898 = vmatmul.mubr.bf16.gmra.mrb[20].mxu0 %v1868_v54 }
  0x50   : > { %1059 = vmatmul.mubr.bf16.gmra.mrb[20].mxu1 %v1869_v55  ;;  %905 = vmatprep.mubr.bf16.mxu0 %v1870_v56 }
  0x51   : > { %1066 = vmatprep.mubr.bf16.mxu1 %v1872_v57 }
  0x57   : > { %906 = vmatmul.mubr.bf16.gmra.mrb[24].mxu0 %v1874_v58 }
  0x58   : > { %1067 = vmatmul.mubr.bf16.gmra.mrb[24].mxu1 %v1875_v59  ;;  %913 = vmatprep.mubr.bf16.mxu0 %v1876_v60 }
  0x59   : > { %1074 = vmatprep.mubr.bf16.mxu1 %v1878_v61 }
  0x5f   : > { %914 = vmatmul.mubr.bf16.gmra.mrb[28].mxu0 %v1880_v62 }
  0x60   : > { %1075 = vmatmul.mubr.bf16.gmra.mrb[28].mxu1 %v1881_v63  ;;  %921 = vmatprep.mubr.bf16.mxu0 %v1882_v0 }
  0x61   : > { %1082 = vmatprep.mubr.bf16.mxu1 %v1884_v1 }
  0x67   : > { %922 = vmatmul.mubr.bf16.gmra.mrb[32].mxu0 %v1886_v2 }
  0x68   : > { %1083 = vmatmul.mubr.bf16.gmra.mrb[32].mxu1 %v1887_v3  ;;  %929 = vmatprep.mubr.bf16.mxu0 %v1888_v4 }
  0x69   : > { %1090 = vmatprep.mubr.bf16.mxu1 %v1890_v5 }
  0x6f   : > { %930 = vmatmul.mubr.bf16.gmra.mrb[36].mxu0 %v1892_v6 }
  0x70   : > { %1091 = vmatmul.mubr.bf16.gmra.mrb[36].mxu1 %v1893_v7  ;;  %937 = vmatprep.mubr.bf16.mxu0 %v1894_v8 }
  0x71   : > { %1098 = vmatprep.mubr.bf16.mxu1 %v1896_v9 }
  0x77   : > { %938 = vmatmul.mubr.bf16.gmra.mrb[40].mxu0 %v1898_v10 }
  0x78   : > { %1099 = vmatmul.mubr.bf16.gmra.mrb[40].mxu1 %v1899_v11  ;;  %945 = vmatprep.mubr.bf16.mxu0 %v1900_v12 }
  0x79   : > { %1106 = vmatprep.mubr.bf16.mxu1 %v1902_v13 }
  0x7f   : > { %946 = vmatmul.mubr.bf16.gmra.mrb[44].mxu0 %v1904_v14 }
  0x80   : > { %1107 = vmatmul.mubr.bf16.gmra.mrb[44].mxu1 %v1905_v15  ;;  %953 = vmatprep.mubr.bf16.mxu0 %v1906_v16 }
  0x81   : > { %1114 = vmatprep.mubr.bf16.mxu1 %v1908_v17 }
  0x87   : > { %954 = vmatmul.mubr.bf16.gmra.mrb[48].mxu0 %v1910_v18 }
  0x88   : > { %1115 = vmatmul.mubr.bf16.gmra.mrb[48].mxu1 %v1911_v19  ;;  %961 = vmatprep.mubr.bf16.mxu0 %v1912_v20 }
  0x89   : > { %1122 = vmatprep.mubr.bf16.mxu1 %v1914_v21 }
  0x8f   : > { %962 = vmatmul.mubr.bf16.gmra.mrb[52].mxu0 %v1916_v22 }
  0x90   : > { %1123 = vmatmul.mubr.bf16.gmra.mrb[52].mxu1 %v1917_v23  ;;  %969 = vmatprep.mubr.bf16.mxu0 %v1918_v24 }
  0x91   : > { %1130 = vmatprep.mubr.bf16.mxu1 %v1920_v25 }
  0x97   : > { %970 = vmatmul.mubr.bf16.gmra.mrb[56].mxu0 %v1922_v26 }
  0x98   : > { %1131 = vmatmul.mubr.bf16.gmra.mrb[56].mxu1 %v1923_v27  ;;  %977 = vmatprep.mubr.bf16.mxu0 %v1924_v28 }
  0x99   : > { %1138 = vmatprep.mubr.bf16.mxu1 %v1926_v29 }
  0x9f   : > { %978 = vmatmul.mubr.bf16.gmra.mrb[60].mxu0 %v1928_v30 }
  0xa0   : > { %1139 = vmatmul.mubr.bf16.gmra.mrb[60].mxu1 %v1929_v31 }
  0xfa   : > { %v1586_v32 = vpop.f32.mrb[0].mxu0 }
  0xfb   : > { %v1698_v33 = vpop.f32.mrb[0].mxu1  ;;  %v1587_v35 = vpop.f32.mrb[1].mxu0 }
  0xfc   : > { %v1588_v36 = vadd.f32 %v1587_v35, %v1586_v32  ;;  %v1699_v37 = vpop.f32.mrb[1].mxu1  ;;  %v1589_v38 = vpop.f32.mrb[2].mxu0 }
  0xfd   : > { %v1700_v39 = vadd.f32 %v1699_v37, %v1698_v33  ;;  %v1701_v40 = vpop.f32.mrb[2].mxu1  ;;  %v1590_v41 = vpop.f32.mrb[3].mxu0 }
  0xfe   : > { %v860_v42 = vadd.f32 %v1588_v36, %v2139_v34  ;;  %v1591_v43 = vadd.f32 %v1590_v41, %v1589_v38  ;;  %v1702_v44 = vpop.f32.mrb[3].mxu1 }
  0xff   : > { %v1703_v45 = vadd.f32 %v1702_v44, %v1701_v40 }
 0x100   : > { %v1021_v46 = vadd.f32 %v1700_v39, %v860_v42  ;;  %v863_v47 = vadd.f32 %v1591_v43, %v2139_v34 }
 0x102   : > { %v1147_v48 = vmax.f32 %v1021_v46, 0.0  ;;  %v1024_v49 = vadd.f32 %v1703_v45, %v863_v47  ;;  %v1592_v50 = vpop.f32.mrb[4].mxu0 }
 0x103   : > { %v1704_v51 = vpop.f32.mrb[4].mxu1  ;;  %v1593_v52 = vpop.f32.mrb[5].mxu0 }
 0x104   : > { %v1538_v53 = vpack.c.bf16 %v1147_v48, %v1147_v48  ;;  %v1148_v54 = vmax.f32 %v1024_v49, 0.0  ;;  %v1594_v55 = vadd.f32 %v1593_v52, %v1592_v50  ;;  %v1705_v56 = vpop.f32.mrb[5].mxu1  ;;  %v1595_v57 = vpop.f32.mrb[6].mxu0 }
 0x105   : > { %v1706_v58 = vadd.f32 %v1705_v56, %v1704_v51  ;;  %v1707_v59 = vpop.f32.mrb[6].mxu1  ;;  %v1596_v60 = vpop.f32.mrb[7].mxu0 }
 0x106   : > { %1308 = vst.msk [vmem:[%s2147_s10] sm:$0xf] %vm1307_vm0, %v1538_v53  ;;  %v1539_v61 = vpack.c.bf16 %v1148_v54, %v1148_v54  ;;  %v868_v62 = vadd.f32 %v1594_v55, %v2139_v34  ;;  %v1597_v63 = vadd.f32 %v1596_v60, %v1595_v57  ;;  %v1708_v0 = vpop.f32.mrb[7].mxu1 }
 0x107   : > { %v1709_v1 = vadd.f32 %v1708_v0, %v1707_v59 }
 0x108   : > { %1309 = vst.msk [vmem:[%s2147_s10 + $0x4] sm:$0xf] %vm1307_vm0, %v1539_v61  ;;  %v1029_v2 = vadd.f32 %v1706_v58, %v868_v62  ;;  %v871_v3 = vadd.f32 %v1597_v63, %v2139_v34 }
 0x10a   : > { %v1149_v4 = vmax.f32 %v1029_v2, 0.0  ;;  %v1032_v5 = vadd.f32 %v1709_v1, %v871_v3  ;;  %v1598_v6 = vpop.f32.mrb[8].mxu0 }
 0x10b   : > { %v1710_v7 = vpop.f32.mrb[8].mxu1  ;;  %v1599_v8 = vpop.f32.mrb[9].mxu0 }
 0x10c   : > { %v1540_v9 = vpack.c.bf16 %v1149_v4, %v1149_v4  ;;  %v1150_v10 = vmax.f32 %v1032_v5, 0.0  ;;  %v1600_v11 = vadd.f32 %v1599_v8, %v1598_v6  ;;  %v1711_v12 = vpop.f32.mrb[9].mxu1  ;;  %v1601_v13 = vpop.f32.mrb[10].mxu0 }
 0x10d   : > { %v1712_v14 = vadd.f32 %v1711_v12, %v1710_v7  ;;  %v1713_v15 = vpop.f32.mrb[10].mxu1  ;;  %v1602_v16 = vpop.f32.mrb[11].mxu0 }
 0x10e   : > { %1310 = vst.msk [vmem:[%s2147_s10 + $0x8] sm:$0xf] %vm1307_vm0, %v1540_v9  ;;  %v1541_v17 = vpack.c.bf16 %v1150_v10, %v1150_v10  ;;  %v876_v18 = vadd.f32 %v1600_v11, %v2139_v34  ;;  %v1603_v19 = vadd.f32 %v1602_v16, %v1601_v13  ;;  %v1714_v20 = vpop.f32.mrb[11].mxu1 }
 0x10f   : > { %v1715_v21 = vadd.f32 %v1714_v20, %v1713_v15 }
 0x110   : > { %1311 = vst.msk [vmem:[%s2147_s10 + $0xc] sm:$0xf] %vm1307_vm0, %v1541_v17  ;;  %v1037_v22 = vadd.f32 %v1712_v14, %v876_v18  ;;  %v879_v23 = vadd.f32 %v1603_v19, %v2139_v34 }
 0x112   : > { %v1151_v24 = vmax.f32 %v1037_v22, 0.0  ;;  %v1040_v25 = vadd.f32 %v1715_v21, %v879_v23  ;;  %v1604_v26 = vpop.f32.mrb[12].mxu0 }
 0x113   : > { %v1716_v27 = vpop.f32.mrb[12].mxu1  ;;  %v1605_v28 = vpop.f32.mrb[13].mxu0 }
 0x114   : > { %v1542_v29 = vpack.c.bf16 %v1151_v24, %v1151_v24  ;;  %v1152_v30 = vmax.f32 %v1040_v25, 0.0  ;;  %v1606_v31 = vadd.f32 %v1605_v28, %v1604_v26  ;;  %v1717_v32 = vpop.f32.mrb[13].mxu1  ;;  %v1607_v33 = vpop.f32.mrb[14].mxu0 }
 0x115   : > { %v1718_v35 = vadd.f32 %v1717_v32, %v1716_v27  ;;  %v1719_v36 = vpop.f32.mrb[14].mxu1  ;;  %v1608_v37 = vpop.f32.mrb[15].mxu0 }
 0x116   : > { %1312 = vst.msk [vmem:[%s2147_s10 + $0x10] sm:$0xf] %vm1307_vm0, %v1542_v29  ;;  %v1543_v38 = vpack.c.bf16 %v1152_v30, %v1152_v30  ;;  %v884_v39 = vadd.f32 %v1606_v31, %v2139_v34  ;;  %v1609_v40 = vadd.f32 %v1608_v37, %v1607_v33  ;;  %v1720_v41 = vpop.f32.mrb[15].mxu1 }
 0x117   : > { %v1721_v42 = vadd.f32 %v1720_v41, %v1719_v36 }
 0x118   : > { %1313 = vst.msk [vmem:[%s2147_s10 + $0x14] sm:$0xf] %vm1307_vm0, %v1543_v38  ;;  %v1045_v43 = vadd.f32 %v1718_v35, %v884_v39  ;;  %v887_v44 = vadd.f32 %v1609_v40, %v2139_v34 }
 0x11a   : > { %v1153_v45 = vmax.f32 %v1045_v43, 0.0  ;;  %v1048_v46 = vadd.f32 %v1721_v42, %v887_v44  ;;  %v1610_v47 = vpop.f32.mrb[16].mxu0 }
 0x11b   : > { %v1722_v48 = vpop.f32.mrb[16].mxu1  ;;  %v1611_v49 = vpop.f32.mrb[17].mxu0 }
 0x11c   : > { %v1544_v50 = vpack.c.bf16 %v1153_v45, %v1153_v45  ;;  %v1154_v51 = vmax.f32 %v1048_v46, 0.0  ;;  %v1612_v52 = vadd.f32 %v1611_v49, %v1610_v47  ;;  %v1723_v53 = vpop.f32.mrb[17].mxu1  ;;  %v1613_v54 = vpop.f32.mrb[18].mxu0 }
 0x11d   : > { %v1724_v55 = vadd.f32 %v1723_v53, %v1722_v48  ;;  %v1725_v56 = vpop.f32.mrb[18].mxu1  ;;  %v1614_v57 = vpop.f32.mrb[19].mxu0 }
 0x11e   : > { %1314 = vst.msk [vmem:[%s2147_s10 + $0x18] sm:$0xf] %vm1307_vm0, %v1544_v50  ;;  %v1545_v58 = vpack.c.bf16 %v1154_v51, %v1154_v51  ;;  %v892_v59 = vadd.f32 %v1612_v52, %v2139_v34  ;;  %v1615_v60 = vadd.f32 %v1614_v57, %v1613_v54  ;;  %v1726_v61 = vpop.f32.mrb[19].mxu1 }
 0x11f   : > { %v1727_v62 = vadd.f32 %v1726_v61, %v1725_v56 }
 0x120   : > { %1315 = vst.msk [vmem:[%s2147_s10 + $0x1c] sm:$0xf] %vm1307_vm0, %v1545_v58  ;;  %v1053_v63 = vadd.f32 %v1724_v55, %v892_v59  ;;  %v895_v0 = vadd.f32 %v1615_v60, %v2139_v34 }
 0x122   : > { %v1155_v1 = vmax.f32 %v1053_v63, 0.0  ;;  %v1056_v2 = vadd.f32 %v1727_v62, %v895_v0  ;;  %v1616_v3 = vpop.f32.mrb[20].mxu0 }
 0x123   : > { %v1728_v4 = vpop.f32.mrb[20].mxu1  ;;  %v1617_v5 = vpop.f32.mrb[21].mxu0 }
 0x124   : > { %v1546_v6 = vpack.c.bf16 %v1155_v1, %v1155_v1  ;;  %v1156_v7 = vmax.f32 %v1056_v2, 0.0  ;;  %v1618_v8 = vadd.f32 %v1617_v5, %v1616_v3  ;;  %v1729_v9 = vpop.f32.mrb[21].mxu1  ;;  %v1619_v10 = vpop.f32.mrb[22].mxu0 }
 0x125   : > { %v1730_v11 = vadd.f32 %v1729_v9, %v1728_v4  ;;  %v1731_v12 = vpop.f32.mrb[22].mxu1  ;;  %v1620_v13 = vpop.f32.mrb[23].mxu0 }
 0x126   : > { %1316 = vst.msk [vmem:[%s2147_s10 + $0x20] sm:$0xf] %vm1307_vm0, %v1546_v6  ;;  %v1547_v14 = vpack.c.bf16 %v1156_v7, %v1156_v7  ;;  %v900_v15 = vadd.f32 %v1618_v8, %v2139_v34  ;;  %v1621_v16 = vadd.f32 %v1620_v13, %v1619_v10  ;;  %v1732_v17 = vpop.f32.mrb[23].mxu1 }
 0x127   : > { %v1733_v18 = vadd.f32 %v1732_v17, %v1731_v12 }
 0x128   : > { %1317 = vst.msk [vmem:[%s2147_s10 + $0x24] sm:$0xf] %vm1307_vm0, %v1547_v14  ;;  %v1061_v19 = vadd.f32 %v1730_v11, %v900_v15  ;;  %v903_v20 = vadd.f32 %v1621_v16, %v2139_v34 }
 0x12a   : > { %v1157_v21 = vmax.f32 %v1061_v19, 0.0  ;;  %v1064_v22 = vadd.f32 %v1733_v18, %v903_v20  ;;  %v1622_v23 = vpop.f32.mrb[24].mxu0 }
 0x12b   : > { %v1734_v24 = vpop.f32.mrb[24].mxu1  ;;  %v1623_v25 = vpop.f32.mrb[25].mxu0 }
 0x12c   : > { %v1548_v26 = vpack.c.bf16 %v1157_v21, %v1157_v21  ;;  %v1158_v27 = vmax.f32 %v1064_v22, 0.0  ;;  %v1624_v28 = vadd.f32 %v1623_v25, %v1622_v23  ;;  %v1735_v29 = vpop.f32.mrb[25].mxu1  ;;  %v1625_v30 = vpop.f32.mrb[26].mxu0 }
 0x12d   : > { %v1736_v31 = vadd.f32 %v1735_v29, %v1734_v24  ;;  %v1737_v32 = vpop.f32.mrb[26].mxu1  ;;  %v1626_v33 = vpop.f32.mrb[27].mxu0 }
 0x12e   : > { %1318 = vst.msk [vmem:[%s2147_s10 + $0x28] sm:$0xf] %vm1307_vm0, %v1548_v26  ;;  %v1549_v35 = vpack.c.bf16 %v1158_v27, %v1158_v27  ;;  %v908_v36 = vadd.f32 %v1624_v28, %v2139_v34  ;;  %v1627_v37 = vadd.f32 %v1626_v33, %v1625_v30  ;;  %v1738_v38 = vpop.f32.mrb[27].mxu1 }
 0x12f   : > { %v1739_v39 = vadd.f32 %v1738_v38, %v1737_v32 }
 0x130   : > { %1319 = vst.msk [vmem:[%s2147_s10 + $0x2c] sm:$0xf] %vm1307_vm0, %v1549_v35  ;;  %v1069_v40 = vadd.f32 %v1736_v31, %v908_v36  ;;  %v911_v41 = vadd.f32 %v1627_v37, %v2139_v34 }
 0x132   : > { %v1159_v42 = vmax.f32 %v1069_v40, 0.0  ;;  %v1072_v43 = vadd.f32 %v1739_v39, %v911_v41  ;;  %v1628_v44 = vpop.f32.mrb[28].mxu0 }
 0x133   : > { %v1740_v45 = vpop.f32.mrb[28].mxu1  ;;  %v1629_v46 = vpop.f32.mrb[29].mxu0 }
 0x134   : > { %v1550_v47 = vpack.c.bf16 %v1159_v42, %v1159_v42  ;;  %v1160_v48 = vmax.f32 %v1072_v43, 0.0  ;;  %v1630_v49 = vadd.f32 %v1629_v46, %v1628_v44  ;;  %v1741_v50 = vpop.f32.mrb[29].mxu1  ;;  %v1631_v51 = vpop.f32.mrb[30].mxu0 }
 0x135   : > { %v1742_v52 = vadd.f32 %v1741_v50, %v1740_v45  ;;  %v1743_v53 = vpop.f32.mrb[30].mxu1  ;;  %v1632_v54 = vpop.f32.mrb[31].mxu0 }
 0x136   : > { %1320 = vst.msk [vmem:[%s2147_s10 + $0x30] sm:$0xf] %vm1307_vm0, %v1550_v47  ;;  %v1551_v55 = vpack.c.bf16 %v1160_v48, %v1160_v48  ;;  %v916_v56 = vadd.f32 %v1630_v49, %v2139_v34  ;;  %v1633_v57 = vadd.f32 %v1632_v54, %v1631_v51  ;;  %v1744_v58 = vpop.f32.mrb[31].mxu1 }
 0x137   : > { %v1745_v59 = vadd.f32 %v1744_v58, %v1743_v53 }
 0x138   : > { %1321 = vst.msk [vmem:[%s2147_s10 + $0x34] sm:$0xf] %vm1307_vm0, %v1551_v55  ;;  %v1077_v60 = vadd.f32 %v1742_v52, %v916_v56  ;;  %v919_v61 = vadd.f32 %v1633_v57, %v2139_v34 }
 0x13a   : > { %v1161_v62 = vmax.f32 %v1077_v60, 0.0  ;;  %v1080_v63 = vadd.f32 %v1745_v59, %v919_v61  ;;  %v1634_v0 = vpop.f32.mrb[32].mxu0 }
 0x13b   : > { %v1746_v1 = vpop.f32.mrb[32].mxu1  ;;  %v1635_v2 = vpop.f32.mrb[33].mxu0 }
 0x13c   : > { %v1552_v3 = vpack.c.bf16 %v1161_v62, %v1161_v62  ;;  %v1162_v4 = vmax.f32 %v1080_v63, 0.0  ;;  %v1636_v5 = vadd.f32 %v1635_v2, %v1634_v0  ;;  %v1747_v6 = vpop.f32.mrb[33].mxu1  ;;  %v1637_v7 = vpop.f32.mrb[34].mxu0 }
 0x13d   : > { %v1748_v8 = vadd.f32 %v1747_v6, %v1746_v1  ;;  %v1749_v9 = vpop.f32.mrb[34].mxu1  ;;  %v1638_v10 = vpop.f32.mrb[35].mxu0 }
 0x13e   : > { %1322 = vst.msk [vmem:[%s2147_s10 + $0x38] sm:$0xf] %vm1307_vm0, %v1552_v3  ;;  %v1553_v11 = vpack.c.bf16 %v1162_v4, %v1162_v4  ;;  %v924_v12 = vadd.f32 %v1636_v5, %v2139_v34  ;;  %v1639_v13 = vadd.f32 %v1638_v10, %v1637_v7  ;;  %v1750_v14 = vpop.f32.mrb[35].mxu1 }
 0x13f   : > { %v1751_v15 = vadd.f32 %v1750_v14, %v1749_v9 }
 0x140   : > { %1323 = vst.msk [vmem:[%s2147_s10 + $0x3c] sm:$0xf] %vm1307_vm0, %v1553_v11  ;;  %v1085_v16 = vadd.f32 %v1748_v8, %v924_v12  ;;  %v927_v17 = vadd.f32 %v1639_v13, %v2139_v34 }
 0x142   : > { %v1163_v18 = vmax.f32 %v1085_v16, 0.0  ;;  %v1088_v19 = vadd.f32 %v1751_v15, %v927_v17  ;;  %v1640_v20 = vpop.f32.mrb[36].mxu0 }
 0x143   : > { %v1752_v21 = vpop.f32.mrb[36].mxu1  ;;  %v1641_v22 = vpop.f32.mrb[37].mxu0 }
 0x144   : > { %v1554_v23 = vpack.c.bf16 %v1163_v18, %v1163_v18  ;;  %v1164_v24 = vmax.f32 %v1088_v19, 0.0  ;;  %v1642_v25 = vadd.f32 %v1641_v22, %v1640_v20  ;;  %v1753_v26 = vpop.f32.mrb[37].mxu1  ;;  %v1643_v27 = vpop.f32.mrb[38].mxu0 }
 0x145   : > { %v1754_v28 = vadd.f32 %v1753_v26, %v1752_v21  ;;  %v1755_v29 = vpop.f32.mrb[38].mxu1  ;;  %v1644_v30 = vpop.f32.mrb[39].mxu0 }
 0x146   : > { %1324 = vst.msk [vmem:[%s2147_s10 + $0x40] sm:$0xf] %vm1307_vm0, %v1554_v23  ;;  %v1555_v31 = vpack.c.bf16 %v1164_v24, %v1164_v24  ;;  %v932_v32 = vadd.f32 %v1642_v25, %v2139_v34  ;;  %v1645_v33 = vadd.f32 %v1644_v30, %v1643_v27  ;;  %v1756_v35 = vpop.f32.mrb[39].mxu1 }
 0x147   : > { %v1757_v36 = vadd.f32 %v1756_v35, %v1755_v29 }
 0x148   : > { %1325 = vst.msk [vmem:[%s2147_s10 + $0x44] sm:$0xf] %vm1307_vm0, %v1555_v31  ;;  %v1093_v37 = vadd.f32 %v1754_v28, %v932_v32  ;;  %v935_v38 = vadd.f32 %v1645_v33, %v2139_v34 }
 0x14a   : > { %v1165_v39 = vmax.f32 %v1093_v37, 0.0  ;;  %v1096_v40 = vadd.f32 %v1757_v36, %v935_v38  ;;  %v1646_v41 = vpop.f32.mrb[40].mxu0 }
 0x14b   : > { %v1758_v42 = vpop.f32.mrb[40].mxu1  ;;  %v1647_v43 = vpop.f32.mrb[41].mxu0 }
 0x14c   : > { %v1556_v44 = vpack.c.bf16 %v1165_v39, %v1165_v39  ;;  %v1166_v45 = vmax.f32 %v1096_v40, 0.0  ;;  %v1648_v46 = vadd.f32 %v1647_v43, %v1646_v41  ;;  %v1759_v47 = vpop.f32.mrb[41].mxu1  ;;  %v1649_v48 = vpop.f32.mrb[42].mxu0 }
 0x14d   : > { %v1760_v49 = vadd.f32 %v1759_v47, %v1758_v42  ;;  %v1761_v50 = vpop.f32.mrb[42].mxu1  ;;  %v1650_v51 = vpop.f32.mrb[43].mxu0 }
 0x14e   : > { %1326 = vst.msk [vmem:[%s2147_s10 + $0x48] sm:$0xf] %vm1307_vm0, %v1556_v44  ;;  %v1557_v52 = vpack.c.bf16 %v1166_v45, %v1166_v45  ;;  %v940_v53 = vadd.f32 %v1648_v46, %v2139_v34  ;;  %v1651_v54 = vadd.f32 %v1650_v51, %v1649_v48  ;;  %v1762_v55 = vpop.f32.mrb[43].mxu1 }
 0x14f   : > { %v1763_v56 = vadd.f32 %v1762_v55, %v1761_v50 }
 0x150   : > { %1327 = vst.msk [vmem:[%s2147_s10 + $0x4c] sm:$0xf] %vm1307_vm0, %v1557_v52  ;;  %v1101_v57 = vadd.f32 %v1760_v49, %v940_v53  ;;  %v943_v58 = vadd.f32 %v1651_v54, %v2139_v34 }
 0x152   : > { %v1167_v59 = vmax.f32 %v1101_v57, 0.0  ;;  %v1104_v60 = vadd.f32 %v1763_v56, %v943_v58  ;;  %v1652_v61 = vpop.f32.mrb[44].mxu0 }
 0x153   : > { %v1764_v62 = vpop.f32.mrb[44].mxu1  ;;  %v1653_v63 = vpop.f32.mrb[45].mxu0 }
 0x154   : > { %v1558_v0 = vpack.c.bf16 %v1167_v59, %v1167_v59  ;;  %v1168_v1 = vmax.f32 %v1104_v60, 0.0  ;;  %v1654_v2 = vadd.f32 %v1653_v63, %v1652_v61  ;;  %v1765_v3 = vpop.f32.mrb[45].mxu1  ;;  %v1655_v4 = vpop.f32.mrb[46].mxu0 }
 0x155   : > { %v1766_v5 = vadd.f32 %v1765_v3, %v1764_v62  ;;  %v1767_v6 = vpop.f32.mrb[46].mxu1  ;;  %v1656_v7 = vpop.f32.mrb[47].mxu0 }
 0x156   : > { %1328 = vst.msk [vmem:[%s2147_s10 + $0x50] sm:$0xf] %vm1307_vm0, %v1558_v0  ;;  %v1559_v8 = vpack.c.bf16 %v1168_v1, %v1168_v1  ;;  %v948_v9 = vadd.f32 %v1654_v2, %v2139_v34  ;;  %v1657_v10 = vadd.f32 %v1656_v7, %v1655_v4  ;;  %v1768_v11 = vpop.f32.mrb[47].mxu1 }
 0x157   : > { %v1769_v12 = vadd.f32 %v1768_v11, %v1767_v6 }
 0x158   : > { %1329 = vst.msk [vmem:[%s2147_s10 + $0x54] sm:$0xf] %vm1307_vm0, %v1559_v8  ;;  %v1109_v13 = vadd.f32 %v1766_v5, %v948_v9  ;;  %v951_v14 = vadd.f32 %v1657_v10, %v2139_v34 }
 0x15a   : > { %v1169_v15 = vmax.f32 %v1109_v13, 0.0  ;;  %v1112_v16 = vadd.f32 %v1769_v12, %v951_v14  ;;  %v1658_v17 = vpop.f32.mrb[48].mxu0 }
 0x15b   : > { %v1770_v18 = vpop.f32.mrb[48].mxu1  ;;  %v1659_v19 = vpop.f32.mrb[49].mxu0 }
 0x15c   : > { %v1560_v20 = vpack.c.bf16 %v1169_v15, %v1169_v15  ;;  %v1170_v21 = vmax.f32 %v1112_v16, 0.0  ;;  %v1660_v22 = vadd.f32 %v1659_v19, %v1658_v17  ;;  %v1771_v23 = vpop.f32.mrb[49].mxu1  ;;  %v1661_v24 = vpop.f32.mrb[50].mxu0 }
 0x15d   : > { %v1772_v25 = vadd.f32 %v1771_v23, %v1770_v18  ;;  %v1773_v26 = vpop.f32.mrb[50].mxu1  ;;  %v1662_v27 = vpop.f32.mrb[51].mxu0 }
 0x15e   : > { %1330 = vst.msk [vmem:[%s2147_s10 + $0x58] sm:$0xf] %vm1307_vm0, %v1560_v20  ;;  %v1561_v28 = vpack.c.bf16 %v1170_v21, %v1170_v21  ;;  %v956_v29 = vadd.f32 %v1660_v22, %v2139_v34  ;;  %v1663_v30 = vadd.f32 %v1662_v27, %v1661_v24  ;;  %v1774_v31 = vpop.f32.mrb[51].mxu1 }
 0x15f   : > { %v1775_v32 = vadd.f32 %v1774_v31, %v1773_v26 }
 0x160   : > { %1331 = vst.msk [vmem:[%s2147_s10 + $0x5c] sm:$0xf] %vm1307_vm0, %v1561_v28  ;;  %v1117_v33 = vadd.f32 %v1772_v25, %v956_v29  ;;  %v959_v35 = vadd.f32 %v1663_v30, %v2139_v34 }
 0x162   : > { %v1171_v36 = vmax.f32 %v1117_v33, 0.0  ;;  %v1120_v37 = vadd.f32 %v1775_v32, %v959_v35  ;;  %v1664_v38 = vpop.f32.mrb[52].mxu0 }
 0x163   : > { %v1776_v39 = vpop.f32.mrb[52].mxu1  ;;  %v1665_v40 = vpop.f32.mrb[53].mxu0 }
 0x164   : > { %v1562_v41 = vpack.c.bf16 %v1171_v36, %v1171_v36  ;;  %v1172_v42 = vmax.f32 %v1120_v37, 0.0  ;;  %v1666_v43 = vadd.f32 %v1665_v40, %v1664_v38  ;;  %v1777_v44 = vpop.f32.mrb[53].mxu1  ;;  %v1667_v45 = vpop.f32.mrb[54].mxu0 }
 0x165   : > { %v1778_v46 = vadd.f32 %v1777_v44, %v1776_v39  ;;  %v1779_v47 = vpop.f32.mrb[54].mxu1  ;;  %v1668_v48 = vpop.f32.mrb[55].mxu0 }
 0x166   : > { %1332 = vst.msk [vmem:[%s2147_s10 + $0x60] sm:$0xf] %vm1307_vm0, %v1562_v41  ;;  %v1563_v49 = vpack.c.bf16 %v1172_v42, %v1172_v42  ;;  %v964_v50 = vadd.f32 %v1666_v43, %v2139_v34  ;;  %v1669_v51 = vadd.f32 %v1668_v48, %v1667_v45  ;;  %v1780_v52 = vpop.f32.mrb[55].mxu1 }
 0x167   : > { %v1781_v53 = vadd.f32 %v1780_v52, %v1779_v47 }
 0x168   : > { %1333 = vst.msk [vmem:[%s2147_s10 + $0x64] sm:$0xf] %vm1307_vm0, %v1563_v49  ;;  %v1125_v54 = vadd.f32 %v1778_v46, %v964_v50  ;;  %v967_v55 = vadd.f32 %v1669_v51, %v2139_v34 }
 0x16a   : > { %v1173_v56 = vmax.f32 %v1125_v54, 0.0  ;;  %v1128_v57 = vadd.f32 %v1781_v53, %v967_v55  ;;  %v1670_v58 = vpop.f32.mrb[56].mxu0 }
 0x16b   : > { %v1782_v59 = vpop.f32.mrb[56].mxu1  ;;  %v1671_v60 = vpop.f32.mrb[57].mxu0 }
 0x16c   : > { %v1564_v61 = vpack.c.bf16 %v1173_v56, %v1173_v56  ;;  %v1174_v62 = vmax.f32 %v1128_v57, 0.0  ;;  %v1672_v63 = vadd.f32 %v1671_v60, %v1670_v58  ;;  %v1783_v0 = vpop.f32.mrb[57].mxu1  ;;  %v1673_v1 = vpop.f32.mrb[58].mxu0 }
 0x16d   : > { %v1784_v2 = vadd.f32 %v1783_v0, %v1782_v59  ;;  %v1785_v3 = vpop.f32.mrb[58].mxu1  ;;  %v1674_v4 = vpop.f32.mrb[59].mxu0 }
 0x16e   : > { %1334 = vst.msk [vmem:[%s2147_s10 + $0x68] sm:$0xf] %vm1307_vm0, %v1564_v61  ;;  %v1565_v5 = vpack.c.bf16 %v1174_v62, %v1174_v62  ;;  %v972_v6 = vadd.f32 %v1672_v63, %v2139_v34  ;;  %v1675_v7 = vadd.f32 %v1674_v4, %v1673_v1  ;;  %v1786_v8 = vpop.f32.mrb[59].mxu1 }
 0x16f   : > { %v1787_v9 = vadd.f32 %v1786_v8, %v1785_v3 }
 0x170   : > { %1335 = vst.msk [vmem:[%s2147_s10 + $0x6c] sm:$0xf] %vm1307_vm0, %v1565_v5  ;;  %v1133_v10 = vadd.f32 %v1784_v2, %v972_v6  ;;  %v975_v11 = vadd.f32 %v1675_v7, %v2139_v34 }
 0x172   : > { %v1175_v12 = vmax.f32 %v1133_v10, 0.0  ;;  %v1136_v13 = vadd.f32 %v1787_v9, %v975_v11  ;;  %v1676_v14 = vpop.f32.mrb[60].mxu0 }
 0x173   : > { %v1788_v15 = vpop.f32.mrb[60].mxu1  ;;  %v1677_v16 = vpop.f32.mrb[61].mxu0 }
 0x174   : > { %v1566_v17 = vpack.c.bf16 %v1175_v12, %v1175_v12  ;;  %v1176_v18 = vmax.f32 %v1136_v13, 0.0  ;;  %v1678_v19 = vadd.f32 %v1677_v16, %v1676_v14  ;;  %v1789_v20 = vpop.f32.mrb[61].mxu1  ;;  %v1679_v21 = vpop.f32.mrb[62].mxu0 }
 0x175   : > { %v1790_v22 = vadd.f32 %v1789_v20, %v1788_v15  ;;  %v1791_v23 = vpop.f32.mrb[62].mxu1  ;;  %v1680_v24 = vpop.f32.mrb[63].mxu0 }
 0x176   : > { %1336 = vst.msk [vmem:[%s2147_s10 + $0x70] sm:$0xf] %vm1307_vm0, %v1566_v17  ;;  %v1567_v25 = vpack.c.bf16 %v1176_v18, %v1176_v18  ;;  %v980_v26 = vadd.f32 %v1678_v19, %v2139_v34  ;;  %v1681_v27 = vadd.f32 %v1680_v24, %v1679_v21  ;;  %v1792_v28 = vpop.f32.mrb[63].mxu1 }
 0x177   : > { %v1793_v29 = vadd.f32 %v1792_v28, %v1791_v23 }
 0x178   : > { %1337 = vst.msk [vmem:[%s2147_s10 + $0x74] sm:$0xf] %vm1307_vm0, %v1567_v25  ;;  %v1141_v30 = vadd.f32 %v1790_v22, %v980_v26  ;;  %v983_v31 = vadd.f32 %v1681_v27, %v2139_v34 }
 0x17a   : > { %v1177_v32 = vmax.f32 %v1141_v30, 0.0  ;;  %v1144_v33 = vadd.f32 %v1793_v29, %v983_v31 }
 0x17c   : > { %v1568_v35 = vpack.c.bf16 %v1177_v32, %v1177_v32  ;;  %v1178_v36 = vmax.f32 %v1144_v33, 0.0 }
 0x17e   : > { %1338 = vst.msk [vmem:[%s2147_s10 + $0x78] sm:$0xf] %vm1307_vm0, %v1568_v35  ;;  %v1569_v37 = vpack.c.bf16 %v1178_v36, %v1178_v36 }
 0x180   : > { %1339 = vst.msk [vmem:[%s2147_s10 + $0x7c] sm:$0xf] %vm1307_vm0, %v1569_v37 }
 0x181 PF: > { %s13_s12 = sadd.s32 1, %s1936_s12  }
 0x182   : > { %p10_p4 = scmp.ge.s32.totalorder %s13_s12, 4  }
 0x184   :  { %12 = sbr.rel (!%p10_p4) target bundleno = 1 (0x1), region = 62 }

// kernel: posenet_forward.6
= control target key start
LH: loop header
LB: loop body
LE: loop exit
PB: predicated region body
PF: predicated region fallthrough
CT: control target
= control target key end

     0   :  { %s909_s12 = smov 0   ;;  %s1047_s0 = inlined_call_operand.vmem [shape: bf16[128,384], index: 0, kind: input, shape index: {}]   ;;  %s1048_s1 = inlined_call_operand.vmem [shape: bf16[384,64], index: 1, kind: input, shape index: {}]   ;;  %s1049_s2 = inlined_call_operand.vmem [shape: f32[1,64], index: 2, kind: input, shape index: {}]   ;;  %s1050_s3 = inlined_call_operand.vmem [shape: bf16[128,64], index: 3, kind: output, shape index: {}]  }
   0x1 LB: > { %s692_s13 = sadd.s32 4294967295, %s887_s12   ;;  %p696_p0 = scmp.ge.s32.totalorder %s887_s12, 1  ;;  %s887_s12 = sphi %s909_s12, %s13_s12  }
   0x2   : > { %p139_p1 = scmp.lt.s32.totalorder %s887_s12, 3 }
   0x4   : > { %p140_p2 = pnand %p696_p0, %p139_p1 }
   0x5   : > { %v841_v0 = vld [vmem:[%s1048_s1 + $0x40] sm:$0xff] (!%p140_p2)   ;;  %v843_v2 = vld [vmem:[%s1048_s1 + $0x48] sm:$0xff] (!%p140_p2)   ;;  %v846_v5 = vld [vmem:[%s1048_s1 + $0x50] sm:$0xff] (!%p140_p2)   ;;  %s697_s28 = sshll.u32 (!%p140_p2), %s692_s13, 3  ;;  %vm627_vm0 = vcmask (!%p140_p2), 519168  }
   0x6   : > { %143 = sbr.rel (%p140_p2) target bundleno = 288 (0x120), region = 32  ;;  %v842_v1 = vld [vmem:[%s1048_s1] sm:$0xff] (!%p140_p2)   ;;  %756 = vmatprep.subr.bf16.mxu0 (!%p140_p2), %v841_v0  ;;  %v845_v4 = vld [vmem:[%s1048_s1 + $0x8] sm:$0xff] (!%p140_p2)   ;;  %v848_v7 = vld [vmem:[%s1048_s1 + $0x10] sm:$0xff] (!%p140_p2)   ;;  %p165_p3 = scmp.lt.s32.totalorder (!%p140_p2), %s697_s28, 15 }
   0x7   : > { %757 = vmatpush3.bf16.msra.mxu0 (!%p140_p2), %v842_v1  ;;  %v844_v3 = vld [vmem:[%s1048_s1 + $0x80] sm:$0xff] (!%p140_p2)   ;;  %v847_v6 = vld [vmem:[%s1048_s1 + $0x88] sm:$0xff] (!%p140_p2)   ;;  %v849_v8 = vld [vmem:[%s1048_s1 + $0x58] sm:$0xff] (!%p140_p2)  }
   0x8   : > { %758 = vmatprep.subr.bf16.mxu0 (!%p140_p2), %v843_v2  ;;  %808 = vmatprep.subr.bf16.mxu1 (!%p140_p2), %v844_v3  ;;  %v850_v9 = vld [vmem:[%s1048_s1 + $0x90] sm:$0xff] (!%p140_p2)   ;;  %v851_v10 = vld [vmem:[%s1048_s1 + $0x18] sm:$0xff] (!%p140_p2)   ;;  %v852_v11 = vld [vmem:[%s1048_s1 + $0x60] sm:$0xff] (!%p140_p2)  }
   0x9   : > { %809 = vmatpush3.bf16.msra.mxu1 (!%p140_p2), %v844_v3  ;;  %v853_v12 = vld [vmem:[%s1048_s1 + $0x98] sm:$0xff] (!%p140_p2)   ;;  %v854_v13 = vld [vmem:[%s1048_s1 + $0x20] sm:$0xff] (!%p140_p2)   ;;  %v855_v15 = vld [vmem:[%s1048_s1 + $0x68] sm:$0xff] (!%p140_p2)  }
   0xa   : > { %810 = vmatprep.subr.bf16.mxu1 (!%p140_p2), %v847_v6  ;;  %v856_v14 = vld [vmem:[%s1048_s1 + $0xa0] sm:$0xff] (!%p140_p2)   ;;  %v857_v16 = vld [vmem:[%s1048_s1 + $0x28] sm:$0xff] (!%p140_p2)   ;;  %v858_v18 = vld [vmem:[%s1048_s1 + $0x70] sm:$0xff] (!%p140_p2)  }
   0xb   : > { %759 = vmatpush3.bf16.msra.mxu0 (!%p140_p2), %v845_v4  ;;  %v859_v17 = vld [vmem:[%s1048_s1 + $0xa8] sm:$0xff] (!%p140_p2)   ;;  %v860_v19 = vld [vmem:[%s1048_s1 + $0x30] sm:$0xff] (!%p140_p2)   ;;  %v861_v20 = vld [vmem:[%s1048_s1 + $0x78] sm:$0xff] (!%p140_p2)  }
   0xc   : > { %760 = vmatprep.subr.bf16.mxu0 (!%p140_p2), %v846_v5  ;;  %v862_v21 = vld [vmem:[%s1048_s1 + $0xb0] sm:$0xff] (!%p140_p2)   ;;  %v863_v23 = vld [vmem:[%s1048_s1 + $0x38] sm:$0xff] (!%p140_p2)   ;;  %v1012_v38 = vld [vmem:[%s1049_s2] ss:$0 sm:$0xff] (!%p140_p2) }
   0xd   : > { %811 = vmatpush3.bf16.msra.mxu1 %v847_v6  ;;  %s1052_s28 = smov (!%p165_p3, %s697_s28), 15  ;;  %v867_v25 = vld [vmem:[%s1048_s1 + $0xb8] sm:$0xff]  }
   0xe   : > { %812 = vmatprep.subr.bf16.mxu1 %v850_v9  ;;  %s832_s21 = smul.u32 12, %s1052_s28  ;;  %s700_s18 = sshll.u32 %s1052_s28, 2 }
   0xf   : > { %761 = vmatpush3.bf16.msra.mxu0 %v848_v7 }
  0x10   : > { %762 = vmatprep.subr.bf16.mxu0 %v849_v8  ;;  %s983_s6 = scalar_lea.vmem %s1047_s0, %s832_s21  ;;  %s1020_s21 = scalar_lea.vmem %s1050_s3, %s700_s18 }
  0x11   : > { %813 = vmatpush3.bf16.msra.mxu1 %v850_v9  ;;  %v866_v22 = vld [vmem:[%s983_s6 + $0x4] ss:$12 sps:$4 sm:$0xff]   ;;  %v868_v24 = vld [vmem:[%s983_s6 + $0x8] ss:$12 sps:$4 sm:$0xff]   ;;  %v864_v26 = vld [vmem:[%s983_s6] ss:$12 sps:$4 sm:$0xff]  }
  0x12   : > { %814 = vmatprep.subr.bf16.mxu1 %v853_v12  ;;  %489 = vmatprep.mubr.bf16.mxu0 %v866_v22  ;;  %v870_v27 = vld [vmem:[%s983_s6 + $0x1c] ss:$12 sps:$4 sm:$0xff]   ;;  %v869_v28 = vld [vmem:[%s983_s6 + $0x20] ss:$12 sps:$4 sm:$0xff]   ;;  %v876_v29 = vld [vmem:[%s983_s6 + $0x38] ss:$12 sps:$4 sm:$0xff]  }
  0x13   : > { %763 = vmatpush3.bf16.msra.mxu0 %v851_v10  ;;  %824 = vmatprep.mubr.bf16.mxu1 %v868_v24  ;;  %v872_v30 = vld [vmem:[%s983_s6 + $0x18] ss:$12 sps:$4 sm:$0xff]   ;;  %v873_v31 = vld [vmem:[%s983_s6 + $0x34] ss:$12 sps:$4 sm:$0xff]   ;;  %v877_v32 = vld [vmem:[%s983_s6 + $0x50] ss:$12 sps:$4 sm:$0xff]  }
  0x14   : > { %764 = vmatprep.subr.bf16.mxu0 %v852_v11  ;;  %v875_v33 = vld [vmem:[%s983_s6 + $0x30] ss:$12 sps:$4 sm:$0xff]   ;;  %v878_v34 = vld [vmem:[%s983_s6 + $0x4c] ss:$12 sps:$4 sm:$0xff]   ;;  %v880_v35 = vld [vmem:[%s983_s6 + $0x48] ss:$12 sps:$4 sm:$0xff]  }
  0x15   : > { %815 = vmatpush3.bf16.msra.mxu1 %v853_v12 }
  0x16   : > { %816 = vmatprep.subr.bf16.mxu1 %v856_v14 }
  0x17   : > { %765 = vmatpush3.bf16.msra.mxu0 %v854_v13 }
  0x18   : > { %766 = vmatprep.subr.bf16.mxu0 %v855_v15 }
  0x19   : > { %817 = vmatpush3.bf16.msra.mxu1 %v856_v14 }
  0x1a   : > { %818 = vmatprep.subr.bf16.mxu1 %v859_v17 }
  0x1b   : > { %767 = vmatpush3.bf16.msra.mxu0 %v857_v16 }
  0x1c   : > { %768 = vmatprep.subr.bf16.mxu0 %v858_v18 }
  0x1d   : > { %819 = vmatpush3.bf16.msra.mxu1 %v859_v17 }
  0x1e   : > { %820 = vmatprep.subr.bf16.mxu1 %v862_v21 }
  0x1f   : > { %769 = vmatpush3.bf16.msra.mxu0 %v860_v19 }
  0x20   : > { %770 = vmatprep.subr.bf16.mxu0 %v861_v20 }
  0x21   : > { %821 = vmatpush3.bf16.msra.mxu1 %v862_v21 }
  0x22   : > { %822 = vmatprep.subr.bf16.mxu1 %v867_v25 }
  0x23   : > { %771 = vmatpush3.bf16.msra.mxu0 %v863_v23 }
  0x25   : > { %823 = vmatpush3.bf16.msra.mxu1 %v867_v25 }
  0x26   : > { %490 = vmatmul.mubr.bf16.vlgmr.msra.gmra.mrb[0].mxu0 %v864_v26 }
  0x27   : > { %497 = vmatprep.mubr.bf16.mxu0 %v870_v27 }
  0x28   : > { %825 = vmatmul.mubr.bf16.vlgmr.msra.gmra.mrb[0].mxu1 %v869_v28 }
  0x29   : > { %828 = vmatprep.mubr.bf16.mxu1 %v876_v29 }
  0x2e   : > { %498 = vmatmul.mubr.bf16.gmra.mrb[4].mxu0 %v872_v30 }
  0x2f   : > { %505 = vmatprep.mubr.bf16.mxu0 %v873_v31 }
  0x30   : > { %829 = vmatmul.mubr.bf16.gmra.mrb[4].mxu1 %v877_v32 }
  0x36   : > { %506 = vmatmul.mubr.bf16.gmra.mrb[8].mxu0 %v875_v33 }
  0x37   : > { %513 = vmatprep.mubr.bf16.mxu0 %v878_v34 }
  0x3e   : > { %514 = vmatmul.mubr.bf16.gmra.mrb[12].mxu0 %v880_v35 }
  0xf9   : > { %v772_v36 = vpop.f32.mrb[0].mxu0 }
  0xfa   : > { %v773_v37 = vpop.f32.mrb[1].mxu0 }
  0xfb   : > { %v774_v39 = vadd.f32 %v773_v37, %v772_v36  ;;  %v775_v40 = vpop.f32.mrb[2].mxu0  ;;  %v826_v42 = vpop.f32.mrb[0].mxu1 }
  0xfc   : > { %v776_v41 = vpop.f32.mrb[3].mxu0  ;;  %v556_v45 = vpop.f32.mrb[1].mxu1 }
  0xfd   : > { %v777_v43 = vadd.f32 %v776_v41, %v775_v40  ;;  %v492_v44 = vadd.f32 %v774_v39, %v1012_v38  ;;  %v827_v46 = vpop.f32.mrb[2].mxu1 }
  0xfe   : > { %v559_v49 = vpop.f32.mrb[3].mxu1 }
  0xff   : > { %v557_v47 = vadd.f32 %v556_v45, %v492_v44  ;;  %v495_v48 = vadd.f32 %v777_v43, %v1012_v38 }
 0x101   : > { %v587_v50 = vmax.f32 %v557_v47, 0.0  ;;  %v560_v51 = vadd.f32 %v559_v49, %v495_v48  ;;  %v778_v52 = vpop.f32.mrb[4].mxu0 }
 0x102   : > { %v779_v53 = vpop.f32.mrb[5].mxu0 }
 0x103   : > { %v748_v54 = vpack.c.bf16 %v587_v50, %v587_v50  ;;  %v588_v55 = vmax.f32 %v560_v51, 0.0  ;;  %v780_v56 = vadd.f32 %v779_v53, %v778_v52  ;;  %v781_v57 = vpop.f32.mrb[6].mxu0  ;;  %v830_v59 = vpop.f32.mrb[4].mxu1 }
 0x104   : > { %v782_v58 = vpop.f32.mrb[7].mxu0  ;;  %v572_v63 = vpop.f32.mrb[5].mxu1 }
 0x105   : > { %628 = vst.msk [vmem:[%s1020_s21] sm:$0xf] %vm627_vm0, %v748_v54  ;;  %v749_v60 = vpack.c.bf16 %v588_v55, %v588_v55  ;;  %v500_v61 = vadd.f32 %v780_v56, %v1012_v38  ;;  %v783_v62 = vadd.f32 %v782_v58, %v781_v57  ;;  %v831_v0 = vpop.f32.mrb[6].mxu1 }
 0x106   : > { %v575_v3 = vpop.f32.mrb[7].mxu1 }
 0x107   : > { %629 = vst.msk [vmem:[%s1020_s21 + $0x4] sm:$0xf] %vm627_vm0, %v749_v60  ;;  %v565_v1 = vadd.f32 %v826_v42, %v500_v61  ;;  %v503_v2 = vadd.f32 %v783_v62, %v1012_v38 }
 0x109   : > { %v589_v4 = vmax.f32 %v565_v1, 0.0  ;;  %v568_v5 = vadd.f32 %v827_v46, %v503_v2  ;;  %v784_v6 = vpop.f32.mrb[8].mxu0 }
 0x10a   : > { %v785_v7 = vpop.f32.mrb[9].mxu0 }
 0x10b   : > { %v750_v8 = vpack.c.bf16 %v589_v4, %v589_v4  ;;  %v590_v9 = vmax.f32 %v568_v5, 0.0  ;;  %v786_v10 = vadd.f32 %v785_v7, %v784_v6  ;;  %v787_v11 = vpop.f32.mrb[10].mxu0 }
 0x10c   : > { %v788_v12 = vpop.f32.mrb[11].mxu0 }
 0x10d   : > { %630 = vst.msk [vmem:[%s1020_s21 + $0x8] sm:$0xf] %vm627_vm0, %v750_v8  ;;  %v751_v13 = vpack.c.bf16 %v590_v9, %v590_v9  ;;  %v789_v14 = vadd.f32 %v788_v12, %v787_v11  ;;  %v508_v15 = vadd.f32 %v786_v10, %v1012_v38 }
 0x10f   : > { %631 = vst.msk [vmem:[%s1020_s21 + $0xc] sm:$0xf] %vm627_vm0, %v751_v13  ;;  %v573_v16 = vadd.f32 %v572_v63, %v508_v15  ;;  %v511_v17 = vadd.f32 %v789_v14, %v1012_v38 }
 0x111   : > { %v591_v18 = vmax.f32 %v573_v16, 0.0  ;;  %v576_v19 = vadd.f32 %v575_v3, %v511_v17  ;;  %v790_v20 = vpop.f32.mrb[12].mxu0 }
 0x112   : > { %v791_v21 = vpop.f32.mrb[13].mxu0 }
 0x113   : > { %v752_v22 = vpack.c.bf16 %v591_v18, %v591_v18  ;;  %v592_v23 = vmax.f32 %v576_v19, 0.0  ;;  %v792_v24 = vadd.f32 %v791_v21, %v790_v20  ;;  %v793_v25 = vpop.f32.mrb[14].mxu0 }
 0x114   : > { %v794_v26 = vpop.f32.mrb[15].mxu0 }
 0x115   : > { %632 = vst.msk [vmem:[%s1020_s21 + $0x10] sm:$0xf] %vm627_vm0, %v752_v22  ;;  %v753_v27 = vpack.c.bf16 %v592_v23, %v592_v23  ;;  %v516_v28 = vadd.f32 %v792_v24, %v1012_v38  ;;  %v795_v29 = vadd.f32 %v794_v26, %v793_v25 }
 0x117   : > { %633 = vst.msk [vmem:[%s1020_s21 + $0x14] sm:$0xf] %vm627_vm0, %v753_v27  ;;  %v581_v30 = vadd.f32 %v830_v59, %v516_v28  ;;  %v519_v31 = vadd.f32 %v795_v29, %v1012_v38 }
 0x119   : > { %v593_v32 = vmax.f32 %v581_v30, 0.0  ;;  %v584_v33 = vadd.f32 %v831_v0, %v519_v31 }
 0x11b   : > { %v754_v34 = vpack.c.bf16 %v593_v32, %v593_v32  ;;  %v594_v35 = vmax.f32 %v584_v33, 0.0 }
 0x11d   : > { %634 = vst.msk [vmem:[%s1020_s21 + $0x18] sm:$0xf] %vm627_vm0, %v754_v34  ;;  %v755_v36 = vpack.c.bf16 %v594_v35, %v594_v35 }
 0x11f   : > { %635 = vst.msk [vmem:[%s1020_s21 + $0x1c] sm:$0xf] %vm627_vm0, %v755_v36 }
 0x120 PF: > { %s13_s12 = sadd.s32 1, %s887_s12  }
 0x121   : > { %p10_p4 = scmp.ge.s32.totalorder %s13_s12, 4  }
 0x123   :  { %12 = sbr.rel (!%p10_p4) target bundleno = 1 (0x1), region = 62 }

// kernel: posenet_forward.7
= control target key start
LH: loop header
LB: loop body
LE: loop exit
PB: predicated region body
PF: predicated region fallthrough
CT: control target
= control target key end

     0   :  { %s7370_s0 = inlined_call_operand.vmem [shape: bf16[2,64,64], index: 0, kind: input, shape index: {}]   ;;  %s7371_s1 = inlined_call_operand.vmem [shape: bf16[3,3,64,128], index: 1, kind: input, shape index: {}]   ;;  %s7372_s2 = inlined_call_operand.vmem [shape: f32[1,128], index: 2, kind: input, shape index: {}]   ;;  %s7373_s3 = inlined_call_operand.vmem [shape: bf16[3,3,128,256], index: 3, kind: input, shape index: {}]   ;;  %s7374_s4 = inlined_call_operand.vmem [shape: f32[1,256], index: 4, kind: input, shape index: {}]   ;;  %s7375_s5 = inlined_call_operand.vmem [shape: bf16[3,3,256,256], index: 5, kind: input, shape index: {}]   ;;  %s7376_s6 = inlined_call_operand.vmem [shape: f32[1,256], index: 6, kind: input, shape index: {}]   ;;  %s7377_s7 = inlined_call_operand.vmem [shape: bf16[3,3,256,256], index: 7, kind: input, shape index: {}]   ;;  %s7378_s8 = inlined_call_operand.vmem [shape: f32[1,256], index: 8, kind: input, shape index: {}]   ;;  %s7379_s9 = inlined_call_operand.vmem [shape: bf16[3,3,256,6], index: 9, kind: input, shape index: {}]   ;;  %s7380_s10 = inlined_call_operand.vmem [shape: f32[1,6], index: 10, kind: input, shape index: {}]   ;;  %s7381_s11 = inlined_call_operand.hbm [shape: f32[2,1,6], index: 11, kind: output, shape index: {}]  }
   0x1   :  { %7382 = sst [smem:[#allocation5_spill]] %s7370_s0 }
   0x2   :  { %7383 = sst [smem:[#allocation6_spill]] %s7371_s1 }
   0x3   :  { %16 = vsyncpa [#allocation3], 0 }
   0x4   :  { %18 = vsyncpa [#allocation3 + $0x1], 0  ;;  %s5775_s17 = smov 0   ;;  %s5777_s18 = smov 0  }
   0x5   :  { %s5779_s19 = smov 0   ;;  %s5781_s20 = smov 0  }
   0x6 LB: > { %s5796_s21 = sadd.s32 4294967295, %s5709_s20   ;;  %s4138_s22 = sadd.s32 4294967294, %s5709_s20   ;;  %s5709_s20 = sphi %s5781_s20, %s7393_s20   ;;  %s5705_s19 = sphi %s5779_s19, %s7392_s19   ;;  %s5701_s18 = sphi %s5777_s18, %s7391_s18   ;;  %s5697_s17 = sphi %s5775_s17, %s7390_s17  }
   0x7   : > { %s5800_s23 = sadd.s32 1, %s5709_s20   ;;  %s267_s24 = sadd.s32 1, %s5705_s19 }
   0x8   : > { %s264_s25 = ssub.s32 %s5709_s20, %s5800_s23  ;;  %p277_p0 = scmp.ne.s32.totalorder %s5705_s19, %s5701_s18 }
   0x9   : > { %p265_p1 = scmp.eq.s32.totalorder %s264_s25, 0  ;;  %p278_p2 = scmp.eq.s32.totalorder %s5796_s21, 1 }
   0xa   : > { %p283_p3 = scmp.ne.s32.totalorder %s5701_s18, %s5697_s17  ;;  %p284_p4 = scmp.eq.s32.totalorder %s4138_s22, 1 }
   0xb   : > { %s5811_s26 = scalar_select %p265_p1, %s5705_s19, %s267_s24  }
   0xc   : > { %p5813_p5 = por %p278_p2, %p277_p0  ;;  %p5817_p6 = por %p284_p4, %p283_p3 }
   0xd   : > { %p4141_p7 = scmp.ge.s32.totalorder %s5709_s20, 1  ;;  %p340_p8 = scmp.lt.s32.totalorder %s5709_s20, 3 }
   0xf   : > { %p341_p9 = pnand %p4141_p7, %p340_p8 }
  0x10   : > { %s7386_s1 = sld [smem:[#allocation6_spill]] (!%p341_p9)  ;;  %v5711_v1 = vmov (!%p341_p9), 0.0   ;;  %vm5712_vm0 = vmmov (!%p341_p9), 0   ;;  %p379_p10 = scmp.lt.s32.totalorder (!%p341_p9), %s5796_s21, 1  ;;  %vm420_vm1 = vcmask (!%p341_p9), 1044480   ;;  %vm422_vm2 = vcmask (!%p341_p9), 1045504  }
  0x11   : > { %344 = sbr.rel (%p341_p9) target bundleno = 1423 (0x58f), region = 64  ;;  %4989 = vmatprep.subr.bf16.mxu0 (!%p341_p9), %v5711_v1  ;;  %5001 = vmatprep.subr.bf16.mxu1 (!%p341_p9), %v5711_v1  ;;  %s7387_s0 = sld [smem:[#allocation5_spill]] (!%p341_p9)  ;;  %vm424_vm3 = vcmask (!%p341_p9), 1046528   ;;  %vm426_vm4 = vcmask (!%p341_p9), 1040384   ;;  %vm428_vm5 = vcmask (!%p341_p9), 1041408   ;;  %vm430_vm6 = vcmask (!%p341_p9), 1042432  }
  0x12   : > { %4997 = vmatprep.mubr.msk.bf16.mxu0 (!%p341_p9), %vm5712_vm0, %v5711_v1  ;;  %5009 = vmatprep.mubr.msk.bf16.mxu1 (!%p341_p9), %vm5712_vm0, %v5711_v1  ;;  %vm432_vm7 = vcmask (!%p341_p9), 1043456   ;;  %vm497_vm8 = vcmask (!%p341_p9), 523264   ;;  %vm6357_vm9 = vmneg (!%p341_p9), %vm430_vm6  ;;  %s377_s22 = sand.u32 (!%p341_p9), 1, %s5701_s18   ;;  %s4899_s29 = sshll.u32 (!%p341_p9), %s5796_s21, 4  ;;  %vm4068_vm11 = vcmask (!%p341_p9), 40960  }
  0x13   : > { %vm4304_vm10 = vmpackc.low (!%p341_p9), %vm6357_vm9, %vm6357_vm9  ;;  %s7328_s13 = scalar_lea.hbm (!%p341_p9), %s7381_s11, %s4899_s29  ;;  %s4071_s14 = scalar_lea.sflag (!%p341_p9), [#allocation3], %s377_s22 }
  0x16   : > { %v5139_v0 = vld [vmem:[%s7386_s1 + $0x20] sm:$0xff] (!%p341_p9)   ;;  %v5141_v3 = vld [vmem:[%s7386_s1 + $0x28] sm:$0xff] (!%p341_p9)   ;;  %v5143_v5 = vld [vmem:[%s7386_s1 + $0x30] sm:$0xff] (!%p341_p9)  }
  0x17   : > { %v5140_v2 = vld [vmem:[%s7386_s1] sm:$0xff] (!%p341_p9)   ;;  %4990 = vmatpush3.bf16.msra.mxu0 (!%p341_p9), %v5139_v0  ;;  %v5142_v4 = vld [vmem:[%s7386_s1 + $0x8] sm:$0xff] (!%p341_p9)   ;;  %v5144_v6 = vld [vmem:[%s7386_s1 + $0x10] sm:$0xff] (!%p341_p9)  }
  0x18   : > { %5002 = vmatpush3.bf16.msra.mxu1 %v5140_v2  ;;  %4991 = vmatprep.subr.bf16.mxu0 %v5711_v1  ;;  %s380_s24 = scalar_select %p379_p10, %s5796_s21, 1  ;;  %v5145_v7 = vld [vmem:[%s7386_s1 + $0x38] sm:$0xff]   ;;  %v5147_v51 = vld [vmem:[%s7386_s1 + $0x40] sm:$0xff]   ;;  %v5149_v2 = vld [vmem:[%s7386_s1 + $0x48] sm:$0xff]  }
  0x19   : > { %5003 = vmatprep.subr.bf16.mxu1 %v5711_v1  ;;  %v5146_v11 = vld [vmem:[%s7386_s1 + $0x18] sm:$0xff]   ;;  %v5148_v60 = vld [vmem:[%s7386_s1 + $0x60] sm:$0xff]   ;;  %s5714_s21 = smov [#allocation2]  }
  0x1a   : > { %s4902_s30 = sshll.u32 %s380_s24, 5 }
  0x1b   : > { %4992 = vmatpush3.bf16.msra.mxu0 %v5141_v3  ;;  %s5855_s16 = scalar_lea.vmem %s7387_s0, %s4902_s30  ;;  %v5150_v3 = vld [vmem:[%s7386_s1 + $0x68] sm:$0xff]   ;;  %s378_s30 = scalar_lea.vmem [#allocation2], %s377_s22 }
  0x1c   : > { %5004 = vmatpush3.bf16.msra.mxu1 %v5142_v4  ;;  %4993 = vmatprep.subr.bf16.mxu0 %v5711_v1  ;;  %v4904_v8 = vld [vmem:[%s5855_s16] sm:$0xff]   ;;  %v4919_v9 = vld [vmem:[%s5855_s16 + $0x8] sm:$0xff]   ;;  %v4920_v10 = vld [vmem:[%s5855_s16 + $0x10] sm:$0xff]   ;;  %s4083_s12 = sshll.u32 %s378_s30, 4  ;;  %s7330_s12 = int_to_ptr.vmem [resolvable:$true] %s4083_s12 }
  0x1d   : > { %5005 = vmatprep.subr.bf16.mxu1 %v5711_v1  ;;  %v5867_v12 = vunpack.c.h.bf16 %v4904_v8  ;;  %v5869_v13 = vunpack.c.h.bf16 %v4919_v9  ;;  %v5871_v14 = vunpack.c.h.bf16 %v4920_v10  ;;  %v5873_v15 = vunpack.c.l.bf16 %v4904_v8  ;;  %v5938_v57 = vld [vmem:[%s5855_s16 + $0x18] sm:$0xff]   ;;  %s5647_s15 = scalar_lea.vmem %s7330_s12, 16  ;;  %s5651_s16 = sshll.u32 %s5714_s21, 4  ;;  %s5652_s16 = int_to_ptr.vmem [resolvable:$false] %s5651_s16 }
  0x1e   : > { %v5887_v22 = vunpack.c.l.bf16 %v4919_v9  ;;  %v5889_v23 = vunpack.c.l.bf16 %v4920_v10  ;;  %v5946_v62 = vunpack.c.l.bf16 %v5938_v57  ;;  %p5648_p11 = scmp.ne.s32.totalorder %s7330_s12, %s5647_s15  ;;  %s5653_s24 = scalar_lea.vmem %s5652_s16, 32 }
  0x1f   : > { %4994 = vmatpush3.bf16.msra.mxu0 %v5143_v5  ;;  %v5877_v16 = vrot.slane %v5867_v12, 4  ;;  %v404_v17 = vrot.slane %v5867_v12, 5  ;;  %v406_v18 = vrot.slane %v5867_v12, 6  ;;  %v409_v19 = vrot.slane %v5869_v13, 1  ;;  %p5654_p0 = scmp.lt.s32.totalorder %s7330_s12, %s5652_s16  ;;  %p5655_p1 = scmp.lt.s32.totalorder %s5653_s24, %s5647_s15 }
  0x20   : > { %5006 = vmatpush3.bf16.msra.mxu1 %v5144_v6  ;;  %4995 = vmatprep.subr.bf16.mxu0 %v5711_v1  ;;  %v411_v20 = vrot.slane %v5869_v13, 2  ;;  %v5885_v21 = vrot.slane %v5871_v14, 4  ;;  %v416_v24 = vrot.slane %v5871_v14, 5  ;;  %v446_v25 = vrot.slane %v5867_v12, 7  ;;  %p5649_p12 = pnand %p5648_p11, %p5813_p5 }
  0x21   : > { %5007 = vmatprep.subr.bf16.mxu1 %v5711_v1  ;;  %v448_v26 = vrot.slane %v5869_v13, 3  ;;  %v452_v27 = vsel %vm432_vm7, 0.0, %v5877_v16  ;;  %v456_v29 = vsel %vm426_vm4, %v5869_v13, %v409_v19  ;;  %v421_v30 = vsel %vm420_vm1, 0.0, %v5877_v16  ;;  %p5656_p2 = por %p5655_p1, %p5654_p0 }
  0x22   : > { %v453_v28 = vsel %vm420_vm1, %v452_v27, %v404_v17  ;;  %v427_v31 = vsel %vm426_vm4, 0.0, %v5869_v13  ;;  %v418_v32 = vrot.slane %v5871_v14, 6  ;;  %v457_v34 = vsel %vm428_vm5, %v456_v29, %v411_v20  ;;  %p5650_p13 = pneg %p5649_p12 }
  0x23   : > { %4996 = vmatpush3.bf16.msra.mxu0 %v5145_v7  ;;  %v454_v33 = vsel %vm422_vm2, %v453_v28, %v406_v18  ;;  %v5908_v35 = vrot.slane %v5869_v13, 4  ;;  %v450_v36 = vrot.slane %v5871_v14, 7  ;;  %v458_v37 = vsel %vm430_vm6, %v457_v34, %v448_v26 }
  0x24   : > { %5008 = vmatpush3.bf16.msra.mxu1 %v5146_v11  ;;  %5013 = vmatprep.subr.bf16.mxu0 %v5711_v1  ;;  %v423_v38 = vsel %vm422_vm2, %v421_v30, %v404_v17  ;;  %v429_v39 = vsel %vm428_vm5, %v427_v31, %v409_v19  ;;  %v459_v40 = vsel %vm432_vm7, %v458_v37, %v5885_v21  ;;  %v612_v42 = vsel %vm432_vm7, 0.0, %v404_v17  ;;  %v5152_v31 = vld [vmem:[%s7386_s1 + $0x70] sm:$0xff]   ;;  %p5657_p3 = pnand %p5656_p2, %p5650_p13 }
  0x25   : > { %5025 = vmatprep.subr.bf16.mxu1 %v5711_v1  ;;  %v431_v41 = vsel %vm430_vm6, %v429_v39, %v411_v20  ;;  %v616_v43 = vsel %vm426_vm4, %v409_v19, %v411_v20  ;;  %v455_v44 = vsel %vm424_vm3, %v454_v33, %v446_v25  ;;  %v460_v45 = vsel %vm420_vm1, %v459_v40, %v416_v24 }
  0x26   : > { %v433_v46 = vsel %vm432_vm7, %v431_v41, 0.0  ;;  %v617_v47 = vsel %vm428_vm5, %v616_v43, %v448_v26  ;;  %v461_v48 = vsel %vm422_vm2, %v460_v45, %v418_v32  ;;  %v425_v49 = vsel %vm424_vm3, %v423_v38, %v406_v18  ;;  %v5151_v26 = vld [vmem:[%s7386_s1 + $0x50] sm:$0xff]  }
  0x27   : > { %v434_v50 = vsel %vm420_vm1, %v433_v46, %v5885_v21  ;;  %v618_v52 = vsel %vm430_vm6, %v617_v47, %v5908_v35  ;;  %v462_v53 = vsel %vm424_vm3, %v461_v48, %v450_v36  ;;  %v613_v55 = vsel %vm420_vm1, %v612_v42, %v406_v18  ;;  %v5153_v48 = vld [vmem:[%s7386_s1 + $0x58] sm:$0xff]  }
  0x28   : > { %v435_v54 = vsel %vm422_vm2, %v434_v50, %v416_v24  ;;  %v619_v56 = vsel %vm432_vm7, %v618_v52, %v416_v24  ;;  %v463_v58 = vpack.c.bf16 %v462_v53, %v455_v44  ;;  %v704_v0 = vrot.slane %v5873_v15, 1  ;;  %v5154_v52 = vld [vmem:[%s7386_s1 + $0x78] sm:$0xff]  }
  0x29   : > { %v436_v59 = vsel %vm424_vm3, %v435_v54, %v418_v32  ;;  %v620_v61 = vsel %vm420_vm1, %v619_v56, %v418_v32  ;;  %v614_v4 = vsel %vm422_vm2, %v613_v55, %v446_v25  ;;  %v706_v6 = vrot.slane %v5873_v15, 2 }
  0x2a   : > { %v437_v63 = vpack.c.bf16 %v436_v59, %v425_v49  ;;  %4998 = vmatmul.mubr.msk.bf16.vlgmr.msra.gmra.mrb[0].mxu0 %vm497_vm8, %v463_v58  ;;  %v621_v5 = vsel %vm422_vm2, %v620_v61, %v450_v36  ;;  %v709_v7 = vrot.slane %v5887_v22, 4  ;;  %v5962_v8 = vrot.slane %v5887_v22, 5 }
  0x2b   : > { %5014 = vmatpush3.bf16.msra.mxu0 %v5147_v51  ;;  %v716_v9 = vrot.slane %v5889_v23, 1  ;;  %v718_v10 = vrot.slane %v5889_v23, 2  ;;  %v721_v11 = vrot.slane %v5946_v62, 4  ;;  %v5969_v17 = vrot.slane %v5946_v62, 5  ;;  %5021 = vmatprep.mubr.msk.bf16.mxu0 %vm5712_vm0, %v5711_v1 }
  0x2c   : > { %5010 = vmatmul.mubr.msk.bf16.vlgmr.msra.gmra.mrb[0].mxu1 %vm497_vm8, %v437_v63  ;;  %5015 = vmatprep.subr.bf16.mxu0 %v5711_v1  ;;  %v727_v18 = vsel %vm426_vm4, 0.0, %v5873_v15  ;;  %v734_v19 = vsel %vm426_vm4, 0.0, %v5889_v23  ;;  %v829_v25 = vsel %vm426_vm4, %v5873_v15, %v704_v0  ;;  %v821_v29 = vrot.slane %v5873_v15, 3 }
  0x2d   : > { %5026 = vmatpush3.bf16.msra.mxu1 %v5148_v60  ;;  %v728_v20 = vsel %vm428_vm5, %v727_v18, %v704_v0  ;;  %v735_v24 = vsel %vm428_vm5, %v734_v19, %v716_v9  ;;  %5033 = vmatprep.mubr.msk.bf16.mxu1 %vm5712_vm0, %v5711_v1  ;;  %v830_v30 = vsel %vm428_vm5, %v829_v25, %v706_v6  ;;  %v713_v32 = vrot.slane %v5887_v22, 6  ;;  %v5157_v18 = vld [vmem:[%s7386_s1 + $0x88] sm:$0xff]   ;;  %v5159_v25 = vld [vmem:[%s7386_s1 + $0x90] sm:$0xff]  }
  0x2e   : > { %5027 = vmatprep.subr.bf16.mxu1 %v5711_v1  ;;  %v729_v27 = vsel %vm430_vm6, %v728_v20, %v706_v6  ;;  %v736_v28 = vsel %vm430_vm6, %v735_v24, %v718_v10  ;;  %v836_v36 = vsel %vm426_vm4, %v5889_v23, %v716_v9  ;;  %v725_v37 = vrot.slane %v5946_v62, 6 }
  0x2f   : > { %5016 = vmatpush3.bf16.msra.mxu0 %v5149_v2  ;;  %v730_v33 = vsel %vm432_vm7, %v729_v27, 0.0  ;;  %v737_v34 = vsel %vm432_vm7, %v736_v28, 0.0  ;;  %v825_v40 = vrot.slane %v5889_v23, 3  ;;  %v831_v43 = vsel %vm430_vm6, %v830_v30, %v821_v29 }
  0x30   : > { %5017 = vmatprep.subr.bf16.mxu0 %v5711_v1  ;;  %v731_v38 = vsel %vm420_vm1, %v730_v33, %v709_v7  ;;  %v738_v39 = vsel %vm420_vm1, %v737_v34, %v721_v11  ;;  %v837_v44 = vsel %vm428_vm5, %v836_v36, %v718_v10  ;;  %v615_v45 = vsel %vm424_vm3, %v614_v4, %v5867_v12 }
  0x31   : > { %5028 = vmatpush3.bf16.msra.mxu1 %v5150_v3  ;;  %v732_v41 = vsel %vm422_vm2, %v731_v38, %v5962_v8  ;;  %v739_v42 = vsel %vm422_vm2, %v738_v39, %v5969_v17  ;;  %v622_v46 = vsel %vm424_vm3, %v621_v5, %v5871_v14  ;;  %v838_v47 = vsel %vm430_vm6, %v837_v44, %v825_v40  ;;  %v5156_v5 = vld [vmem:[%s7386_s1 + $0xa0] sm:$0xff]   ;;  %v5162_v44 = vld [vmem:[%s7386_s1 + $0xb8] sm:$0xff]  }
  0x32   : > { %5029 = vmatprep.subr.bf16.mxu1 %v5711_v1  ;;  %v832_v49 = vsel %vm432_vm7, %v831_v43, %v709_v7  ;;  %v839_v50 = vsel %vm432_vm7, %v838_v47, %v721_v11  ;;  %v923_v51 = vrot.slane %v5873_v15, 4  ;;  %v733_v53 = vsel %vm424_vm3, %v732_v41, %v713_v32 }
  0x33   : > { %5018 = vmatpush3.bf16.msra.mxu0 %v5151_v26  ;;  %v740_v54 = vsel %vm424_vm3, %v739_v42, %v725_v37  ;;  %v925_v55 = vrot.slane %v5889_v23, 4  ;;  %v927_v56 = vsel %vm426_vm4, %v704_v0, %v706_v6  ;;  %v623_v58 = vpack.c.bf16 %v622_v46, %v615_v45  ;;  %v5155_v23 = vld [vmem:[%s7386_s1 + $0x80] sm:$0xff]  }
  0x34   : > { %5019 = vmatprep.subr.bf16.mxu0 %v5711_v1  ;;  %v928_v15 = vsel %vm428_vm5, %v927_v56, %v821_v29  ;;  %v934_v59 = vsel %vm426_vm4, %v716_v9, %v718_v10  ;;  %v833_v60 = vsel %vm420_vm1, %v832_v49, %v5962_v8  ;;  %v840_v61 = vsel %vm420_vm1, %v839_v50, %v5969_v17  ;;  %v5160_v29 = vld [vmem:[%s7386_s1 + $0xb0] sm:$0xff]  }
  0x35   : > { %5030 = vmatpush3.bf16.msra.mxu1 %v5152_v31  ;;  %v929_v63 = vsel %vm430_vm6, %v928_v15, %v923_v51  ;;  %v935_v2 = vsel %vm428_vm5, %v934_v59, %v825_v40  ;;  %v741_v0 = vpack.c.bf16 %v740_v54, %v733_v53  ;;  %v823_v6 = vrot.slane %v5887_v22, 7  ;;  %v5161_v40 = vld [vmem:[%s7386_s1 + $0x98] sm:$0xff]   ;;  %v5164_v59 = vld [vmem:[%s7386_s1 + $0xe0] sm:$0xff]  }
  0x36   : > { %5031 = vmatprep.subr.bf16.mxu1 %v5711_v1  ;;  %v930_v3 = vsel %vm432_vm7, %v929_v63, %v5962_v8  ;;  %v936_v4 = vsel %vm430_vm6, %v935_v2, %v925_v55  ;;  %v827_v7 = vrot.slane %v5946_v62, 7  ;;  %v834_v8 = vsel %vm422_vm2, %v833_v60, %v713_v32 }
  0x37   : > { %5020 = vmatpush3.bf16.msra.mxu0 %v5153_v48  ;;  %v937_v9 = vsel %vm432_vm7, %v936_v4, %v5969_v17  ;;  %v841_v10 = vsel %vm422_vm2, %v840_v61, %v725_v37  ;;  %v931_v11 = vsel %vm420_vm1, %v930_v3, %v713_v32  ;;  %v5158_v17 = vld [vmem:[%s7386_s1 + $0xa8] sm:$0xff]   ;;  %v6068_v20 = vsel %vm424_vm3, %v834_v8, %v823_v6 }
  0x38   : > { %5037 = vmatprep.subr.bf16.mxu0 %v5711_v1  ;;  %v938_v19 = vsel %vm420_vm1, %v937_v9, %v725_v37  ;;  %v6071_v24 = vsel %vm424_vm3, %v841_v10, %v827_v7  ;;  %v932_v26 = vsel %vm422_vm2, %v931_v11, %v823_v6  ;;  %v6081_v27 = vunpack.c.h.bf16 %v5938_v57  ;;  %v5165_v6 = vld [vmem:[%s7386_s1 + $0xc8] sm:$0xff]  }
  0x39   : > { %5032 = vmatpush3.bf16.msra.mxu1 %v5154_v52  ;;  %v1021_v28 = vrot.slane %v5867_v12, 1  ;;  %v939_v30 = vsel %vm422_vm2, %v938_v19, %v827_v7  ;;  %v1029_v31 = vrot.slane %v5871_v14, 1  ;;  %v843_v32 = vpack.c.bf16 %v6071_v24, %v6068_v20  ;;  %v5166_v9 = vld [vmem:[%s7386_s1 + $0xe8] sm:$0xff]   ;;  %v5167_v19 = vld [vmem:[%s7386_s1 + $0xd0] sm:$0xff]  }
  0x3a   : > { %5049 = vmatprep.subr.bf16.mxu1 %v5711_v1  ;;  %5022 = vmatmul.mubr.msk.bf16.vlgmr.msra.gmra.mrb[4].mxu0 %vm497_vm8, %v623_v58  ;;  %v1023_v57 = vrot.slane %v5867_v12, 2  ;;  %v6095_v33 = vrot.slane %v5869_v13, 5  ;;  %v1040_v34 = vsel %vm426_vm4, 0.0, %v5867_v12  ;;  %v933_v36 = vsel %vm424_vm3, %v932_v26, %v5887_v22 }
  0x3b   : > { %5038 = vmatpush3.bf16.msra.mxu0 %v5155_v23  ;;  %5045 = vmatprep.mubr.msk.bf16.mxu0 %vm5712_vm0, %v5711_v1  ;;  %v6103_v37 = vrot.slane %v5869_v13, 6  ;;  %v1031_v38 = vrot.slane %v5871_v14, 2  ;;  %v1047_v39 = vsel %vm426_vm4, 0.0, %v5871_v14  ;;  %v940_v41 = vsel %vm424_vm3, %v939_v30, %v5946_v62 }
  0x3c   : > { %5034 = vmatmul.mubr.msk.bf16.vlgmr.msra.gmra.mrb[4].mxu1 %vm497_vm8, %v741_v0  ;;  %5039 = vmatprep.subr.bf16.mxu0 %v5711_v1  ;;  %v1034_v42 = vrot.slane %v6081_v27, 4  ;;  %v1134_v22 = vrot.slane %v5867_v12, 3  ;;  %v1142_v43 = vsel %vm426_vm4, %v5867_v12, %v1021_v28  ;;  %v6122_v45 = vrot.slane %v6081_v27, 5 }
  0x3d   : > { %5050 = vmatpush3.bf16.msra.mxu1 %v5156_v5  ;;  %5057 = vmatprep.mubr.msk.bf16.mxu1 %vm5712_vm0, %v5711_v1  ;;  %v1041_v46 = vsel %vm428_vm5, %v1040_v34, %v1021_v28  ;;  %v1149_v47 = vsel %vm426_vm4, %v5871_v14, %v1029_v31  ;;  %v1236_v62 = vsel %vm426_vm4, %v1021_v28, %v1023_v57  ;;  %v1138_v49 = vrot.slane %v5871_v14, 3  ;;  %v5163_v14 = vld [vmem:[%s7386_s1 + $0xc0] sm:$0xff]  }
  0x3e   : > { %5051 = vmatprep.subr.bf16.mxu1 %v5711_v1  ;;  %v1048_v48 = vsel %vm428_vm5, %v1047_v39, %v1029_v31  ;;  %v1237_v12 = vsel %vm428_vm5, %v1236_v62, %v1134_v22  ;;  %v1243_v50 = vsel %vm426_vm4, %v1029_v31, %v1031_v38  ;;  %v941_v51 = vpack.c.bf16 %v940_v41, %v933_v36  ;;  %v5173_v41 = vld [vmem:[%s7386_s1 + $0x110] sm:$0xff]  }
  0x3f   : > { %5040 = vmatpush3.bf16.msra.mxu0 %v5157_v18  ;;  %v1038_v52 = vrot.slane %v6081_v27, 6  ;;  %v1143_v53 = vsel %vm428_vm5, %v1142_v43, %v1023_v57  ;;  %v1238_v54 = vsel %vm430_vm6, %v1237_v12, %v5877_v16  ;;  %v1136_v55 = vrot.slane %v5869_v13, 7  ;;  %v5177_v43 = vld [vmem:[%s7373_s3 + $0x4] ss:$8 sps:$4 sm:$0xff]   ;;  %v5184_v62 = vld [vmem:[%s7373_s3 + $0x90] ss:$8 sps:$4 sm:$0xff]  }
  0x40   : > { %5041 = vmatprep.subr.bf16.mxu0 %v5711_v1  ;;  %v1150_v56 = vsel %vm428_vm5, %v1149_v47, %v1031_v38  ;;  %v1239_v58 = vsel %vm432_vm7, %v1238_v54, %v6095_v33  ;;  %v1244_v15 = vsel %vm428_vm5, %v1243_v50, %v1138_v49  ;;  %v1042_v16 = vsel %vm430_vm6, %v1041_v46, %v1023_v57  ;;  %v5183_v46 = vld [vmem:[%s7373_s3 + $0x14] ss:$8 sps:$4 sm:$0xff]   ;;  %v5192_v12 = vld [vmem:[%s7373_s3 + $0xa4] ss:$8 sps:$4 sm:$0xff]   ;;  %v5190_v50 = vld [vmem:[%s7373_s3 + $0xa0] ss:$8 sps:$4 sm:$0xff]  }
  0x41   : > { %5052 = vmatpush3.bf16.msra.mxu1 %v5158_v17  ;;  %v1049_v60 = vsel %vm430_vm6, %v1048_v48, %v1031_v38  ;;  %v1240_v61 = vsel %vm420_vm1, %v1239_v58, %v6103_v37  ;;  %v1245_v63 = vsel %vm430_vm6, %v1244_v15, %v5885_v21  ;;  %v1140_v2 = vrot.slane %v6081_v27, 7  ;;  %v5171_v38 = vld [vmem:[%s7386_s1 + $0x100] sm:$0xff]   ;;  %v5186_v47 = vld [vmem:[%s7373_s3 + $0x94] ss:$8 sps:$4 sm:$0xff]  }
  0x42   : > { %5053 = vmatprep.subr.bf16.mxu1 %v5711_v1  ;;  %v1144_v23 = vsel %vm430_vm6, %v1143_v53, %v1134_v22  ;;  %v1241_v0 = vsel %vm422_vm2, %v1240_v61, %v1136_v55  ;;  %v1246_v3 = vsel %vm432_vm7, %v1245_v63, %v6122_v45  ;;  %v1151_v4 = vsel %vm430_vm6, %v1150_v56, %v1138_v49  ;;  %v5175_v22 = vld [vmem:[%s7373_s3] ss:$8 sps:$4 sm:$0xff]   ;;  %v5189_v48 = vld [vmem:[%s7373_s3 + $0x24] ss:$8 sps:$4 sm:$0xff]   ;;  %v5196_v53 = vld [vmem:[%s7373_s3 + $0xb0] ss:$8 sps:$4 sm:$0xff]  }
  0x43   : > { %5042 = vmatpush3.bf16.msra.mxu0 %v5159_v25  ;;  %v6164_v5 = vsel %vm424_vm3, %v1241_v0, %v5869_v13  ;;  %v1247_v21 = vsel %vm420_vm1, %v1246_v3, %v1038_v52  ;;  %v1043_v8 = vsel %vm432_vm7, %v1042_v16, 0.0  ;;  %v1050_v13 = vsel %vm432_vm7, %v1049_v60, 0.0  ;;  %v5168_v25 = vld [vmem:[%s7386_s1 + $0xf0] sm:$0xff]   ;;  %v5187_v49 = vld [vmem:[%s7373_s3 + $0x20] ss:$8 sps:$4 sm:$0xff]  }
  0x44   : > { %5043 = vmatprep.subr.bf16.mxu0 %v5711_v1  ;;  %v1248_v7 = vsel %vm422_vm2, %v1247_v21, %v1140_v2  ;;  %v1145_v11 = vsel %vm432_vm7, %v1144_v23, %v5908_v35  ;;  %v1152_v18 = vsel %vm432_vm7, %v1151_v4, %v1034_v42  ;;  %v1044_v20 = vsel %vm420_vm1, %v1043_v8, %v5908_v35  ;;  %v5198_v54 = vld [vmem:[%s7373_s3 + $0xb4] ss:$8 sps:$4 sm:$0xff]   ;;  %v5204_v56 = vld [vmem:[%s7373_s3 + $0xc4] ss:$8 sps:$4 sm:$0xff]   ;;  %v5202_v15 = vld [vmem:[%s7373_s3 + $0xc0] ss:$8 sps:$4 sm:$0xff]  }
  0x45   : > { %5054 = vmatpush3.bf16.msra.mxu1 %v5160_v29  ;;  %v1249_v10 = vsel %vm424_vm3, %v1248_v7, %v6081_v27  ;;  %v1051_v24 = vsel %vm420_vm1, %v1050_v13, %v1034_v42  ;;  %v1146_v26 = vsel %vm420_vm1, %v1145_v11, %v6095_v33  ;;  %v1153_v27 = vsel %vm420_vm1, %v1152_v18, %v6122_v45  ;;  %v5169_v29 = vld [vmem:[%s7386_s1 + $0xd8] sm:$0xff]   ;;  %v5213_v61 = vld [vmem:[%s7373_s3 + $0x64] ss:$8 sps:$4 sm:$0xff]   ;;  %v5211_v63 = vld [vmem:[%s7373_s3 + $0x60] ss:$8 sps:$4 sm:$0xff]  }
  0x46   : > { %5055 = vmatprep.subr.bf16.mxu1 %v5711_v1  ;;  %v1250_v17 = vpack.c.bf16 %v1249_v10, %v6164_v5  ;;  %v1045_v35 = vsel %vm422_vm2, %v1044_v20, %v6095_v33  ;;  %v1052_v28 = vsel %vm422_vm2, %v1051_v24, %v6122_v45  ;;  %v1147_v30 = vsel %vm422_vm2, %v1146_v26, %v6103_v37  ;;  %v5174_v42 = vld [vmem:[%s7386_s1 + $0x118] sm:$0xff]   ;;  %v5180_v45 = vld [vmem:[%s7373_s3 + $0x84] ss:$8 sps:$4 sm:$0xff]   ;;  %v5214_v23 = vld [vmem:[%s7373_s3 + $0xe0] ss:$8 sps:$4 sm:$0xff]  }
  0x47   : > { %5044 = vmatpush3.bf16.msra.mxu0 %v5161_v40  ;;  %v1154_v31 = vsel %vm422_vm2, %v1153_v27, %v1038_v52  ;;  %v1046_v57 = vsel %vm424_vm3, %v1045_v35, %v6103_v37  ;;  %v1053_v33 = vsel %vm424_vm3, %v1052_v28, %v1038_v52  ;;  %v1148_v34 = vsel %vm424_vm3, %v1147_v30, %v1136_v55  ;;  %v5172_v37 = vld [vmem:[%s7386_s1 + $0x108] sm:$0xff]   ;;  %v5193_v52 = vld [vmem:[%s7373_s3 + $0x30] ss:$8 sps:$4 sm:$0xff]   ;;  %v5207_v58 = vld [vmem:[%s7373_s3 + $0x54] ss:$8 sps:$4 sm:$0xff]  }
  0x48   : > { %5061 = vmatprep.subr.bf16.mxu0 %v5711_v1  ;;  %v1155_v36 = vsel %vm424_vm3, %v1154_v31, %v1140_v2  ;;  %v1054_v39 = vpack.c.bf16 %v1053_v33, %v1046_v57  ;;  %v5199_v55 = vld [vmem:[%s7373_s3 + $0x40] ss:$8 sps:$4 sm:$0xff]   ;;  %v5210_v16 = vld [vmem:[%s7373_s3 + $0xd4] ss:$8 sps:$4 sm:$0xff]   ;;  %v5208_v60 = vld [vmem:[%s7373_s3 + $0xd0] ss:$8 sps:$4 sm:$0xff]  }
  0x49   : > { %5056 = vmatpush3.bf16.msra.mxu1 %v5162_v44  ;;  %v1156_v40 = vpack.c.bf16 %v1155_v36, %v1148_v34  ;;  %v5178_v44 = vld [vmem:[%s7373_s3 + $0x80] ss:$8 sps:$4 sm:$0xff]   ;;  %v5216_v2 = vld [vmem:[%s7373_s3 + $0xe4] ss:$8 sps:$4 sm:$0xff]   ;;  %v5219_v0 = vld [vmem:[%s7373_s3 + $0x74] ss:$8 sps:$4 sm:$0xff]  }
  0x4a   : > { %5073 = vmatprep.subr.bf16.mxu1 %v5711_v1  ;;  %5046 = vmatmul.mubr.msk.bf16.vlgmr.msra.gmra.mrb[8].mxu0 %vm497_vm8, %v843_v32  ;;  %v5170_v32 = vld [vmem:[%s7386_s1 + $0xf8] sm:$0xff]   ;;  %v5713_v21 = vmov 0   ;;  %v5228_v7 = vld [vmem:[%s7373_s3 + $0x104] ss:$8 sps:$4 sm:$0xff]  }
  0x4b   : > { %5062 = vmatpush3.bf16.msra.mxu0 %v5163_v14  ;;  %5069 = vmatprep.mubr.msk.bf16.mxu0 %vm5712_vm0, %v5711_v1  ;;  %v5201_v14 = vld [vmem:[%s7373_s3 + $0x44] ss:$8 sps:$4 sm:$0xff]   ;;  %v5217_v3 = vld [vmem:[%s7373_s3 + $0x70] ss:$8 sps:$4 sm:$0xff]   ;;  %v5222_v4 = vld [vmem:[%s7373_s3 + $0xf4] ss:$8 sps:$4 sm:$0xff]  }
  0x4c   : > { %5058 = vmatmul.mubr.msk.bf16.vlgmr.msra.gmra.mrb[8].mxu1 %vm497_vm8, %v941_v51  ;;  %5063 = vmatprep.subr.bf16.mxu0 %v5711_v1  ;;  %v5195_v51 = vld [vmem:[%s7373_s3 + $0x34] ss:$8 sps:$4 sm:$0xff]   ;;  %v5220_v5 = vld [vmem:[%s7373_s3 + $0xf0] ss:$8 sps:$4 sm:$0xff]  }
  0x4d   : > { %5074 = vmatpush3.bf16.msra.mxu1 %v5164_v59  ;;  %5081 = vmatprep.mubr.msk.bf16.mxu1 %vm5712_vm0, %v5711_v1  ;;  %v5205_v59 = vld [vmem:[%s7373_s3 + $0x50] ss:$8 sps:$4 sm:$0xff]  }
  0x4e   : > { %5075 = vmatprep.subr.bf16.mxu1 %v5711_v1 }
  0x4f   : > { %5064 = vmatpush3.bf16.msra.mxu0 %v5165_v6  ;;  %v5225_v6 = vld [vmem:[%s7373_s3 + $0x184] ss:$8 sps:$4 sm:$0xff]  }
  0x50   : > { %5065 = vmatprep.subr.bf16.mxu0 %v5711_v1 }
  0x51   : > { %5076 = vmatpush3.bf16.msra.mxu1 %v5166_v9 }
  0x52   : > { %5077 = vmatprep.subr.bf16.mxu1 %v5711_v1 }
  0x53   : > { %5066 = vmatpush3.bf16.msra.mxu0 %v5167_v19 }
  0x54   : > { %5067 = vmatprep.subr.bf16.mxu0 %v5711_v1 }
  0x55   : > { %5078 = vmatpush3.bf16.msra.mxu1 %v5168_v25 }
  0x56   : > { %5079 = vmatprep.subr.bf16.mxu1 %v5711_v1 }
  0x57   : > { %5068 = vmatpush3.bf16.msra.mxu0 %v5169_v29 }
  0x58   : > { %5085 = vmatprep.subr.bf16.mxu0 %v5711_v1 }
  0x59   : > { %5080 = vmatpush3.bf16.msra.mxu1 %v5170_v32 }
  0x5a   : > { %5070 = vmatmul.mubr.msk.bf16.vlgmr.msra.gmra.mrb[12].mxu0 %vm497_vm8, %v1054_v39  ;;  %1464 = vmatprep.subr.bf16.mxu1 %v5180_v45 }
  0x5b   : > { %5086 = vmatpush3.bf16.msra.mxu0 %v5171_v38  ;;  %5093 = vmatprep.mubr.msk.bf16.mxu0 %vm5712_vm0, %v5711_v1 }
  0x5c   : > { %5082 = vmatmul.mubr.msk.bf16.vlgmr.msra.gmra.mrb[12].mxu1 %vm497_vm8, %v1156_v40  ;;  %5087 = vmatprep.subr.bf16.mxu0 %v5711_v1 }
  0x5d   : > { %1465 = vmatpush1.bf16.msra.mxu1 %v5178_v44  ;;  %1496 = vmatprep.mubr.bf16.mxu1 %v5713_v21 }
  0x5e   : > { %1466 = vmatprep.subr.bf16.mxu1 %v5186_v47 }
  0x5f   : > { %5088 = vmatpush3.bf16.msra.mxu0 %v5172_v37 }
  0x60   : > { %5089 = vmatprep.subr.bf16.mxu0 %v5711_v1 }
  0x61   : > { %1467 = vmatpush1.bf16.msra.mxu1 %v5184_v62 }
  0x62   : > { %1468 = vmatprep.subr.bf16.mxu1 %v5192_v12 }
  0x63   : > { %5090 = vmatpush3.bf16.msra.mxu0 %v5173_v41 }
  0x64   : > { %5091 = vmatprep.subr.bf16.mxu0 %v5711_v1  ;;  %v5181_v1 = vld [vmem:[%s7373_s3 + $0x10] ss:$8 sps:$4 sm:$0xff]  }
  0x65   : > { %1469 = vmatpush1.bf16.msra.mxu1 %v5190_v50 }
  0x66   : > { %1470 = vmatprep.subr.bf16.mxu1 %v5198_v54 }
  0x67   : > { %5092 = vmatpush3.bf16.msra.mxu0 %v5174_v42 }
  0x68   : > { %1585 = vmatprep.subr.bf16.mxu0 %v5177_v43 }
  0x69   : > { %1471 = vmatpush1.bf16.msra.mxu1 %v5196_v53 }
  0x6a   : > { %5094 = vmatmul.mubr.msk.bf16.vlgmr.msra.gmra.mrb[16].mxu0 %vm497_vm8, %v1250_v17  ;;  %1472 = vmatprep.subr.bf16.mxu1 %v5204_v56  ;;  %v4253_v56 = vld [vmem:[%s7372_s2] ss:$0 sm:$0xff] }
  0x6b   : > { %1586 = vmatpush1.bf16.msra.mxu0 %v5175_v22  ;;  %1617 = vmatprep.mubr.bf16.mxu0 %v5713_v21 }
  0x6c   : > { %1587 = vmatprep.subr.bf16.mxu0 %v5183_v46 }
  0x6d   : > { %1473 = vmatpush1.bf16.msra.mxu1 %v5202_v15 }
  0x6e   : > { %1474 = vmatprep.subr.bf16.mxu1 %v5210_v16 }
  0x6f   : > { %1588 = vmatpush1.bf16.msra.mxu0 %v5181_v1 }
  0x70   : > { %1589 = vmatprep.subr.bf16.mxu0 %v5189_v48 }
  0x71   : > { %1475 = vmatpush1.bf16.msra.mxu1 %v5208_v60 }
  0x72   : > { %1476 = vmatprep.subr.bf16.mxu1 %v5216_v2 }
  0x73   : > { %1590 = vmatpush1.bf16.msra.mxu0 %v5187_v49 }
  0x74   : > { %1591 = vmatprep.subr.bf16.mxu0 %v5195_v51 }
  0x75   : > { %1477 = vmatpush1.bf16.msra.mxu1 %v5214_v23  ;;  %v5270_v23 = vld [vmem:[%s7373_s3 + $0x174] ss:$8 sps:$4 sm:$0xff]  }
  0x76   : > { %1478 = vmatprep.subr.bf16.mxu1 %v5222_v4 }
  0x77   : > { %1592 = vmatpush1.bf16.msra.mxu0 %v5193_v52 }
  0x78   : > { %1593 = vmatprep.subr.bf16.mxu0 %v5201_v14 }
  0x79   : > { %1479 = vmatpush1.bf16.msra.mxu1 %v5220_v5 }
  0x7a   : > { %1728 = vmatprep.subr.bf16.mxu1 %v5228_v7 }
  0x7b   : > { %1594 = vmatpush1.bf16.msra.mxu0 %v5199_v55 }
  0x7c   : > { %1595 = vmatprep.subr.bf16.mxu0 %v5207_v58 }
  0x7f   : > { %1596 = vmatpush1.bf16.msra.mxu0 %v5205_v59 }
  0x80   : > { %1597 = vmatprep.subr.bf16.mxu0 %v5213_v61 }
  0x83   : > { %1598 = vmatpush1.bf16.msra.mxu0 %v5211_v63 }
  0x84   : > { %1599 = vmatprep.subr.bf16.mxu0 %v5219_v0 }
  0x87   : > { %1600 = vmatpush1.bf16.msra.mxu0 %v5217_v3 }
  0x88   : > { %1875 = vmatprep.subr.bf16.mxu0 %v5225_v6  ;;  %v5223_v6 = vld [vmem:[%s7373_s3 + $0x180] ss:$8 sps:$4 sm:$0xff]  }
  0xfd   : > { %v535_v9 = vpop.f32.mrb[0].mxu0 }
  0xfe   : > { %v4999_v13 = vpop.f32.mrb[1].mxu0 }
  0xff   : > { %v603_v8 = vpop.f32.mrb[0].mxu1  ;;  %v538_v18 = vpop.f32.mrb[2].mxu0 }
 0x100   : > { %v604_v10 = vadd.f32 %v603_v8, %v535_v9  ;;  %v5011_v11 = vpop.f32.mrb[1].mxu1  ;;  %v5000_v19 = vpop.f32.mrb[3].mxu0 }
 0x101   : > { %v606_v17 = vpop.f32.mrb[2].mxu1 }
 0x102   : > { %v607_v20 = vadd.f32 %v606_v17, %v538_v18  ;;  %v5012_v24 = vpop.f32.mrb[3].mxu1  ;;  %v5226_v17 = vld [vmem:[%s7373_s3 + $0x100] ss:$8 sps:$4 sm:$0xff]  }
 0x10d   : > { %v694_v25 = vpop.f32.mrb[4].mxu0 }
 0x10e   : > { %v701_v26 = vadd.f32 %v694_v25, %v604_v10  ;;  %v5023_v27 = vpop.f32.mrb[5].mxu0  ;;  %v5231_v10 = vld [vmem:[%s7373_s3 + $0x194] ss:$8 sps:$4 sm:$0xff]  }
 0x10f   : > { %v812_v35 = vpop.f32.mrb[4].mxu1  ;;  %v697_v28 = vpop.f32.mrb[6].mxu0  ;;  %v5234_v27 = vld [vmem:[%s7373_s3 + $0x114] ss:$8 sps:$4 sm:$0xff]  }
 0x110   : > { %v5035_v29 = vpop.f32.mrb[5].mxu1  ;;  %v702_v30 = vadd.f32 %v697_v28, %v607_v20  ;;  %v819_v31 = vadd.f32 %v812_v35, %v701_v26  ;;  %v5024_v32 = vpop.f32.mrb[7].mxu0 }
 0x111   : > { %v815_v57 = vpop.f32.mrb[6].mxu1  ;;  %v5229_v29 = vld [vmem:[%s7373_s3 + $0x190] ss:$8 sps:$4 sm:$0xff]  }
 0x112   : > { %v5036_v33 = vpop.f32.mrb[7].mxu1  ;;  %v820_v34 = vadd.f32 %v815_v57, %v702_v30  ;;  %v5237_v57 = vld [vmem:[%s7373_s3 + $0x1a4] ss:$8 sps:$4 sm:$0xff]  }
 0x11d   : > { %v914_v36 = vpop.f32.mrb[8].mxu0 }
 0x11e   : > { %v921_v38 = vadd.f32 %v914_v36, %v819_v31  ;;  %v5047_v39 = vpop.f32.mrb[9].mxu0 }
 0x11f   : > { %v1012_v40 = vpop.f32.mrb[8].mxu1  ;;  %v917_v37 = vpop.f32.mrb[10].mxu0  ;;  %v5232_v39 = vld [vmem:[%s7373_s3 + $0x110] ss:$8 sps:$4 sm:$0xff]  }
 0x120   : > { %v5059_v41 = vpop.f32.mrb[9].mxu1  ;;  %v922_v42 = vadd.f32 %v917_v37, %v820_v34  ;;  %v1019_v22 = vadd.f32 %v1012_v40, %v921_v38  ;;  %v5048_v43 = vpop.f32.mrb[11].mxu0 }
 0x121   : > { %v1015_v44 = vpop.f32.mrb[10].mxu1  ;;  %v5240_v41 = vld [vmem:[%s7373_s3 + $0x124] ss:$8 sps:$4 sm:$0xff]  }
 0x122   : > { %v5060_v45 = vpop.f32.mrb[11].mxu1  ;;  %v1020_v1 = vadd.f32 %v1015_v44, %v922_v42 }
 0x123   : > { %v5235_v45 = vld [vmem:[%s7373_s3 + $0x1a0] ss:$8 sps:$4 sm:$0xff]  }
 0x12d   : > { %v1125_v46 = vpop.f32.mrb[12].mxu0 }
 0x12e   : > { %v1132_v47 = vadd.f32 %v1125_v46, %v1019_v22  ;;  %v5071_v62 = vpop.f32.mrb[13].mxu0  ;;  %v5243_v46 = vld [vmem:[%s7373_s3 + $0x1b4] ss:$8 sps:$4 sm:$0xff]  }
 0x12f   : > { %v1227_v48 = vpop.f32.mrb[12].mxu1  ;;  %v1128_v49 = vpop.f32.mrb[14].mxu0  ;;  %v5238_v62 = vld [vmem:[%s7373_s3 + $0x120] ss:$8 sps:$4 sm:$0xff]  }
 0x130   : > { %v5083_v12 = vpop.f32.mrb[13].mxu1  ;;  %v1133_v50 = vadd.f32 %v1128_v49, %v1020_v1  ;;  %v1234_v51 = vadd.f32 %v1227_v48, %v1132_v47  ;;  %v5072_v52 = vpop.f32.mrb[15].mxu0  ;;  %v5246_v49 = vld [vmem:[%s7373_s3 + $0x134] ss:$8 sps:$4 sm:$0xff]  }
 0x131   : > { %v1230_v53 = vpop.f32.mrb[14].mxu1  ;;  %v5244_v52 = vld [vmem:[%s7373_s3 + $0x130] ss:$8 sps:$4 sm:$0xff]  }
 0x132   : > { %v5084_v54 = vpop.f32.mrb[15].mxu1  ;;  %v1235_v14 = vadd.f32 %v1230_v53, %v1133_v50  ;;  %v5241_v50 = vld [vmem:[%s7373_s3 + $0x1b0] ss:$8 sps:$4 sm:$0xff]   ;;  %v5252_v53 = vld [vmem:[%s7373_s3 + $0x144] ss:$8 sps:$4 sm:$0xff]  }
 0x133   : > { %v5247_v54 = vld [vmem:[%s7373_s3 + $0x1c0] ss:$8 sps:$4 sm:$0xff]  }
 0x13d   : > { %v1321_v55 = vpop.f32.mrb[16].mxu0 }
 0x13e   : > { %v1328_v58 = vadd.f32 %v1321_v55, %v1234_v51  ;;  %v5095_v15 = vpop.f32.mrb[17].mxu0  ;;  %v5249_v51 = vld [vmem:[%s7373_s3 + $0x1c4] ss:$8 sps:$4 sm:$0xff]   ;;  %v5250_v55 = vld [vmem:[%s7373_s3 + $0x140] ss:$8 sps:$4 sm:$0xff]  }
 0x13f   : > { %v1324_v59 = vpop.f32.mrb[18].mxu0  ;;  %v5261_v15 = vld [vmem:[%s7373_s3 + $0x1e4] ss:$8 sps:$4 sm:$0xff]  }
 0x140   : > { %v1337_v16 = vadd.f32 %v4253_v56, %v1328_v58  ;;  %v1329_v60 = vadd.f32 %v1324_v59, %v1235_v14  ;;  %v5096_v61 = vpop.f32.mrb[19].mxu0  ;;  %v5255_v14 = vld [vmem:[%s7373_s3 + $0x1d4] ss:$8 sps:$4 sm:$0xff]   ;;  %v5253_v58 = vld [vmem:[%s7373_s3 + $0x1d0] ss:$8 sps:$4 sm:$0xff]  }
 0x141   : > { %v5256_v59 = vld [vmem:[%s7373_s3 + $0x150] ss:$8 sps:$4 sm:$0xff]   ;;  %v5267_v61 = vld [vmem:[%s7373_s3 + $0x1f4] ss:$8 sps:$4 sm:$0xff]  }
 0x142   : > { %v6354_v63 = vmax.f32 %v1337_v16, 0.0  ;;  %v1338_v2 = vadd.f32 %v4253_v56, %v1329_v60  ;;  %v5258_v56 = vld [vmem:[%s7373_s3 + $0x154] ss:$8 sps:$4 sm:$0xff]   ;;  %v5264_v16 = vld [vmem:[%s7373_s3 + $0x164] ss:$8 sps:$4 sm:$0xff]  }
 0x143   : > { %v5259_v60 = vld [vmem:[%s7373_s3 + $0x1e0] ss:$8 sps:$4 sm:$0xff]  }
 0x144   : > { %v1340_v0 = vmax.f32 %v1338_v2, 0.0  ;;  %v1342_v3 = vrot.slane %v6354_v63, 2  ;;  %v1362_v4 = vrot.slane %v6354_v63, 3  ;;  %v1774_v5 = vsel %vm426_vm4, 0.0, %v6354_v63  ;;  %v5262_v2 = vld [vmem:[%s7373_s3 + $0x160] ss:$8 sps:$4 sm:$0xff]  }
 0x145   : > { %v6372_v7 = vrot.slane %v6354_v63, 4  ;;  %v1918_v9 = vrot.slane %v6354_v63, 1  ;;  %v2356_v18 = vrot.slane %v6354_v63, 5  ;;  %v1775_v20 = vsel %vm428_vm5, %v1774_v5, 0.0 }
 0x146   : > { %v4305_v8 = vpack.c.bf16 %v1342_v3, %v1342_v3  ;;  %v1364_v13 = vsel %vm428_vm5, 0.0, %v1342_v3  ;;  %v1772_v11 = vrot.slane %v1340_v0, 6  ;;  %v1920_v24 = vrot.slane %v1340_v0, 7 }
 0x147   : > { %v1365_v19 = vsel %vm430_vm6, %v1364_v13, %v1362_v4  ;;  %v2066_v25 = vsel %vm426_vm4, %v1918_v9, %v1342_v3  ;;  %v1922_v28 = vsel %vm426_vm4, %v6354_v63, %v1918_v9  ;;  %v2210_v32 = vrot.slane %v1340_v0, 2  ;;  %v5273_v3 = vld [vmem:[%s7373_s3 + $0x284] ss:$8 sps:$4 sm:$0xff]   ;;  %v5279_v13 = vld [vmem:[%s7373_s3 + $0x294] ss:$8 sps:$4 sm:$0xff]  }
 0x148   : > { %4306 = vmatmul.mubr.msk.bf16.vlgmr.msra.gmra.mrb[20].mxu0 %vm4304_vm10, %v4305_v8  ;;  %v1366_v26 = vpack.c.bf16 %v1365_v19, %v1365_v19  ;;  %v6392_v35 = vsel %vm430_vm6, %v1775_v20, %v1772_v11  ;;  %v2067_v30 = vsel %vm428_vm5, %v2066_v25, %v1920_v24  ;;  %v1923_v31 = vsel %vm428_vm5, %v1922_v28, %v1772_v11  ;;  %v5276_v9 = vld [vmem:[%s7373_s3 + $0x204] ss:$8 sps:$4 sm:$0xff]   ;;  %v5271_v8 = vld [vmem:[%s7373_s3 + $0x280] ss:$8 sps:$4 sm:$0xff]   ;;  %v5280_v19 = vld [vmem:[%s7373_s3 + $0x210] ss:$8 sps:$4 sm:$0xff]  }
 0x149   : > { %1876 = vmatpush1.bf16.msra.mxu0 %v5223_v6  ;;  %1907 = vmatprep.mubr.bf16.mxu0 %v5713_v21  ;;  %v6406_v33 = vsel %vm430_vm6, %v2067_v30, %v1340_v0  ;;  %v6409_v34 = vsel %vm430_vm6, %v1923_v31, %v1920_v24  ;;  %v2358_v36 = vrot.slane %v1340_v0, 3  ;;  %v2360_v38 = vsel %vm426_vm4, %v6372_v7, %v2356_v18  ;;  %v5268_v6 = vld [vmem:[%s7373_s3 + $0x170] ss:$8 sps:$4 sm:$0xff]   ;;  %v5288_v20 = vld [vmem:[%s7373_s3 + $0x224] ss:$8 sps:$4 sm:$0xff]  }
 0x14a   : > { %1497 = vmatmul.mubr.bf16.vlgmr.msra.gmra.mrb[16].mxu1 %v1366_v26  ;;  %1877 = vmatprep.subr.bf16.mxu0 %v5231_v10  ;;  %v2361_v40 = vsel %vm428_vm5, %v2360_v38, %v2210_v32  ;;  %v2212_v37 = vsel %vm426_vm4, 0.0, %v6372_v7  ;;  %v2504_v43 = vrot.slane %v6354_v63, 6  ;;  %v2506_v44 = vrot.slane %v1340_v0, 4  ;;  %v5265_v0 = vld [vmem:[%s7373_s3 + $0x1f0] ss:$8 sps:$4 sm:$0xff]  }
 0x14b   : > { %1729 = vmatpush1.bf16.msra.mxu1 %v5226_v17  ;;  %1760 = vmatprep.mubr.bf16.mxu1 %v5713_v21  ;;  %v6424_v42 = vsel %vm430_vm6, %v2361_v40, %v2358_v36  ;;  %v2213_v22 = vsel %vm428_vm5, %v2212_v37, 0.0  ;;  %v1628_v5 = vsel %vm428_vm5, 0.0, %v1362_v4  ;;  %v1777_v4 = vpack.c.bf16 %v6392_v35, %v6392_v35  ;;  %v5274_v10 = vld [vmem:[%s7373_s3 + $0x200] ss:$8 sps:$4 sm:$0xff]   ;;  %v5285_v17 = vld [vmem:[%s7373_s3 + $0x2a4] ss:$8 sps:$4 sm:$0xff]  }
 0x14c   : > { %1730 = vmatprep.subr.bf16.mxu1 %v5234_v27  ;;  %v6432_v1 = vsel %vm430_vm6, %v2213_v22, %v2210_v32  ;;  %v2508_v47 = vsel %vm426_vm4, %v2356_v18, %v2504_v43  ;;  %v1629_v63 = vsel %vm430_vm6, %v1628_v5, %v6372_v7  ;;  %v5282_v7 = vld [vmem:[%s7373_s3 + $0x214] ss:$8 sps:$4 sm:$0xff]   ;;  %v5277_v18 = vld [vmem:[%s7373_s3 + $0x290] ss:$8 sps:$4 sm:$0xff]   ;;  %v5283_v24 = vld [vmem:[%s7373_s3 + $0x2a0] ss:$8 sps:$4 sm:$0xff]  }
 0x14d   : > { %1878 = vmatpush1.bf16.msra.mxu0 %v5229_v29  ;;  %v2509_v48 = vsel %vm428_vm5, %v2508_v47, %v2358_v36  ;;  %v1630_v11 = vpack.c.bf16 %v1629_v63, %v1629_v63  ;;  %v5291_v25 = vld [vmem:[%s7373_s3 + $0x2b4] ss:$8 sps:$4 sm:$0xff]   ;;  %v5286_v26 = vld [vmem:[%s7373_s3 + $0x220] ss:$8 sps:$4 sm:$0xff]   ;;  %v5289_v35 = vld [vmem:[%s7373_s3 + $0x2b0] ss:$8 sps:$4 sm:$0xff]  }
 0x14e   : > { %1879 = vmatprep.subr.bf16.mxu0 %v5237_v57  ;;  %v6446_v12 = vsel %vm430_vm6, %v2509_v48, %v2506_v44  ;;  %v5294_v27 = vld [vmem:[%s7373_s3 + $0x234] ss:$8 sps:$4 sm:$0xff]   ;;  %v5297_v28 = vld [vmem:[%s7373_s3 + $0x2c4] ss:$8 sps:$4 sm:$0xff]   ;;  %v5292_v29 = vld [vmem:[%s7373_s3 + $0x230] ss:$8 sps:$4 sm:$0xff]  }
 0x14f   : > { %1731 = vmatpush1.bf16.msra.mxu1 %v5232_v39  ;;  %v5300_v30 = vld [vmem:[%s7373_s3 + $0x244] ss:$8 sps:$4 sm:$0xff]   ;;  %v5295_v31 = vld [vmem:[%s7373_s3 + $0x2c0] ss:$8 sps:$4 sm:$0xff]   ;;  %v5303_v32 = vld [vmem:[%s7373_s3 + $0x2d4] ss:$8 sps:$4 sm:$0xff]  }
 0x150   : > { %1732 = vmatprep.subr.bf16.mxu1 %v5240_v41  ;;  %v5298_v57 = vld [vmem:[%s7373_s3 + $0x240] ss:$8 sps:$4 sm:$0xff]   ;;  %v5306_v36 = vld [vmem:[%s7373_s3 + $0x254] ss:$8 sps:$4 sm:$0xff]   ;;  %v5301_v38 = vld [vmem:[%s7373_s3 + $0x2d0] ss:$8 sps:$4 sm:$0xff]  }
 0x151   : > { %1880 = vmatpush1.bf16.msra.mxu0 %v5235_v45  ;;  %v5309_v39 = vld [vmem:[%s7373_s3 + $0x2e4] ss:$8 sps:$4 sm:$0xff]   ;;  %v5304_v40 = vld [vmem:[%s7373_s3 + $0x250] ss:$8 sps:$4 sm:$0xff]   ;;  %v5307_v41 = vld [vmem:[%s7373_s3 + $0x2e0] ss:$8 sps:$4 sm:$0xff]  }
 0x152   : > { %1881 = vmatprep.subr.bf16.mxu0 %v5243_v46  ;;  %v5312_v37 = vld [vmem:[%s7373_s3 + $0x264] ss:$8 sps:$4 sm:$0xff]   ;;  %v5315_v22 = vld [vmem:[%s7373_s3 + $0x2f4] ss:$8 sps:$4 sm:$0xff]   ;;  %v5310_v43 = vld [vmem:[%s7373_s3 + $0x260] ss:$8 sps:$4 sm:$0xff]  }
 0x153   : > { %1733 = vmatpush1.bf16.msra.mxu1 %v5238_v62  ;;  %v5318_v44 = vld [vmem:[%s7373_s3 + $0x274] ss:$8 sps:$4 sm:$0xff]   ;;  %v5313_v45 = vld [vmem:[%s7373_s3 + $0x2f0] ss:$8 sps:$4 sm:$0xff]   ;;  %v5321_v46 = vld [vmem:[%s7373_s3 + $0x384] ss:$8 sps:$4 sm:$0xff]  }
 0x154   : > { %1734 = vmatprep.subr.bf16.mxu1 %v5246_v49  ;;  %v5316_v47 = vld [vmem:[%s7373_s3 + $0x270] ss:$8 sps:$4 sm:$0xff]   ;;  %v5324_v62 = vld [vmem:[%s7373_s3 + $0x304] ss:$8 sps:$4 sm:$0xff]   ;;  %v5319_v48 = vld [vmem:[%s7373_s3 + $0x380] ss:$8 sps:$4 sm:$0xff]   ;;  %v2069_v49 = vpack.c.bf16 %v6406_v33, %v6406_v33 }
 0x155   : > { %1882 = vmatpush1.bf16.msra.mxu0 %v5241_v50  ;;  %v5327_v50 = vld [vmem:[%s7373_s3 + $0x394] ss:$8 sps:$4 sm:$0xff]   ;;  %v5325_v33 = vld [vmem:[%s7373_s3 + $0x390] ss:$8 sps:$4 sm:$0xff]   ;;  %v5355_v63 = vld [vmem:[%s7373_s3 + $0x3e0] ss:$8 sps:$4 sm:$0xff]  }
 0x156   : > { %1883 = vmatprep.subr.bf16.mxu0 %v5249_v51  ;;  %v5322_v51 = vld [vmem:[%s7373_s3 + $0x300] ss:$8 sps:$4 sm:$0xff]   ;;  %v5349_v5 = vld [vmem:[%s7373_s3 + $0x3d0] ss:$8 sps:$4 sm:$0xff]  }
 0x157   : > { %1735 = vmatpush1.bf16.msra.mxu1 %v5244_v52  ;;  %v1925_v52 = vpack.c.bf16 %v6409_v34, %v6409_v34  ;;  %v5328_v34 = vld [vmem:[%s7373_s3 + $0x310] ss:$8 sps:$4 sm:$0xff]  }
 0x158   : > { %1736 = vmatprep.subr.bf16.mxu1 %v5252_v53  ;;  %v5330_v53 = vld [vmem:[%s7373_s3 + $0x314] ss:$8 sps:$4 sm:$0xff]  }
 0x159   : > { %1884 = vmatpush1.bf16.msra.mxu0 %v5247_v54  ;;  %v5333_v54 = vld [vmem:[%s7373_s3 + $0x3a4] ss:$8 sps:$4 sm:$0xff]  }
 0x15a   : > { %1885 = vmatprep.subr.bf16.mxu0 %v5255_v14  ;;  %v5336_v14 = vld [vmem:[%s7373_s3 + $0x324] ss:$8 sps:$4 sm:$0xff]  }
 0x15b   : > { %1737 = vmatpush1.bf16.msra.mxu1 %v5250_v55  ;;  %v5331_v55 = vld [vmem:[%s7373_s3 + $0x3a0] ss:$8 sps:$4 sm:$0xff]  }
 0x15c   : > { %1738 = vmatprep.subr.bf16.mxu1 %v5258_v56  ;;  %v5339_v56 = vld [vmem:[%s7373_s3 + $0x3b4] ss:$8 sps:$4 sm:$0xff]  }
 0x15d   : > { %1886 = vmatpush1.bf16.msra.mxu0 %v5253_v58  ;;  %v5334_v58 = vld [vmem:[%s7373_s3 + $0x320] ss:$8 sps:$4 sm:$0xff]  }
 0x15e   : > { %1887 = vmatprep.subr.bf16.mxu0 %v5261_v15  ;;  %v5342_v15 = vld [vmem:[%s7373_s3 + $0x334] ss:$8 sps:$4 sm:$0xff]  }
 0x15f   : > { %1739 = vmatpush1.bf16.msra.mxu1 %v5256_v59  ;;  %v5337_v59 = vld [vmem:[%s7373_s3 + $0x3b0] ss:$8 sps:$4 sm:$0xff]  }
 0x160   : > { %1740 = vmatprep.subr.bf16.mxu1 %v5264_v16  ;;  %v5345_v16 = vld [vmem:[%s7373_s3 + $0x3c4] ss:$8 sps:$4 sm:$0xff]  }
 0x161   : > { %1888 = vmatpush1.bf16.msra.mxu0 %v5259_v60  ;;  %v5340_v60 = vld [vmem:[%s7373_s3 + $0x330] ss:$8 sps:$4 sm:$0xff]  }
 0x162   : > { %1889 = vmatprep.subr.bf16.mxu0 %v5267_v61  ;;  %v5348_v61 = vld [vmem:[%s7373_s3 + $0x344] ss:$8 sps:$4 sm:$0xff]  }
 0x163   : > { %1741 = vmatpush1.bf16.msra.mxu1 %v5262_v2  ;;  %v5343_v2 = vld [vmem:[%s7373_s3 + $0x3c0] ss:$8 sps:$4 sm:$0xff]  }
 0x164   : > { %1742 = vmatprep.subr.bf16.mxu1 %v5270_v23  ;;  %v5351_v23 = vld [vmem:[%s7373_s3 + $0x3d4] ss:$8 sps:$4 sm:$0xff]  }
 0x165   : > { %1890 = vmatpush1.bf16.msra.mxu0 %v5265_v0  ;;  %v5346_v0 = vld [vmem:[%s7373_s3 + $0x340] ss:$8 sps:$4 sm:$0xff]  }
 0x166   : > { %2167 = vmatprep.subr.bf16.mxu0 %v5273_v3  ;;  %v5354_v3 = vld [vmem:[%s7373_s3 + $0x354] ss:$8 sps:$4 sm:$0xff]  }
 0x167   : > { %1743 = vmatpush1.bf16.msra.mxu1 %v5268_v6  ;;  %v5357_v6 = vld [vmem:[%s7373_s3 + $0x3e4] ss:$8 sps:$4 sm:$0xff]  }
 0x168   : > { %1908 = vmatmul.mubr.bf16.vlgmr.msra.gmra.mrb[24].mxu0 %v1777_v4  ;;  %2023 = vmatprep.subr.bf16.mxu1 %v5276_v9  ;;  %v5352_v9 = vld [vmem:[%s7373_s3 + $0x350] ss:$8 sps:$4 sm:$0xff]   ;;  %v5363_v4 = vld [vmem:[%s7373_s3 + $0x3f4] ss:$8 sps:$4 sm:$0xff]  }
 0x169   : > { %2168 = vmatpush1.bf16.msra.mxu0 %v5271_v8  ;;  %2199 = vmatprep.mubr.bf16.mxu0 %v5713_v21  ;;  %v5360_v8 = vld [vmem:[%s7373_s3 + $0x364] ss:$8 sps:$4 sm:$0xff]  }
 0x16a   : > { %1761 = vmatmul.mubr.bf16.vlgmr.msra.gmra.mrb[20].mxu1 %v1630_v11  ;;  %2169 = vmatprep.subr.bf16.mxu0 %v5279_v13  ;;  %v5358_v13 = vld [vmem:[%s7373_s3 + $0x360] ss:$8 sps:$4 sm:$0xff]   ;;  %v5361_v11 = vld [vmem:[%s7373_s3 + $0x3f0] ss:$8 sps:$4 sm:$0xff]  }
 0x16b   : > { %2024 = vmatpush1.bf16.msra.mxu1 %v5274_v10  ;;  %2055 = vmatprep.mubr.bf16.mxu1 %v5713_v21  ;;  %v5366_v10 = vld [vmem:[%s7373_s3 + $0x374] ss:$8 sps:$4 sm:$0xff]  }
 0x16c   : > { %2025 = vmatprep.subr.bf16.mxu1 %v5282_v7  ;;  %v5364_v7 = vld [vmem:[%s7373_s3 + $0x370] ss:$8 sps:$4 sm:$0xff]  }
 0x16d   : > { %2170 = vmatpush1.bf16.msra.mxu0 %v5277_v18  ;;  %v5369_v18 = vld [vmem:[%s7373_s3 + $0x404] ss:$8 sps:$4 sm:$0xff]  }
 0x16e   : > { %2171 = vmatprep.subr.bf16.mxu0 %v5285_v17  ;;  %v2363_v17 = vpack.c.bf16 %v6424_v42, %v6424_v42  ;;  %v5370_v42 = vld [vmem:[%s7373_s3 + $0x410] ss:$8 sps:$4 sm:$0xff]  }
 0x16f   : > { %2026 = vmatpush1.bf16.msra.mxu1 %v5280_v19  ;;  %v5367_v19 = vld [vmem:[%s7373_s3 + $0x400] ss:$8 sps:$4 sm:$0xff]  }
 0x170   : > { %2027 = vmatprep.subr.bf16.mxu1 %v5288_v20  ;;  %v2215_v20 = vpack.c.bf16 %v6432_v1, %v6432_v1  ;;  %v5373_v1 = vld [vmem:[%s7373_s3 + $0x420] ss:$8 sps:$4 sm:$0xff]  }
 0x171   : > { %2172 = vmatpush1.bf16.msra.mxu0 %v5283_v24  ;;  %v5372_v24 = vld [vmem:[%s7373_s3 + $0x414] ss:$8 sps:$4 sm:$0xff]  }
 0x172   : > { %2173 = vmatprep.subr.bf16.mxu0 %v5291_v25  ;;  %v5375_v25 = vld [vmem:[%s7373_s3 + $0x424] ss:$8 sps:$4 sm:$0xff]  }
 0x173   : > { %2028 = vmatpush1.bf16.msra.mxu1 %v5286_v26  ;;  %v5378_v26 = vld [vmem:[%s7373_s3 + $0x434] ss:$8 sps:$4 sm:$0xff]  }
 0x174   : > { %2029 = vmatprep.subr.bf16.mxu1 %v5294_v27  ;;  %v5381_v27 = vld [vmem:[%s7373_s3 + $0x444] ss:$8 sps:$4 sm:$0xff]  }
 0x175   : > { %2174 = vmatpush1.bf16.msra.mxu0 %v5289_v35  ;;  %v5379_v35 = vld [vmem:[%s7373_s3 + $0x440] ss:$8 sps:$4 sm:$0xff]  }
 0x176   : > { %2175 = vmatprep.subr.bf16.mxu0 %v5297_v28  ;;  %v5384_v28 = vld [vmem:[%s7373_s3 + $0x454] ss:$8 sps:$4 sm:$0xff]  }
 0x177   : > { %2030 = vmatpush1.bf16.msra.mxu1 %v5292_v29  ;;  %v5382_v29 = vld [vmem:[%s7373_s3 + $0x450] ss:$8 sps:$4 sm:$0xff]  }
 0x178   : > { %2031 = vmatprep.subr.bf16.mxu1 %v5300_v30  ;;  %v5387_v30 = vld [vmem:[%s7373_s3 + $0x464] ss:$8 sps:$4 sm:$0xff]  }
 0x179   : > { %2176 = vmatpush1.bf16.msra.mxu0 %v5295_v31  ;;  %v5385_v31 = vld [vmem:[%s7373_s3 + $0x460] ss:$8 sps:$4 sm:$0xff]  }
 0x17a   : > { %2177 = vmatprep.subr.bf16.mxu0 %v5303_v32  ;;  %v5390_v32 = vld [vmem:[%s7373_s3 + $0x474] ss:$8 sps:$4 sm:$0xff]  }
 0x17b   : > { %2032 = vmatpush1.bf16.msra.mxu1 %v5298_v57  ;;  %v5388_v57 = vld [vmem:[%s7373_s3 + $0x470] ss:$8 sps:$4 sm:$0xff]  }
 0x17c   : > { %2033 = vmatprep.subr.bf16.mxu1 %v5306_v36  ;;  %v2511_v36 = vpack.c.bf16 %v6446_v12, %v6446_v12  ;;  %v5399_v12 = vld [vmem:[%s7375_s5 + $0x414] ss:$8 sps:$4 sm:$0xff]  }
 0x17d   : > { %2178 = vmatpush1.bf16.msra.mxu0 %v5301_v38  ;;  %v5391_v38 = vld [vmem:[%s7375_s5 + $0x400] ss:$8 sps:$4 sm:$0xff]  }
 0x17e   : > { %2179 = vmatprep.subr.bf16.mxu0 %v5309_v39  ;;  %v5393_v39 = vld [vmem:[%s7375_s5 + $0x404] ss:$8 sps:$4 sm:$0xff]  }
 0x17f   : > { %2034 = vmatpush1.bf16.msra.mxu1 %v5304_v40  ;;  %v5394_v40 = vld [vmem:[%s7375_s5 + $0x500] ss:$8 sps:$4 sm:$0xff]  }
 0x180   : > { %2035 = vmatprep.subr.bf16.mxu1 %v5312_v37  ;;  %v5396_v37 = vld [vmem:[%s7375_s5 + $0x504] ss:$8 sps:$4 sm:$0xff]  }
 0x181   : > { %2180 = vmatpush1.bf16.msra.mxu0 %v5307_v41  ;;  %v5402_v41 = vld [vmem:[%s7375_s5 + $0x514] ss:$8 sps:$4 sm:$0xff]  }
 0x182   : > { %2181 = vmatprep.subr.bf16.mxu0 %v5315_v22  ;;  %v5397_v22 = vld [vmem:[%s7375_s5 + $0x410] ss:$8 sps:$4 sm:$0xff]  }
 0x183   : > { %2036 = vmatpush1.bf16.msra.mxu1 %v5310_v43  ;;  %v5400_v43 = vld [vmem:[%s7375_s5 + $0x510] ss:$8 sps:$4 sm:$0xff]  }
 0x184   : > { %2037 = vmatprep.subr.bf16.mxu1 %v5318_v44  ;;  %v5405_v44 = vld [vmem:[%s7375_s5 + $0x424] ss:$8 sps:$4 sm:$0xff]  }
 0x185   : > { %2182 = vmatpush1.bf16.msra.mxu0 %v5313_v45  ;;  %v5408_v45 = vld [vmem:[%s7375_s5 + $0x524] ss:$8 sps:$4 sm:$0xff]  }
 0x186   : > { %2461 = vmatprep.subr.bf16.mxu0 %v5321_v46  ;;  %v5403_v46 = vld [vmem:[%s7375_s5 + $0x420] ss:$8 sps:$4 sm:$0xff]  }
 0x187   : > { %2038 = vmatpush1.bf16.msra.mxu1 %v5316_v47  ;;  %v5406_v47 = vld [vmem:[%s7375_s5 + $0x520] ss:$8 sps:$4 sm:$0xff]  }
 0x188   : > { %2200 = vmatmul.mubr.bf16.vlgmr.msra.gmra.mrb[28].mxu0 %v2069_v49  ;;  %2313 = vmatprep.subr.bf16.mxu1 %v5324_v62  ;;  %v5411_v62 = vld [vmem:[%s7375_s5 + $0x434] ss:$8 sps:$4 sm:$0xff]   ;;  %v5409_v49 = vld [vmem:[%s7375_s5 + $0x430] ss:$8 sps:$4 sm:$0xff]  }
 0x189   : > { %2462 = vmatpush1.bf16.msra.mxu0 %v5319_v48  ;;  %2493 = vmatprep.mubr.bf16.mxu0 %v5713_v21  ;;  %v5414_v48 = vld [vmem:[%s7375_s5 + $0x534] ss:$8 sps:$4 sm:$0xff]  }
 0x18a   : > { %2056 = vmatmul.mubr.bf16.vlgmr.msra.gmra.mrb[24].mxu1 %v1925_v52  ;;  %2463 = vmatprep.subr.bf16.mxu0 %v5327_v50  ;;  %v5412_v50 = vld [vmem:[%s7375_s5 + $0x530] ss:$8 sps:$4 sm:$0xff]   ;;  %v5420_v52 = vld [vmem:[%s7375_s5 + $0x544] ss:$8 sps:$4 sm:$0xff]  }
 0x18b   : > { %2314 = vmatpush1.bf16.msra.mxu1 %v5322_v51  ;;  %2345 = vmatprep.mubr.bf16.mxu1 %v5713_v21  ;;  %v5417_v51 = vld [vmem:[%s7375_s5 + $0x444] ss:$8 sps:$4 sm:$0xff]  }
 0x18c   : > { %2315 = vmatprep.subr.bf16.mxu1 %v5330_v53  ;;  %v5415_v53 = vld [vmem:[%s7375_s5 + $0x440] ss:$8 sps:$4 sm:$0xff]  }
 0x18d   : > { %2464 = vmatpush1.bf16.msra.mxu0 %v5325_v33  ;;  %v5418_v33 = vld [vmem:[%s7375_s5 + $0x540] ss:$8 sps:$4 sm:$0xff]  }
 0x18e   : > { %2465 = vmatprep.subr.bf16.mxu0 %v5333_v54  ;;  %v5421_v54 = vld [vmem:[%s7375_s5 + $0x450] ss:$8 sps:$4 sm:$0xff]  }
 0x18f   : > { %2316 = vmatpush1.bf16.msra.mxu1 %v5328_v34  ;;  %v5423_v34 = vld [vmem:[%s7375_s5 + $0x454] ss:$8 sps:$4 sm:$0xff]  }
 0x190   : > { %2317 = vmatprep.subr.bf16.mxu1 %v5336_v14  ;;  %v5424_v14 = vld [vmem:[%s7375_s5 + $0x550] ss:$8 sps:$4 sm:$0xff]  }
 0x191   : > { %2466 = vmatpush1.bf16.msra.mxu0 %v5331_v55  ;;  %v5426_v55 = vld [vmem:[%s7375_s5 + $0x554] ss:$8 sps:$4 sm:$0xff]  }
 0x192   : > { %2467 = vmatprep.subr.bf16.mxu0 %v5339_v56  ;;  %v5427_v56 = vld [vmem:[%s7375_s5 + $0x460] ss:$8 sps:$4 sm:$0xff]  }
 0x193   : > { %2318 = vmatpush1.bf16.msra.mxu1 %v5334_v58  ;;  %v5429_v58 = vld [vmem:[%s7375_s5 + $0x464] ss:$8 sps:$4 sm:$0xff]  }
 0x194   : > { %2319 = vmatprep.subr.bf16.mxu1 %v5342_v15  ;;  %v5432_v15 = vld [vmem:[%s7375_s5 + $0x564] ss:$8 sps:$4 sm:$0xff]  }
 0x195   : > { %2468 = vmatpush1.bf16.msra.mxu0 %v5337_v59  ;;  %v5430_v59 = vld [vmem:[%s7375_s5 + $0x560] ss:$8 sps:$4 sm:$0xff]  }
 0x196   : > { %2469 = vmatprep.subr.bf16.mxu0 %v5345_v16  ;;  %v5435_v16 = vld [vmem:[%s7375_s5 + $0x474] ss:$8 sps:$4 sm:$0xff]  }
 0x197   : > { %2320 = vmatpush1.bf16.msra.mxu1 %v5340_v60  ;;  %v5433_v60 = vld [vmem:[%s7375_s5 + $0x470] ss:$8 sps:$4 sm:$0xff]  }
 0x198   : > { %2321 = vmatprep.subr.bf16.mxu1 %v5348_v61  ;;  %v5438_v61 = vld [vmem:[%s7375_s5 + $0x574] ss:$8 sps:$4 sm:$0xff]  }
 0x199   : > { %2470 = vmatpush1.bf16.msra.mxu0 %v5343_v2  ;;  %v5441_v2 = vld [vmem:[%s7375_s5 + $0x484] ss:$8 sps:$4 sm:$0xff]  }
 0x19a   : > { %2471 = vmatprep.subr.bf16.mxu0 %v5351_v23  ;;  %v5436_v23 = vld [vmem:[%s7375_s5 + $0x570] ss:$8 sps:$4 sm:$0xff]  }
 0x19b   : > { %2322 = vmatpush1.bf16.msra.mxu1 %v5346_v0  ;;  %v5439_v0 = vld [vmem:[%s7375_s5 + $0x480] ss:$8 sps:$4 sm:$0xff]  }
 0x19c   : > { %2323 = vmatprep.subr.bf16.mxu1 %v5354_v3  ;;  %v5444_v3 = vld [vmem:[%s7375_s5 + $0x584] ss:$8 sps:$4 sm:$0xff]  }
 0x19d   : > { %2472 = vmatpush1.bf16.msra.mxu0 %v5349_v5  ;;  %v5447_v5 = vld [vmem:[%s7375_s5 + $0x494] ss:$8 sps:$4 sm:$0xff]  }
 0x19e   : > { %2473 = vmatprep.subr.bf16.mxu0 %v5357_v6  ;;  %v5442_v6 = vld [vmem:[%s7375_s5 + $0x580] ss:$8 sps:$4 sm:$0xff]  }
 0x19f   : > { %2324 = vmatpush1.bf16.msra.mxu1 %v5352_v9  ;;  %v5445_v9 = vld [vmem:[%s7375_s5 + $0x490] ss:$8 sps:$4 sm:$0xff]  }
 0x1a0   : > { %2325 = vmatprep.subr.bf16.mxu1 %v5360_v8  ;;  %v5450_v8 = vld [vmem:[%s7375_s5 + $0x594] ss:$8 sps:$4 sm:$0xff]  }
 0x1a1   : > { %2474 = vmatpush1.bf16.msra.mxu0 %v5355_v63  ;;  %v5453_v63 = vld [vmem:[%s7375_s5 + $0x4a4] ss:$8 sps:$4 sm:$0xff]  }
 0x1a2   : > { %2475 = vmatprep.subr.bf16.mxu0 %v5363_v4  ;;  %v5448_v4 = vld [vmem:[%s7375_s5 + $0x590] ss:$8 sps:$4 sm:$0xff]  }
 0x1a3   : > { %2326 = vmatpush1.bf16.msra.mxu1 %v5358_v13  ;;  %v5451_v13 = vld [vmem:[%s7375_s5 + $0x4a0] ss:$8 sps:$4 sm:$0xff]  }
 0x1a4   : > { %2327 = vmatprep.subr.bf16.mxu1 %v5366_v10  ;;  %v5456_v10 = vld [vmem:[%s7375_s5 + $0x5a4] ss:$8 sps:$4 sm:$0xff]  }
 0x1a5   : > { %2476 = vmatpush1.bf16.msra.mxu0 %v5361_v11  ;;  %v5459_v11 = vld [vmem:[%s7375_s5 + $0x4b4] ss:$8 sps:$4 sm:$0xff]  }
 0x1a6   : > { %2904 = vmatprep.subr.bf16.mxu0 %v5396_v37  ;;  %v5475_v37 = vld [vmem:[%s7375_s5 + $0x4e0] ss:$8 sps:$4 sm:$0xff]  }
 0x1a7   : > { %2328 = vmatpush1.bf16.msra.mxu1 %v5364_v7  ;;  %v5454_v7 = vld [vmem:[%s7375_s5 + $0x5a0] ss:$8 sps:$4 sm:$0xff]  }
 0x1a8   : > { %2494 = vmatmul.mubr.bf16.vlgmr.msra.gmra.mrb[32].mxu0 %v2363_v17  ;;  %2609 = vmatprep.subr.bf16.mxu1 %v5369_v18  ;;  %v5457_v18 = vld [vmem:[%s7375_s5 + $0x4b0] ss:$8 sps:$4 sm:$0xff]   ;;  %v5462_v17 = vld [vmem:[%s7375_s5 + $0x5b4] ss:$8 sps:$4 sm:$0xff]  }
 0x1a9   : > { %2905 = vmatpush1.bf16.msra.mxu0 %v5394_v40  ;;  %v5477_v40 = vld [vmem:[%s7375_s5 + $0x4e4] ss:$8 sps:$4 sm:$0xff]  }
 0x1aa   : > { %2346 = vmatmul.mubr.bf16.vlgmr.msra.gmra.mrb[28].mxu1 %v2215_v20  ;;  %2906 = vmatprep.subr.bf16.mxu0 %v5402_v41  ;;  %v5460_v20 = vld [vmem:[%s7375_s5 + $0x5b0] ss:$8 sps:$4 sm:$0xff]   ;;  %v5480_v41 = vld [vmem:[%s7375_s5 + $0x5e4] ss:$8 sps:$4 sm:$0xff]  }
 0x1ab   : > { %2610 = vmatpush1.bf16.msra.mxu1 %v5367_v19  ;;  %2641 = vmatprep.mubr.bf16.mxu1 %v5713_v21  ;;  %v5376_v21 = vld [vmem:[%s7373_s3 + $0x430] ss:$8 sps:$4 sm:$0xff]   ;;  %v5465_v19 = vld [vmem:[%s7375_s5 + $0x4c4] ss:$8 sps:$4 sm:$0xff]  }
 0x1ac   : > { %2611 = vmatprep.subr.bf16.mxu1 %v5372_v24  ;;  %v5463_v24 = vld [vmem:[%s7375_s5 + $0x4c0] ss:$8 sps:$4 sm:$0xff]  }
 0x1ad   : > { %2907 = vmatpush1.bf16.msra.mxu0 %v5400_v43  ;;  %v5481_v43 = vld [vmem:[%s7375_s5 + $0x4f0] ss:$8 sps:$4 sm:$0xff]  }
 0x1ae   : > { %2908 = vmatprep.subr.bf16.mxu0 %v5408_v45  ;;  %v5489_v45 = vld [vmem:[%s7375_s5 + $0x804] ss:$8 sps:$4 sm:$0xff]  }
 0x1af   : > { %2612 = vmatpush1.bf16.msra.mxu1 %v5370_v42  ;;  %v5468_v42 = vld [vmem:[%s7375_s5 + $0x5c4] ss:$8 sps:$4 sm:$0xff]  }
 0x1b0   : > { %2613 = vmatprep.subr.bf16.mxu1 %v5375_v25  ;;  %v5471_v25 = vld [vmem:[%s7375_s5 + $0x4d4] ss:$8 sps:$4 sm:$0xff]  }
 0x1b1   : > { %2909 = vmatpush1.bf16.msra.mxu0 %v5406_v47  ;;  %v5492_v47 = vld [vmem:[%s7375_s5 + $0x704] ss:$8 sps:$4 sm:$0xff]  }
 0x1b2   : > { %2910 = vmatprep.subr.bf16.mxu0 %v5414_v48 }
 0x1b3   : > { %2614 = vmatpush1.bf16.msra.mxu1 %v5373_v1  ;;  %v5466_v1 = vld [vmem:[%s7375_s5 + $0x5c0] ss:$8 sps:$4 sm:$0xff]  }
 0x1b4   : > { %2615 = vmatprep.subr.bf16.mxu1 %v5378_v26  ;;  %v5469_v26 = vld [vmem:[%s7375_s5 + $0x4d0] ss:$8 sps:$4 sm:$0xff]  }
 0x1b5   : > { %2911 = vmatpush1.bf16.msra.mxu0 %v5412_v50 }
 0x1b6   : > { %2912 = vmatprep.subr.bf16.mxu0 %v5420_v52 }
 0x1b7   : > { %2616 = vmatpush1.bf16.msra.mxu1 %v5376_v21 }
 0x1b8   : > { %2617 = vmatprep.subr.bf16.mxu1 %v5381_v27 }
 0x1b9   : > { %2913 = vmatpush1.bf16.msra.mxu0 %v5418_v33 }
 0x1ba   : > { %2914 = vmatprep.subr.bf16.mxu0 %v5426_v55 }
 0x1bb   : > { %2618 = vmatpush1.bf16.msra.mxu1 %v5379_v35 }
 0x1bc   : > { %2619 = vmatprep.subr.bf16.mxu1 %v5384_v28 }
 0x1bd   : > { %2915 = vmatpush1.bf16.msra.mxu0 %v5424_v14 }
 0x1be   : > { %2916 = vmatprep.subr.bf16.mxu0 %v5432_v15 }
 0x1bf   : > { %2620 = vmatpush1.bf16.msra.mxu1 %v5382_v29 }
 0x1c0   : > { %2621 = vmatprep.subr.bf16.mxu1 %v5387_v30 }
 0x1c1   : > { %2917 = vmatpush1.bf16.msra.mxu0 %v5430_v59 }
 0x1c2   : > { %2918 = vmatprep.subr.bf16.mxu0 %v5438_v61 }
 0x1c3   : > { %2622 = vmatpush1.bf16.msra.mxu1 %v5385_v31 }
 0x1c4   : > { %2623 = vmatprep.subr.bf16.mxu1 %v5390_v32 }
 0x1c5   : > { %2919 = vmatpush1.bf16.msra.mxu0 %v5436_v23 }
 0x1c6   : > { %2920 = vmatprep.subr.bf16.mxu0 %v5444_v3 }
 0x1c7   : > { %2624 = vmatpush1.bf16.msra.mxu1 %v5388_v57 }
 0x1c8   : > { %3105 = vmatprep.subr.bf16.mxu1 %v5393_v39  ;;  %v5472_v39 = vld [vmem:[%s7375_s5 + $0x5d0] ss:$8 sps:$4 sm:$0xff]  }
 0x1c9   : > { %2921 = vmatpush1.bf16.msra.mxu0 %v5442_v6 }
 0x1ca   : > { %2642 = vmatmul.mubr.bf16.vlgmr.msra.gmra.mrb[32].mxu1 %v2511_v36  ;;  %2922 = vmatprep.subr.bf16.mxu0 %v5450_v8 }
 0x1cb   : > { %3106 = vmatpush1.bf16.msra.mxu1 %v5391_v38  ;;  %v5474_v38 = vld [vmem:[%s7375_s5 + $0x5d4] ss:$8 sps:$4 sm:$0xff]  }
 0x1cc   : > { %3107 = vmatprep.subr.bf16.mxu1 %v5399_v12  ;;  %v5478_v12 = vld [vmem:[%s7375_s5 + $0x5e0] ss:$8 sps:$4 sm:$0xff]  }
 0x1cd   : > { %2923 = vmatpush1.bf16.msra.mxu0 %v5448_v4 }
 0x1ce   : > { %2924 = vmatprep.subr.bf16.mxu0 %v5456_v10 }
 0x1cf   : > { %3108 = vmatpush1.bf16.msra.mxu1 %v5397_v22  ;;  %v5483_v22 = vld [vmem:[%s7375_s5 + $0x4f4] ss:$8 sps:$4 sm:$0xff]  }
 0x1d0   : > { %3109 = vmatprep.subr.bf16.mxu1 %v5405_v44  ;;  %v5486_v44 = vld [vmem:[%s7375_s5 + $0x5f4] ss:$8 sps:$4 sm:$0xff]  }
 0x1d1   : > { %2925 = vmatpush1.bf16.msra.mxu0 %v5454_v7 }
 0x1d2   : > { %2926 = vmatprep.subr.bf16.mxu0 %v5462_v17 }
 0x1d3   : > { %3110 = vmatpush1.bf16.msra.mxu1 %v5403_v46  ;;  %v5484_v46 = vld [vmem:[%s7375_s5 + $0x5f0] ss:$8 sps:$4 sm:$0xff]  }
 0x1d4   : > { %3111 = vmatprep.subr.bf16.mxu1 %v5411_v62 }
 0x1d5   : > { %2927 = vmatpush1.bf16.msra.mxu0 %v5460_v20  ;;  %v2654_v20 = vlaneseq }
 0x1d6   : > { %2928 = vmatprep.subr.bf16.mxu0 %v5468_v42 }
 0x1d7   : > { %3112 = vmatpush1.bf16.msra.mxu1 %v5409_v49 }
 0x1d8   : > { %3113 = vmatprep.subr.bf16.mxu1 %v5417_v51 }
 0x1d9   : > { %2929 = vmatpush1.bf16.msra.mxu0 %v5466_v1 }
 0x1da   : > { %2930 = vmatprep.subr.bf16.mxu0 %v5474_v38 }
 0x1db   : > { %3114 = vmatpush1.bf16.msra.mxu1 %v5415_v53 }
 0x1dc   : > { %3115 = vmatprep.subr.bf16.mxu1 %v5423_v34 }
 0x1dd   : > { %2931 = vmatpush1.bf16.msra.mxu0 %v5472_v39 }
 0x1de   : > { %2932 = vmatprep.subr.bf16.mxu0 %v5480_v41 }
 0x1df   : > { %3116 = vmatpush1.bf16.msra.mxu1 %v5421_v54 }
 0x1e0   : > { %3117 = vmatprep.subr.bf16.mxu1 %v5429_v58 }
 0x1e1   : > { %2933 = vmatpush1.bf16.msra.mxu0 %v5478_v12  ;;  %v5495_v12 = vld [vmem:[%s7375_s5 + $0x814] ss:$8 sps:$4 sm:$0xff]  }
 0x1e2   : > { %2934 = vmatprep.subr.bf16.mxu0 %v5486_v44  ;;  %v5498_v44 = vld [vmem:[%s7375_s5 + $0x714] ss:$8 sps:$4 sm:$0xff]  }
 0x1e3   : > { %3118 = vmatpush1.bf16.msra.mxu1 %v5427_v56 }
 0x1e4   : > { %3119 = vmatprep.subr.bf16.mxu1 %v5435_v16 }
 0x1e5   : > { %2935 = vmatpush1.bf16.msra.mxu0 %v5484_v46  ;;  %v5493_v46 = vld [vmem:[%s7375_s5 + $0x810] ss:$8 sps:$4 sm:$0xff]  }
 0x1e6   : > { %3345 = vmatprep.subr.bf16.mxu0 %v5492_v47 }
 0x1e7   : > { %3120 = vmatpush1.bf16.msra.mxu1 %v5433_v60 }
 0x1e8   : > { %3121 = vmatprep.subr.bf16.mxu1 %v5441_v2 }
 0x1eb   : > { %3122 = vmatpush1.bf16.msra.mxu1 %v5439_v0 }
 0x1ec   : > { %3123 = vmatprep.subr.bf16.mxu1 %v5447_v5 }
 0x1ef   : > { %3124 = vmatpush1.bf16.msra.mxu1 %v5445_v9 }
 0x1f0   : > { %3125 = vmatprep.subr.bf16.mxu1 %v5453_v63 }
 0x1f3   : > { %3126 = vmatpush1.bf16.msra.mxu1 %v5451_v13 }
 0x1f4   : > { %3127 = vmatprep.subr.bf16.mxu1 %v5459_v11 }
 0x1f7   : > { %3128 = vmatpush1.bf16.msra.mxu1 %v5457_v18 }
 0x1f8   : > { %3129 = vmatprep.subr.bf16.mxu1 %v5465_v19 }
 0x1fb   : > { %3130 = vmatpush1.bf16.msra.mxu1 %v5463_v24  ;;  %v2655_v24 = vshrl.u32 %v2654_v20, 7  ;;  %v5555_v20 = vld [vmem:[%s7375_s5 + $0x8b4] ss:$8 sps:$4 sm:$0xff]  }
 0x1fc   : > { %3131 = vmatprep.subr.bf16.mxu1 %v5471_v25  ;;  %v2652_v25 = vld [vmem:[%s7374_s4] sm:$0x3] }
 0x1fd   : > { %v6962_v42 = vsub.s32 0, %v2655_v24  ;;  %v6967_v1 = vsub.s32 1, %v2655_v24  ;;  %v5550_v24 = vld [vmem:[%s7375_s5 + $0x7a0] ss:$8 sps:$4 sm:$0xff]  }
 0x1ff   : > { %3132 = vmatpush1.bf16.msra.mxu1 %v5469_v26  ;;  %v2657_v26 = vrot.slane %v2652_v25, %v6962_v42 }
 0x200   : > { %3133 = vmatprep.subr.bf16.mxu1 %v5477_v40 }
 0x203   : > { %3134 = vmatpush1.bf16.msra.mxu1 %v5475_v37  ;;  %v5487_v37 = vld [vmem:[%s7375_s5 + $0x800] ss:$8 sps:$4 sm:$0xff]  }
 0x204   : > { %3135 = vmatprep.subr.bf16.mxu1 %v5483_v22  ;;  %v5490_v22 = vld [vmem:[%s7375_s5 + $0x700] ss:$8 sps:$4 sm:$0xff]  }
 0x207   : > { %3136 = vmatpush1.bf16.msra.mxu1 %v5481_v43 }
 0x208   : > { %3585 = vmatprep.subr.bf16.mxu1 %v5489_v45 }
 0x21b   : > { %v1619_v21 = vpop.f32.mrb[20].mxu0 }
 0x21c   : > { %v1621_v27 = vpop.f32.mrb[21].mxu0 }
 0x21d   : > { %v1498_v35 = vpop.f32.mrb[16].mxu1  ;;  %v1623_v28 = vpop.f32.mrb[22].mxu0 }
 0x21e   : > { %v1620_v29 = vadd.f32 %v1619_v21, %v1498_v35  ;;  %v1500_v30 = vpop.f32.mrb[17].mxu1  ;;  %v1624_v31 = vpop.f32.mrb[23].mxu0 }
 0x21f   : > { %v1622_v32 = vadd.f32 %v1621_v27, %v1500_v30  ;;  %v1502_v57 = vpop.f32.mrb[18].mxu1  ;;  %v2661_v27 = vrot.slane %v2652_v25, %v6967_v1  ;;  %v5558_v25 = vld [vmem:[%s7375_s5 + $0x7b4] ss:$8 sps:$4 sm:$0xff]  }
 0x220   : > { %v1503_v36 = vpop.f32.mrb[19].mxu1 }
 0x23b   : > { %v1909_v62 = vpop.f32.mrb[24].mxu0 }
 0x23c   : > { %v1911_v48 = vpop.f32.mrb[25].mxu0 }
 0x23d   : > { %v1762_v49 = vpop.f32.mrb[20].mxu1  ;;  %v1913_v50 = vpop.f32.mrb[26].mxu0 }
 0x23e   : > { %v1769_v51 = vadd.f32 %v1762_v49, %v1620_v29  ;;  %v1764_v52 = vpop.f32.mrb[21].mxu1  ;;  %v1914_v53 = vpop.f32.mrb[27].mxu0  ;;  %v5504_v49 = vld [vmem:[%s7375_s5 + $0x724] ss:$8 sps:$4 sm:$0xff]   ;;  %v5499_v50 = vld [vmem:[%s7375_s5 + $0x820] ss:$8 sps:$4 sm:$0xff]  }
 0x23f   : > { %v1770_v33 = vadd.f32 %v1764_v52, %v1622_v32  ;;  %v1766_v54 = vpop.f32.mrb[22].mxu1  ;;  %v5502_v52 = vld [vmem:[%s7375_s5 + $0x720] ss:$8 sps:$4 sm:$0xff]   ;;  %v5510_v53 = vld [vmem:[%s7375_s5 + $0x734] ss:$8 sps:$4 sm:$0xff]  }
 0x240   : > { %v1767_v34 = vpop.f32.mrb[23].mxu1  ;;  %v1916_v14 = vadd.f32 %v1909_v62, %v1769_v51  ;;  %v5501_v62 = vld [vmem:[%s7375_s5 + $0x824] ss:$8 sps:$4 sm:$0xff]   ;;  %v5507_v51 = vld [vmem:[%s7375_s5 + $0x834] ss:$8 sps:$4 sm:$0xff]  }
 0x241   : > { %v1917_v55 = vadd.f32 %v1911_v48, %v1770_v33  ;;  %v5496_v48 = vld [vmem:[%s7375_s5 + $0x710] ss:$8 sps:$4 sm:$0xff]   ;;  %v5513_v54 = vld [vmem:[%s7375_s5 + $0x844] ss:$8 sps:$4 sm:$0xff]  }
 0x242   : > { %v5505_v33 = vld [vmem:[%s7375_s5 + $0x830] ss:$8 sps:$4 sm:$0xff]  }
 0x243   : > { %v5508_v34 = vld [vmem:[%s7375_s5 + $0x730] ss:$8 sps:$4 sm:$0xff]  }
 0x25b   : > { %v2201_v56 = vpop.f32.mrb[28].mxu0 }
 0x25c   : > { %v2203_v58 = vpop.f32.mrb[29].mxu0 }
 0x25d   : > { %v2057_v15 = vpop.f32.mrb[24].mxu1  ;;  %v2205_v59 = vpop.f32.mrb[30].mxu0 }
 0x25e   : > { %v2064_v16 = vadd.f32 %v2057_v15, %v1916_v14  ;;  %v2059_v60 = vpop.f32.mrb[25].mxu1  ;;  %v2206_v61 = vpop.f32.mrb[31].mxu0  ;;  %v5516_v14 = vld [vmem:[%s7375_s5 + $0x744] ss:$8 sps:$4 sm:$0xff]   ;;  %v5522_v15 = vld [vmem:[%s7375_s5 + $0x754] ss:$8 sps:$4 sm:$0xff]  }
 0x25f   : > { %v2065_v2 = vadd.f32 %v2059_v60, %v1917_v55  ;;  %v2061_v23 = vpop.f32.mrb[26].mxu1  ;;  %v5511_v55 = vld [vmem:[%s7375_s5 + $0x840] ss:$8 sps:$4 sm:$0xff]   ;;  %v5517_v59 = vld [vmem:[%s7375_s5 + $0x850] ss:$8 sps:$4 sm:$0xff]  }
 0x260   : > { %v2062_v0 = vpop.f32.mrb[27].mxu1  ;;  %v2208_v3 = vadd.f32 %v2201_v56, %v2064_v16  ;;  %v5519_v56 = vld [vmem:[%s7375_s5 + $0x854] ss:$8 sps:$4 sm:$0xff]   ;;  %v5525_v16 = vld [vmem:[%s7375_s5 + $0x864] ss:$8 sps:$4 sm:$0xff]  }
 0x261   : > { %v2209_v5 = vadd.f32 %v2203_v58, %v2065_v2  ;;  %v5514_v58 = vld [vmem:[%s7375_s5 + $0x740] ss:$8 sps:$4 sm:$0xff]   ;;  %v5520_v60 = vld [vmem:[%s7375_s5 + $0x750] ss:$8 sps:$4 sm:$0xff]   ;;  %v5528_v61 = vld [vmem:[%s7375_s5 + $0x764] ss:$8 sps:$4 sm:$0xff]  }
 0x262   : > { %v5523_v2 = vld [vmem:[%s7375_s5 + $0x860] ss:$8 sps:$4 sm:$0xff]   ;;  %v5531_v23 = vld [vmem:[%s7375_s5 + $0x874] ss:$8 sps:$4 sm:$0xff]  }
 0x263   : > { %v5526_v0 = vld [vmem:[%s7375_s5 + $0x760] ss:$8 sps:$4 sm:$0xff]  }
 0x27b   : > { %v2495_v6 = vpop.f32.mrb[32].mxu0 }
 0x27c   : > { %v2497_v9 = vpop.f32.mrb[33].mxu0 }
 0x27d   : > { %v2347_v8 = vpop.f32.mrb[28].mxu1  ;;  %v2499_v63 = vpop.f32.mrb[34].mxu0 }
 0x27e   : > { %v2354_v4 = vadd.f32 %v2347_v8, %v2208_v3  ;;  %v2349_v13 = vpop.f32.mrb[29].mxu1  ;;  %v2500_v10 = vpop.f32.mrb[35].mxu0  ;;  %v5534_v3 = vld [vmem:[%s7375_s5 + $0x774] ss:$8 sps:$4 sm:$0xff]   ;;  %v5540_v8 = vld [vmem:[%s7375_s5 + $0x784] ss:$8 sps:$4 sm:$0xff]  }
 0x27f   : > { %v2355_v11 = vadd.f32 %v2349_v13, %v2209_v5  ;;  %v2351_v7 = vpop.f32.mrb[30].mxu1  ;;  %v5529_v5 = vld [vmem:[%s7375_s5 + $0x870] ss:$8 sps:$4 sm:$0xff]   ;;  %v5535_v63 = vld [vmem:[%s7375_s5 + $0x880] ss:$8 sps:$4 sm:$0xff]  }
 0x280   : > { %v2352_v18 = vpop.f32.mrb[31].mxu1  ;;  %v2502_v17 = vadd.f32 %v2495_v6, %v2354_v4  ;;  %v5537_v6 = vld [vmem:[%s7375_s5 + $0x884] ss:$8 sps:$4 sm:$0xff]   ;;  %v5543_v4 = vld [vmem:[%s7375_s5 + $0x894] ss:$8 sps:$4 sm:$0xff]  }
 0x281   : > { %v2503_v19 = vadd.f32 %v2497_v9, %v2355_v11  ;;  %v5532_v9 = vld [vmem:[%s7375_s5 + $0x770] ss:$8 sps:$4 sm:$0xff]   ;;  %v5538_v13 = vld [vmem:[%s7375_s5 + $0x780] ss:$8 sps:$4 sm:$0xff]   ;;  %v5546_v10 = vld [vmem:[%s7375_s5 + $0x794] ss:$8 sps:$4 sm:$0xff]  }
 0x282   : > { %v5541_v11 = vld [vmem:[%s7375_s5 + $0x890] ss:$8 sps:$4 sm:$0xff]   ;;  %v5549_v7 = vld [vmem:[%s7375_s5 + $0x8a4] ss:$8 sps:$4 sm:$0xff]  }
 0x283   : > { %v5544_v18 = vld [vmem:[%s7375_s5 + $0x790] ss:$8 sps:$4 sm:$0xff]  }
 0x29d   : > { %v2643_v21 = vpop.f32.mrb[32].mxu1 }
 0x29e   : > { %v2650_v35 = vadd.f32 %v2643_v21, %v2502_v17  ;;  %v2645_v28 = vpop.f32.mrb[33].mxu1  ;;  %v5552_v17 = vld [vmem:[%s7375_s5 + $0x7a4] ss:$8 sps:$4 sm:$0xff]  }
 0x29f   : > { %v2651_v29 = vadd.f32 %v2645_v28, %v2503_v19  ;;  %v2647_v30 = vpop.f32.mrb[34].mxu1  ;;  %v5547_v19 = vld [vmem:[%s7375_s5 + $0x8a0] ss:$8 sps:$4 sm:$0xff]   ;;  %v5561_v21 = vld [vmem:[%s7375_s5 + $0x8c4] ss:$8 sps:$4 sm:$0xff]  }
 0x2a0   : > { %v2664_v31 = vadd.f32 %v2657_v26, %v2650_v35  ;;  %v2648_v32 = vpop.f32.mrb[35].mxu1  ;;  %v5553_v26 = vld [vmem:[%s7375_s5 + $0x8b0] ss:$8 sps:$4 sm:$0xff]   ;;  %v5564_v35 = vld [vmem:[%s7375_s5 + $0x7c4] ss:$8 sps:$4 sm:$0xff]  }
 0x2a1   : > { %v2665_v57 = vadd.f32 %v2661_v27, %v2651_v29  ;;  %v5556_v27 = vld [vmem:[%s7375_s5 + $0x7b0] ss:$8 sps:$4 sm:$0xff]   ;;  %v5559_v28 = vld [vmem:[%s7375_s5 + $0x8c0] ss:$8 sps:$4 sm:$0xff]   ;;  %v5567_v29 = vld [vmem:[%s7375_s5 + $0x8d4] ss:$8 sps:$4 sm:$0xff]  }
 0x2a2   : > { %v2666_v36 = vmax.f32 %v2664_v31, 0.0  ;;  %v5562_v30 = vld [vmem:[%s7375_s5 + $0x7c0] ss:$8 sps:$4 sm:$0xff]   ;;  %v5570_v31 = vld [vmem:[%s7375_s5 + $0x7d4] ss:$8 sps:$4 sm:$0xff]  }
 0x2a3   : > { %v2667_v38 = vmax.f32 %v2665_v57, 0.0  ;;  %v5565_v32 = vld [vmem:[%s7375_s5 + $0x8d0] ss:$8 sps:$4 sm:$0xff]   ;;  %v5573_v57 = vld [vmem:[%s7375_s5 + $0x8e4] ss:$8 sps:$4 sm:$0xff]  }
 0x2a4   : > { %v6971_v39 = vpack.c.bf16 %v2666_v36, %v2666_v36  ;;  %v5568_v36 = vld [vmem:[%s7375_s5 + $0x7d0] ss:$8 sps:$4 sm:$0xff]  }
 0x2a5   : > { %v2669_v40 = vpack.c.bf16 %v2667_v38, %v2667_v38  ;;  %v5576_v38 = vld [vmem:[%s7375_s5 + $0x7e4] ss:$8 sps:$4 sm:$0xff]  }
 0x2a6   : > { %v2737_v43 = vshrl.u32 %v6971_v39, 16 }
 0x2a7   : > { %3137 = vmatprep.mubr.bf16.mxu1 %v2669_v40  ;;  %v2740_v41 = vshrl.u32 %v2669_v40, 16  ;;  %v3182_v45 = vrot.slane %v2669_v40, 1  ;;  %v5571_v40 = vld [vmem:[%s7375_s5 + $0x8e0] ss:$8 sps:$4 sm:$0xff]  }
 0x2a8   : > { %3138 = vmatmul.mubr.bf16.vlgmr.msra.gmra.mrb[36].mxu1 %v6971_v39 }
 0x2a9   : > { %3586 = vmatpush1.bf16.msra.mxu1 %v5487_v37  ;;  %2936 = vmatprep.mubr.bf16.mxu0 %v2740_v41  ;;  %v3422_v47 = vrot.slane %v2740_v41, 1  ;;  %v5579_v37 = vld [vmem:[%s7375_s5 + $0x8f4] ss:$8 sps:$4 sm:$0xff]  }
 0x2aa   : > { %2937 = vmatmul.mubr.bf16.vlgmr.msra.gmra.mrb[36].mxu0 %v2737_v43  ;;  %3587 = vmatprep.subr.bf16.mxu1 %v5495_v12  ;;  %v5574_v12 = vld [vmem:[%s7375_s5 + $0x7e0] ss:$8 sps:$4 sm:$0xff]   ;;  %v5582_v41 = vld [vmem:[%s7375_s5 + $0x7f4] ss:$8 sps:$4 sm:$0xff]  }
 0x2ab   : > { %3346 = vmatpush1.bf16.msra.mxu0 %v5490_v22  ;;  %3377 = vmatprep.mubr.bf16.mxu0 %v3182_v45  ;;  %v5577_v22 = vld [vmem:[%s7375_s5 + $0x8f0] ss:$8 sps:$4 sm:$0xff]   ;;  %v3421_v45 = vrot.slane %v2737_v43, 1 }
 0x2ac   : > { %3617 = vmatprep.mubr.bf16.mxu1 %v3422_v47  ;;  %3347 = vmatprep.subr.bf16.mxu0 %v5498_v44  ;;  %v5580_v44 = vld [vmem:[%s7375_s5 + $0x7f0] ss:$8 sps:$4 sm:$0xff]   ;;  %v5583_v47 = vld [vmem:[%s7377_s7 + $0x400] ss:$8 sps:$4 sm:$0xff]  }
 0x2ad   : > { %3588 = vmatpush1.bf16.msra.mxu1 %v5493_v46  ;;  %v3181_v46 = vrot.slane %v6971_v39, 1  ;;  %v5586_v43 = vld [vmem:[%s7377_s7 + $0x410] ss:$8 sps:$4 sm:$0xff]   ;;  %v5591_v39 = vld [vmem:[%s7377_s7 + $0x424] ss:$8 sps:$4 sm:$0xff]  }
 0x2ae   : > { %3589 = vmatprep.subr.bf16.mxu1 %v5501_v62  ;;  %v5585_v62 = vld [vmem:[%s7377_s7 + $0x404] ss:$8 sps:$4 sm:$0xff]  }
 0x2af   : > { %3348 = vmatpush1.bf16.msra.mxu0 %v5496_v48  ;;  %v5588_v48 = vld [vmem:[%s7377_s7 + $0x414] ss:$8 sps:$4 sm:$0xff]  }
 0x2b0   : > { %3349 = vmatprep.subr.bf16.mxu0 %v5504_v49  ;;  %v5589_v49 = vld [vmem:[%s7377_s7 + $0x420] ss:$8 sps:$4 sm:$0xff]  }
 0x2b1   : > { %3590 = vmatpush1.bf16.msra.mxu1 %v5499_v50  ;;  %v5594_v50 = vld [vmem:[%s7377_s7 + $0x434] ss:$8 sps:$4 sm:$0xff]  }
 0x2b2   : > { %3591 = vmatprep.subr.bf16.mxu1 %v5507_v51  ;;  %v5592_v51 = vld [vmem:[%s7377_s7 + $0x430] ss:$8 sps:$4 sm:$0xff]  }
 0x2b3   : > { %3350 = vmatpush1.bf16.msra.mxu0 %v5502_v52  ;;  %v5597_v52 = vld [vmem:[%s7377_s7 + $0x444] ss:$8 sps:$4 sm:$0xff]  }
 0x2b4   : > { %3351 = vmatprep.subr.bf16.mxu0 %v5510_v53  ;;  %v5595_v53 = vld [vmem:[%s7377_s7 + $0x440] ss:$8 sps:$4 sm:$0xff]  }
 0x2b5   : > { %3592 = vmatpush1.bf16.msra.mxu1 %v5505_v33  ;;  %v5600_v33 = vld [vmem:[%s7377_s7 + $0x454] ss:$8 sps:$4 sm:$0xff]  }
 0x2b6   : > { %3593 = vmatprep.subr.bf16.mxu1 %v5513_v54  ;;  %v5598_v54 = vld [vmem:[%s7377_s7 + $0x450] ss:$8 sps:$4 sm:$0xff]  }
 0x2b7   : > { %3352 = vmatpush1.bf16.msra.mxu0 %v5508_v34  ;;  %v5603_v34 = vld [vmem:[%s7377_s7 + $0x464] ss:$8 sps:$4 sm:$0xff]  }
 0x2b8   : > { %3353 = vmatprep.subr.bf16.mxu0 %v5516_v14  ;;  %v5601_v14 = vld [vmem:[%s7377_s7 + $0x460] ss:$8 sps:$4 sm:$0xff]  }
 0x2b9   : > { %3594 = vmatpush1.bf16.msra.mxu1 %v5511_v55  ;;  %v5606_v55 = vld [vmem:[%s7377_s7 + $0x474] ss:$8 sps:$4 sm:$0xff]  }
 0x2ba   : > { %3595 = vmatprep.subr.bf16.mxu1 %v5519_v56  ;;  %v5604_v56 = vld [vmem:[%s7377_s7 + $0x470] ss:$8 sps:$4 sm:$0xff]  }
 0x2bb   : > { %3354 = vmatpush1.bf16.msra.mxu0 %v5514_v58  ;;  %v5609_v58 = vld [vmem:[%s7377_s7 + $0x484] ss:$8 sps:$4 sm:$0xff]  }
 0x2bc   : > { %3355 = vmatprep.subr.bf16.mxu0 %v5522_v15  ;;  %v5607_v15 = vld [vmem:[%s7377_s7 + $0x480] ss:$8 sps:$4 sm:$0xff]  }
 0x2bd   : > { %3596 = vmatpush1.bf16.msra.mxu1 %v5517_v59  ;;  %v5612_v59 = vld [vmem:[%s7377_s7 + $0x494] ss:$8 sps:$4 sm:$0xff]  }
 0x2be   : > { %3597 = vmatprep.subr.bf16.mxu1 %v5525_v16  ;;  %v5610_v16 = vld [vmem:[%s7377_s7 + $0x490] ss:$8 sps:$4 sm:$0xff]  }
 0x2bf   : > { %3356 = vmatpush1.bf16.msra.mxu0 %v5520_v60  ;;  %v5615_v60 = vld [vmem:[%s7377_s7 + $0x4a4] ss:$8 sps:$4 sm:$0xff]  }
 0x2c0   : > { %3357 = vmatprep.subr.bf16.mxu0 %v5528_v61  ;;  %v5613_v61 = vld [vmem:[%s7377_s7 + $0x4a0] ss:$8 sps:$4 sm:$0xff]  }
 0x2c1   : > { %3598 = vmatpush1.bf16.msra.mxu1 %v5523_v2  ;;  %v5618_v2 = vld [vmem:[%s7377_s7 + $0x4b4] ss:$8 sps:$4 sm:$0xff]  }
 0x2c2   : > { %3599 = vmatprep.subr.bf16.mxu1 %v5531_v23  ;;  %v5616_v23 = vld [vmem:[%s7377_s7 + $0x4b0] ss:$8 sps:$4 sm:$0xff]  }
 0x2c3   : > { %3358 = vmatpush1.bf16.msra.mxu0 %v5526_v0  ;;  %v5621_v0 = vld [vmem:[%s7377_s7 + $0x4c4] ss:$8 sps:$4 sm:$0xff]  }
 0x2c4   : > { %3359 = vmatprep.subr.bf16.mxu0 %v5534_v3  ;;  %v5619_v3 = vld [vmem:[%s7377_s7 + $0x4c0] ss:$8 sps:$4 sm:$0xff]  }
 0x2c5   : > { %3600 = vmatpush1.bf16.msra.mxu1 %v5529_v5  ;;  %v5624_v5 = vld [vmem:[%s7377_s7 + $0x4d4] ss:$8 sps:$4 sm:$0xff]  }
 0x2c6   : > { %3601 = vmatprep.subr.bf16.mxu1 %v5537_v6  ;;  %v5622_v6 = vld [vmem:[%s7377_s7 + $0x4d0] ss:$8 sps:$4 sm:$0xff]  }
 0x2c7   : > { %3360 = vmatpush1.bf16.msra.mxu0 %v5532_v9  ;;  %v5625_v9 = vld [vmem:[%s7377_s7 + $0x4e0] ss:$8 sps:$4 sm:$0xff]  }
 0x2c8   : > { %3361 = vmatprep.subr.bf16.mxu0 %v5540_v8  ;;  %v5627_v8 = vld [vmem:[%s7377_s7 + $0x4e4] ss:$8 sps:$4 sm:$0xff]  }
 0x2c9   : > { %3602 = vmatpush1.bf16.msra.mxu1 %v5535_v63  ;;  %v5630_v63 = vld [vmem:[%s7377_s7 + $0x4f4] ss:$8 sps:$4 sm:$0xff]  }
 0x2ca   : > { %3603 = vmatprep.subr.bf16.mxu1 %v5543_v4  ;;  %v5628_v4 = vld [vmem:[%s7377_s7 + $0x4f0] ss:$8 sps:$4 sm:$0xff]  }
 0x2cb   : > { %3362 = vmatpush1.bf16.msra.mxu0 %v5538_v13  ;;  %v5631_v13 = vld [vmem:[%s7379_s9 + $0x240] sm:$0xff]  }
 0x2cc   : > { %3363 = vmatprep.subr.bf16.mxu0 %v5546_v10  ;;  %v5632_v10 = vld [vmem:[%s7379_s9 + $0x200] sm:$0xff]  }
 0x2cd   : > { %3604 = vmatpush1.bf16.msra.mxu1 %v5541_v11  ;;  %v5633_v11 = vld [vmem:[%s7379_s9 + $0x248] sm:$0xff]  }
 0x2ce   : > { %3605 = vmatprep.subr.bf16.mxu1 %v5549_v7  ;;  %v5634_v7 = vld [vmem:[%s7379_s9 + $0x208] sm:$0xff]  }
 0x2cf   : > { %3364 = vmatpush1.bf16.msra.mxu0 %v5544_v18  ;;  %v5635_v18 = vld [vmem:[%s7379_s9 + $0x250] sm:$0xff]  }
 0x2d0   : > { %3365 = vmatprep.subr.bf16.mxu0 %v5552_v17  ;;  %v5636_v17 = vld [vmem:[%s7379_s9 + $0x210] sm:$0xff]  }
 0x2d1   : > { %3606 = vmatpush1.bf16.msra.mxu1 %v5547_v19  ;;  %v5637_v19 = vld [vmem:[%s7379_s9 + $0x258] sm:$0xff]  }
 0x2d2   : > { %3607 = vmatprep.subr.bf16.mxu1 %v5555_v20  ;;  %v5638_v20 = vld [vmem:[%s7379_s9 + $0x218] sm:$0xff]  }
 0x2d3   : > { %3366 = vmatpush1.bf16.msra.mxu0 %v5550_v24  ;;  %v5639_v24 = vld [vmem:[%s7379_s9 + $0x260] sm:$0xff]  }
 0x2d4   : > { %3367 = vmatprep.subr.bf16.mxu0 %v5558_v25  ;;  %v5640_v25 = vld [vmem:[%s7379_s9 + $0x220] sm:$0xff]  }
 0x2d5   : > { %3608 = vmatpush1.bf16.msra.mxu1 %v5553_v26  ;;  %v5641_v26 = vld [vmem:[%s7379_s9 + $0x268] sm:$0xff]  }
 0x2d6   : > { %3609 = vmatprep.subr.bf16.mxu1 %v5561_v21  ;;  %v5642_v21 = vld [vmem:[%s7379_s9 + $0x228] sm:$0xff]  }
 0x2d7   : > { %3368 = vmatpush1.bf16.msra.mxu0 %v5556_v27 }
 0x2d8   : > { %3369 = vmatprep.subr.bf16.mxu0 %v5564_v35 }
 0x2d9   : > { %3610 = vmatpush1.bf16.msra.mxu1 %v5559_v28 }
 0x2da   : > { %3611 = vmatprep.subr.bf16.mxu1 %v5567_v29 }
 0x2db   : > { %3370 = vmatpush1.bf16.msra.mxu0 %v5562_v30 }
 0x2dc   : > { %3371 = vmatprep.subr.bf16.mxu0 %v5570_v31 }
 0x2dd   : > { %3612 = vmatpush1.bf16.msra.mxu1 %v5565_v32 }
 0x2de   : > { %3613 = vmatprep.subr.bf16.mxu1 %v5573_v57 }
 0x2df   : > { %3372 = vmatpush1.bf16.msra.mxu0 %v5568_v36 }
 0x2e0   : > { %3373 = vmatprep.subr.bf16.mxu0 %v5576_v38 }
 0x2e1   : > { %3614 = vmatpush1.bf16.msra.mxu1 %v5571_v40 }
 0x2e2   : > { %3615 = vmatprep.subr.bf16.mxu1 %v5579_v37  ;;  %v3628_v37 = vld [vmem:[%s7376_s6] sm:$0x3] }
 0x2e3   : > { %3374 = vmatpush1.bf16.msra.mxu0 %v5574_v12 }
 0x2e4   : > { %3375 = vmatprep.subr.bf16.mxu0 %v5582_v41 }
 0x2e5   : > { %3616 = vmatpush1.bf16.msra.mxu1 %v5577_v22 }
 0x2e6   : > { %4967 = vmatprep.subr.bf16.mxu1 %v5631_v13 }
 0x2e7   : > { %3376 = vmatpush1.bf16.msra.mxu0 %v5580_v44 }
 0x2e8   : > { %3618 = vmatmul.mubr.bf16.vlgmr.msra.gmra.mrb[40].mxu1 %v3421_v45  ;;  %3851 = vmatprep.subr.bf16.mxu0 %v5585_v62  ;;  %v3633_v45 = vrot.slane %v3628_v37, %v6962_v42 }
 0x2e9   : > { %4968 = vmatpush3.bf16.msra.mxu1 %v5632_v10 }
 0x2ea   : > { %3378 = vmatmul.mubr.bf16.vlgmr.msra.gmra.mrb[40].mxu0 %v3181_v46  ;;  %4969 = vmatprep.subr.bf16.mxu1 %v5633_v11 }
 0x2eb   : > { %3852 = vmatpush1.bf16.msra.mxu0 %v5583_v47 }
 0x2ec   : > { %3853 = vmatprep.subr.bf16.mxu0 %v5588_v48  ;;  %v3637_v48 = vrot.slane %v3628_v37, %v6967_v1 }
 0x2ed   : > { %4970 = vmatpush3.bf16.msra.mxu1 %v5634_v7 }
 0x2ee   : > { %4971 = vmatprep.subr.bf16.mxu1 %v5635_v18 }
 0x2ef   : > { %3854 = vmatpush1.bf16.msra.mxu0 %v5586_v43 }
 0x2f0   : > { %3855 = vmatprep.subr.bf16.mxu0 %v5591_v39 }
 0x2f1   : > { %4972 = vmatpush3.bf16.msra.mxu1 %v5636_v17 }
 0x2f2   : > { %4973 = vmatprep.subr.bf16.mxu1 %v5637_v19 }
 0x2f3   : > { %3856 = vmatpush1.bf16.msra.mxu0 %v5589_v49 }
 0x2f4   : > { %3857 = vmatprep.subr.bf16.mxu0 %v5594_v50 }
 0x2f5   : > { %4974 = vmatpush3.bf16.msra.mxu1 %v5638_v20 }
 0x2f6   : > { %4975 = vmatprep.subr.bf16.mxu1 %v5639_v24 }
 0x2f7   : > { %3858 = vmatpush1.bf16.msra.mxu0 %v5592_v51 }
 0x2f8   : > { %3859 = vmatprep.subr.bf16.mxu0 %v5597_v52 }
 0x2f9   : > { %4976 = vmatpush3.bf16.msra.mxu1 %v5640_v25 }
 0x2fa   : > { %4977 = vmatprep.subr.bf16.mxu1 %v5641_v26 }
 0x2fb   : > { %3860 = vmatpush1.bf16.msra.mxu0 %v5595_v53 }
 0x2fc   : > { %3861 = vmatprep.subr.bf16.mxu0 %v5600_v33 }
 0x2fd   : > { %4978 = vmatpush3.bf16.msra.mxu1 %v5642_v21 }
 0x2ff   : > { %3862 = vmatpush1.bf16.msra.mxu0 %v5598_v54 }
 0x300   : > { %3863 = vmatprep.subr.bf16.mxu0 %v5603_v34 }
 0x303   : > { %3864 = vmatpush1.bf16.msra.mxu0 %v5601_v14  ;;  %v5643_v14 = vld [vmem:[%s7379_s9 + $0x270] sm:$0xff]  }
 0x304   : > { %3865 = vmatprep.subr.bf16.mxu0 %v5606_v55  ;;  %v5644_v55 = vld [vmem:[%s7379_s9 + $0x230] sm:$0xff]   ;;  %4979 = vmatprep.subr.bf16.mxu1 %v5643_v14 }
 0x305   : > { %4980 = vmatpush3.bf16.msra.mxu1 %v5644_v55 }
 0x307   : > { %3866 = vmatpush1.bf16.msra.mxu0 %v5604_v56  ;;  %v5645_v56 = vld [vmem:[%s7379_s9 + $0x278] sm:$0xff]  }
 0x308   : > { %3867 = vmatprep.subr.bf16.mxu0 %v5609_v58  ;;  %v5646_v58 = vld [vmem:[%s7379_s9 + $0x238] sm:$0xff]   ;;  %4981 = vmatprep.subr.bf16.mxu1 %v5645_v56 }
 0x309   : > { %4982 = vmatpush3.bf16.msra.mxu1 %v5646_v58 }
 0x30b   : > { %3868 = vmatpush1.bf16.msra.mxu0 %v5607_v15  ;;  %v3679_v15 = vld [vmem:[%s7378_s8] sm:$0x3] }
 0x30c   : > { %3869 = vmatprep.subr.bf16.mxu0 %v5612_v59  ;;  %v3844_v59 = vrot.slane %v3679_v15, %v6962_v42  ;;  %v3929_v42 = vld [vmem:[%s7380_s10] sm:$0x1] }
 0x30f   : > { %3870 = vmatpush1.bf16.msra.mxu0 %v5610_v16  ;;  %v3848_v16 = vrot.slane %v3679_v15, %v6967_v1 }
 0x310   : > { %3871 = vmatprep.subr.bf16.mxu0 %v5615_v60 }
 0x313   : > { %3872 = vmatpush1.bf16.msra.mxu0 %v5613_v61 }
 0x314   : > { %3873 = vmatprep.subr.bf16.mxu0 %v5618_v2 }
 0x317   : > { %3874 = vmatpush1.bf16.msra.mxu0 %v5616_v23 }
 0x318   : > { %3875 = vmatprep.subr.bf16.mxu0 %v5621_v0 }
 0x31b   : > { %3876 = vmatpush1.bf16.msra.mxu0 %v5619_v3 }
 0x31c   : > { %3877 = vmatprep.subr.bf16.mxu0 %v5624_v5 }
 0x31f   : > { %3878 = vmatpush1.bf16.msra.mxu0 %v5622_v6 }
 0x320   : > { %3879 = vmatprep.subr.bf16.mxu0 %v5627_v8 }
 0x323   : > { %3880 = vmatpush1.bf16.msra.mxu0 %v5625_v9 }
 0x324   : > { %3881 = vmatprep.subr.bf16.mxu0 %v5630_v63 }
 0x327   : > { %3882 = vmatpush1.bf16.msra.mxu0 %v5628_v4 }
 0x37b   : > { %v3139_v27 = vpop.f32.mrb[36].mxu1 }
 0x37c   : > { %v3141_v35 = vpop.f32.mrb[37].mxu1 }
 0x37d   : > { %v2938_v28 = vpop.f32.mrb[36].mxu0  ;;  %v3143_v29 = vpop.f32.mrb[38].mxu1 }
 0x37e   : > { %v3140_v30 = vadd.f32 %v3139_v27, %v2938_v28  ;;  %v2940_v31 = vpop.f32.mrb[37].mxu0  ;;  %v3144_v32 = vpop.f32.mrb[39].mxu1 }
 0x37f   : > { %v3142_v57 = vadd.f32 %v3141_v35, %v2940_v31  ;;  %v2942_v36 = vpop.f32.mrb[38].mxu0 }
 0x380   : > { %v2943_v38 = vpop.f32.mrb[39].mxu0 }
 0x3bb   : > { %v3619_v40 = vpop.f32.mrb[40].mxu1 }
 0x3bc   : > { %v3621_v12 = vpop.f32.mrb[41].mxu1 }
 0x3bd   : > { %v3379_v41 = vpop.f32.mrb[40].mxu0  ;;  %v3623_v22 = vpop.f32.mrb[42].mxu1 }
 0x3be   : > { %v3386_v44 = vadd.f32 %v3379_v41, %v3140_v30  ;;  %v3381_v46 = vpop.f32.mrb[41].mxu0  ;;  %v3624_v47 = vpop.f32.mrb[43].mxu1 }
 0x3bf   : > { %v3387_v62 = vadd.f32 %v3381_v46, %v3142_v57  ;;  %v3383_v43 = vpop.f32.mrb[42].mxu0 }
 0x3c0   : > { %v3626_v39 = vadd.f32 %v3619_v40, %v3386_v44  ;;  %v3384_v49 = vpop.f32.mrb[43].mxu0 }
 0x3c1   : > { %v3627_v50 = vadd.f32 %v3621_v12, %v3387_v62 }
 0x3c2   : > { %v3640_v51 = vadd.f32 %v3633_v45, %v3626_v39 }
 0x3c3   : > { %v3641_v52 = vadd.f32 %v3637_v48, %v3627_v50 }
 0x3c4   : > { %v3642_v53 = vmax.f32 %v3640_v51, 0.0 }
 0x3c5   : > { %v3643_v33 = vmax.f32 %v3641_v52, 0.0 }
 0x3c6   : > { %v3644_v34 = vpack.c.bf16 %v3642_v53, %v3642_v53 }
 0x3c7   : > { %v3645_v54 = vpack.c.bf16 %v3643_v33, %v3643_v33 }
 0x3c9   : > { %3883 = vmatprep.mubr.bf16.mxu0 %v3645_v54 }
 0x3ca   : > { %3884 = vmatmul.mubr.bf16.vlgmr.msra.gmra.mrb[44].mxu0 %v3644_v34 }
 0x49d   : > { %v3885_v60 = vpop.f32.mrb[44].mxu0 }
 0x49e   : > { %v3886_v61 = vadd.f32 %v3885_v60, %v3844_v59  ;;  %v3887_v2 = vpop.f32.mrb[45].mxu0 }
 0x49f   : > { %v3888_v23 = vadd.f32 %v3887_v2, %v3848_v16  ;;  %v3889_v0 = vpop.f32.mrb[46].mxu0 }
 0x4a0   : > { %v3892_v3 = vmax.f32 %v3886_v61, 0.0  ;;  %v3890_v5 = vpop.f32.mrb[47].mxu0 }
 0x4a1   : > { %v3893_v6 = vmax.f32 %v3888_v23, 0.0 }
 0x4a2   : > { %v3894_v8 = vpack.c.bf16 %v3892_v3, %v3892_v3 }
 0x4a3   : > { %v3895_v9 = vpack.c.bf16 %v3893_v6, %v3893_v6 }
 0x4a5   : > { %4058 = vmatprep.mubr.bf16.mxu1 %v3895_v9 }
 0x4a6   : > { %4059 = vmatmul.mubr.bf16.vlgmr.msra.gmra.mrb[44].mxu1 %v3894_v8 }
 0x579   : > { %v4983_v63 = vpop.f32.mrb[44].mxu1 }
 0x57a   : > { %v4984_v1 = vpop.f32.mrb[45].mxu1 }
 0x57b   : > { %v4985_v4 = vadd.f32 %v4984_v1, %v4983_v63  ;;  %v4986_v13 = vpop.f32.mrb[46].mxu1 }
 0x57c   : > { %v4987_v10 = vpop.f32.mrb[47].mxu1 }
 0x57d   : > { %v4061_v11 = vadd.f32 %v4985_v4, %v3929_v42 }
 0x57f   : > { %v4067_v7 = vmul.f32 0.01, %v4061_v11 }
 0x581   : > { %4069 = vst.msk [vmem:[%s378_s30] sm:$0x1] %vm4068_vm11, %v4067_v7 }
 0x582   : > { %5660 = shalt.err (!%p5657_p3)
}
 0x583   : > { %s5661_s22 = scalar_lea.hbm %s7328_s13, 16  ;;  %s5665_s30 = scalar_lea.hbm %s7381_s11, 32 }
 0x584   : > { %p5662_p4 = scmp.ne.s32.totalorder %s7328_s13, %s5661_s22  ;;  %p5666_p9 = scmp.lt.u32.totalorder %s7328_s13, %s7381_s11 }
 0x585   : > { %p5667_p10 = scmp.lt.u32.totalorder %s5665_s30, %s5661_s22  ;;  %p5669_p12 = scmp.lt.u32.totalorder %s5661_s22, %s7328_s13 }
 0x586   : > { %p5663_p7 = pnand %p5662_p4, %p5813_p5 }
 0x587   : > { %p5668_p11 = por %p5667_p10, %p5666_p9 }
 0x588   : > { %p5664_p8 = pneg %p5663_p7 }
 0x589   : > { %p5670_p13 = por %p5669_p12, %p5668_p11 }
 0x58b   : > { %p5671_p0 = pnand %p5670_p13, %p5664_p8 }
 0x58d   : > { %5674 = shalt.err (!%p5671_p0)
}
 0x58e   : > { %5097 = dma.vmem_to_hbm [thread:$0]  (%p5813_p5), %s7330_s12, 16, %s7328_s13, %s4071_s14  }
 0x58f PF: > { %p5103_p1 = scmp.ge.s32.totalorder %s5709_s20, 2  ;;  %s4095_s15 = sand.u32 1, %s5697_s17  }
 0x590   : > { %s4096_s21 = scalar_lea.sflag [#allocation3], %s4095_s15 }
 0x591   : > { %p5100_p2 = pnand %p5103_p1, %p5817_p6 }
 0x593   : > { %5692 = dma.done.wait (!%p5100_p2), %s4096_s21, 16  }
 0x594   : > { %5694 = vsyncadd (!%p5100_p2), %s4096_s21, 4294967280  ;;  %p21_p3 = scmp.ge.s32.totalorder %s5800_s23, 4   ;;  %s7390_s17 = smov %s5701_s18 }
 0x595   : > { %s7391_s18 = smov %s5705_s19  ;;  %s7392_s19 = smov %s5811_s26 }
 0x596   : > { %s7393_s20 = smov %s5800_s23  ;;  %23 = sbr.rel (!%p21_p3) target bundleno = 6 (0x6), region = 121 }
 0x59d   :  { %4100 = vsyncpa [#allocation3], 1 }
 0x59e   :  { %4102 = vsyncpa [#allocation3 + $0x1], 1 }

</bundles_post_ra>
